<compile_context>
chip_gen: v6e
topology: v6e:2x2x1
jax: 0.10.0
libtpu: 0.0.40
codegen_flags: <defaults>
</compile_context>

<pallas_src>
import functools

import jax
import jax.numpy as jnp
import numpy as np
from jax.experimental import pallas as pl
from jax.experimental.pallas import tpu as pltpu

# Full f32 matmul precision so kernel and reference agree tightly.
# TODO(synk): for a bandwidth-bound production run (esp. v5e) stream node/edge features as
# bf16 with f32 accumulation and drop this config.
jax.config.update("jax_default_matmul_precision", "highest")

ALPHA = 0.2  # LeakyReLU negative slope


def gat_kernel(nodes_ref, nodes_t_ref, nodes_blk_ref, eft_ref, adj_ref,
               wT_ref, vsrcT_ref, vdst_ref, vedge_ref, o_ref, *,
               alpha, num_heads, out_feats):
    """One grid step computes all heads for a block of TI destination nodes."""
    nodes = nodes_ref[...]          # (N, Din)    all source-node features
    nodes_t = nodes_t_ref[...]      # (Din, N)    transposed copy (lane-dense over sources)
    nodes_blk = nodes_blk_ref[...]  # (TI, Din)   destination-block node features
    eft = eft_ref[...]              # (TI, De, N) edge features of edges * -> dst block
    adj = adj_ref[...]              # (TI, N)     adjacency mask (1.0 = edge src->dst exists)

    # Projections shared across heads (recomputed per block; tiny vs the N^2 edge stream).
    Wh = jnp.dot(nodes, wT_ref[...], preferred_element_type=jnp.float32)          # (N, H*F)
    s_src = jnp.dot(vsrcT_ref[...], nodes_t, preferred_element_type=jnp.float32)  # (H, N)
    s_dst = jnp.dot(nodes_blk, vdst_ref[...], preferred_element_type=jnp.float32) # (TI, H)

    vedge = vedge_ref[...]          # (De, H)
    neg_inf = jnp.float32(-1e30)
    one = jnp.float32(1.0)
    head_outs = []
    for h in range(num_heads):
        # a_edge . (W_e e) folded: s_edge[t, n] = sum_d eft[t, d, n] * v_edge[d, h]
        ve = vedge[:, h:h + 1]                                 # (De, 1), De on sublanes
        s_edge = jnp.sum(eft * ve[None, :, :], axis=1)         # (TI, N) lane-dense over sources

        score = s_edge + s_src[h:h + 1, :] + s_dst[:, h:h + 1]            # (TI, N)
        score = jnp.where(score > 0, score, alpha * score)                # LeakyReLU(alpha)
        score = jnp.where(adj > 0, score, neg_inf)                        # mask non-edges

        # edge_softmax over incoming edges of each destination (lane axis = sources).
        mx = jnp.max(score, axis=-1, keepdims=True)                       # (TI, 1)
        p = jnp.exp(score - mx) * adj                                     # (TI, N)
        denom = jnp.sum(p, axis=-1, keepdims=True)                        # (TI, 1)
        # Exact reciprocal on the tiny (TI,1) column; approx=True was the source of the
        # previous 0.3% mismatch and buys nothing at this size.
        inv = one / jnp.maximum(denom, jnp.float32(1e-30))                # (TI, 1)
        att = p * inv                                                     # (TI, N)
        # TODO(synk): nn.Dropout(0.6) on attention weights omitted (eval-mode identity).

        # message passing on the MXU: (TI, N) @ (N, F)
        head_outs.append(
            jnp.dot(att, Wh[:, h * out_feats:(h + 1) * out_feats],
                    preferred_element_type=jnp.float32))

    h_new = jnp.concatenate(head_outs, axis=-1)                           # (TI, H*F)
    # ELU (concat=True branch), single lane-dense store of the whole block.
    o_ref[...] = jnp.where(h_new > 0, h_new, jnp.exp(h_new) - 1.0)


def _pick_block_rows(n):
    if n % 8 != 0:
        return n  # single full-extent block (allowed by the (8,128) rule)
    for t in (256, 128, 64, 32, 16, 8):
        if n % t == 0:
            return t
    return n


def gat_forward(node_feats, edge_feats_dense, adj, W, W_e, a_src, a_dst, a_edge,
                alpha=ALPHA, block_rows=None):
    """node_feats (N, Din); edge_feats_dense (N_dst, N_src, De); adj (N_dst, N_src);
       W (H*F, Din), W_e (H*F, De) [PyTorch Linear weight layout]; a_* (H, F)."""
    node_feats = node_feats.astype(jnp.float32)
    N, Din = node_feats.shape
    De = edge_feats_dense.shape[-1]
    H, F_out = a_src.shape
    HF = H * F_out

    TI = _pick_block_rows(N) if block_rows is None else block_rows
    assert N % TI == 0 and (TI % 8 == 0 or TI == N), "block_rows must tile N"

    # --- parameter folding (input-independent, fuse attention vectors into weights) ---
    W3 = W.astype(jnp.float32).reshape(H, F_out, Din)
    We3 = W_e.astype(jnp.float32).reshape(H, F_out, De)
    wT = jnp.transpose(W.astype(jnp.float32))                              # (Din, H*F)
    vsrcT = jnp.einsum('hfd,hf->hd', W3, a_src.astype(jnp.float32))        # (H, Din)
    vdst = jnp.einsum('hfd,hf->dh', W3, a_dst.astype(jnp.float32))         # (Din, H)
    vedge = jnp.einsum('hfd,hf->dh', We3, a_edge.astype(jnp.float32))      # (De, H)

    # --- layout plumbing (pure transposes, no hidden compute) -------------------------
    nodes_t = node_feats.T                                                  # (Din, N)
    eft = jnp.transpose(edge_feats_dense.astype(jnp.float32), (0, 2, 1))    # (N, De, N)
    adj_f = adj.astype(jnp.float32)                                         # (N, N)

    out = pl.pallas_call(
        functools.partial(gat_kernel, alpha=alpha, num_heads=H, out_feats=F_out),
        out_shape=jax.ShapeDtypeStruct((N, HF), jnp.float32),
        grid=(N // TI,),
        in_specs=[
            pl.BlockSpec((N, Din), lambda i: (0, 0)),        # all node features (for Wh)
            pl.BlockSpec((Din, N), lambda i: (0, 0)),        # node features^T (for s_src)
            pl.BlockSpec((TI, Din), lambda i: (i, 0)),       # destination-block features (s_dst)
            pl.BlockSpec((TI, De, N), lambda i: (i, 0, 0)),  # edge feats of edges * -> dst block
            pl.BlockSpec((TI, N), lambda i: (i, 0)),         # adjacency rows for dst block
            pl.BlockSpec((Din, HF), lambda i: (0, 0)),       # W^T
            pl.BlockSpec((H, Din), lambda i: (0, 0)),        # folded a_src vectors
            pl.BlockSpec((Din, H), lambda i: (0, 0)),        # folded a_dst vectors
            pl.BlockSpec((De, H), lambda i: (0, 0)),         # folded a_edge vectors
        ],
        out_specs=pl.BlockSpec((TI, HF), lambda i: (i, 0)),
        compiler_params=pltpu.CompilerParams(
            dimension_semantics=("parallel",)),              # stateless blocks -> megacore-safe
    )(node_feats, nodes_t, node_feats, eft, adj_f, wT, vsrcT, vdst, vedge)
    return out


def ref_forward(node_feats, ef_dense, adj, W, W_e, a_src, a_dst, a_edge, alpha=ALPHA):
    """Pure-JAX reference (dense formulation of the DGL module)."""
    N = node_feats.shape[0]
    H, F_out = a_src.shape
    Wh = (node_feats @ W.T).reshape(N, H, F_out)
    We = (ef_dense.reshape(N * N, -1) @ W_e.T).reshape(N, N, H, F_out)
    s_src = jnp.einsum('jhf,hf->jh', Wh, a_src)
    s_dst = jnp.einsum('ihf,hf->ih', Wh, a_dst)
    s_edge = jnp.einsum('ijhf,hf->ijh', We, a_edge)
    score = s_src[None, :, :] + s_dst[:, None, :] + s_edge       # (dst, src, head)
    score = jnp.where(score > 0, score, alpha * score)
    mask = adj[:, :, None] > 0
    score_m = jnp.where(mask, score, -1e30)
    mx = jnp.max(score_m, axis=1, keepdims=True)
    p = jnp.exp(score_m - mx) * adj[:, :, None]
    denom = jnp.sum(p, axis=1, keepdims=True)
    att = p / jnp.maximum(denom, 1e-30)
    h_new = jnp.einsum('ijh,jhf->ihf', att, Wh)
    out = h_new.reshape(N, H * F_out)
    return jnp.where(out > 0, out, jnp.exp(out) - 1.0)


if __name__ == "__main__":
    N, Din, De, F_out, H = 32, 16, 8, 8, 4

    key = jax.random.PRNGKey(0)
    ks = jax.random.split(key, 8)
    gain = 1.414

    def xavier(k, shape, fan_in, fan_out):
        bound = gain * np.sqrt(6.0 / (fan_in + fan_out))
        return jax.random.uniform(k, shape, jnp.float32, -bound, bound)

    # Parameters (same shapes as the nn.Module __init__, deterministic init)
    W = xavier(ks[0], (H * F_out, Din), Din, H * F_out)          # nn.Linear(in_feats, H*F).weight
    W_e = xavier(ks[1], (H * F_out, De), De, H * F_out)          # nn.Linear(edge_feats, H*F).weight
    a_src = xavier(ks[2], (H, F_out, 1), F_out, 1)
    a_dst = xavier(ks[3], (H, F_out, 1), F_out, 1)
    a_edge = xavier(ks[4], (H, F_out, 1), F_out, 1)

    # Inputs: node features, dense edge features, adjacency (self-loops guarantee >=1 in-edge/node)
    h_nodes = jax.random.normal(ks[5], (N, Din), jnp.float32)
    ef_dense = jax.random.normal(ks[6], (N, N, De), jnp.float32)
    adj = (jax.random.uniform(ks[7], (N, N)) < 0.3).astype(jnp.float32)
    adj = jnp.maximum(adj, jnp.eye(N, dtype=jnp.float32))

    out = gat_forward(h_nodes, ef_dense, adj, W, W_e,
                      a_src.squeeze(-1), a_dst.squeeze(-1), a_edge.squeeze(-1),
                      block_rows=16)                             # grid=(2,) destination blocks
    out = jax.block_until_ready(out)

    ref = ref_forward(h_nodes, ef_dense, adj, W, W_e,
                      a_src.squeeze(-1), a_dst.squeeze(-1), a_edge.squeeze(-1))
    np.testing.assert_allclose(np.asarray(out), np.asarray(ref), rtol=2e-3, atol=2e-3)

    print("KERNEL_OK")
</pallas_src>

<mosaic_0001>
module attributes {stable_mosaic.version = 11 : i64} {
  func.func @gat_kernel(%arg0: i32, %arg1: memref<32x16xf32, #tpu.memory_space<vmem>>, %arg2: memref<16x32xf32, #tpu.memory_space<vmem>>, %arg3: memref<16x16xf32, #tpu.memory_space<vmem>>, %arg4: memref<16x8x32xf32, #tpu.memory_space<vmem>>, %arg5: memref<16x32xf32, #tpu.memory_space<vmem>>, %arg6: memref<16x32xf32, #tpu.memory_space<vmem>>, %arg7: memref<4x16xf32, #tpu.memory_space<vmem>>, %arg8: memref<16x4xf32, #tpu.memory_space<vmem>>, %arg9: memref<8x4xf32, #tpu.memory_space<vmem>>, %arg10: memref<16x32xf32, #tpu.memory_space<vmem>>) attributes {dimension_semantics = [#tpu.dimension_semantics<parallel>], iteration_bounds = array<i64: 2>, scalar_prefetch = 0 : i64, scratch_operands = 0 : i64, tpu.core_type = #tpu.core_type<tc>, window_params = [{pipeline_mode = #tpu.pipeline_mode<synchronous>, transform_indices = @transform_0, window_bounds = array<i64: 32, 16>}, {pipeline_mode = #tpu.pipeline_mode<synchronous>, transform_indices = @transform_1, window_bounds = array<i64: 16, 32>}, {transform_indices = @transform_2, window_bounds = array<i64: 16, 16>}, {transform_indices = @transform_3, window_bounds = array<i64: 16, 8, 32>}, {transform_indices = @transform_4, window_bounds = array<i64: 16, 32>}, {pipeline_mode = #tpu.pipeline_mode<synchronous>, transform_indices = @transform_5, window_bounds = array<i64: 16, 32>}, {pipeline_mode = #tpu.pipeline_mode<synchronous>, transform_indices = @transform_6, window_bounds = array<i64: 4, 16>}, {pipeline_mode = #tpu.pipeline_mode<synchronous>, transform_indices = @transform_7, window_bounds = array<i64: 16, 4>}, {pipeline_mode = #tpu.pipeline_mode<synchronous>, transform_indices = @transform_8, window_bounds = array<i64: 8, 4>}, {transform_indices = @transform_9, window_bounds = array<i64: 16, 32>}]} {
    %c0 = arith.constant 0 : index
    %c0_0 = arith.constant 0 : index
    %0 = vector.load %arg1[%c0, %c0_0] : memref<32x16xf32, #tpu.memory_space<vmem>>, vector<32x16xf32>
    %c0_1 = arith.constant 0 : index
    %c0_2 = arith.constant 0 : index
    %1 = vector.load %arg2[%c0_1, %c0_2] : memref<16x32xf32, #tpu.memory_space<vmem>>, vector<16x32xf32>
    %c0_3 = arith.constant 0 : index
    %c0_4 = arith.constant 0 : index
    %2 = vector.load %arg3[%c0_3, %c0_4] : memref<16x16xf32, #tpu.memory_space<vmem>>, vector<16x16xf32>
    %c0_5 = arith.constant 0 : index
    %c0_6 = arith.constant 0 : index
    %c0_7 = arith.constant 0 : index
    %3 = vector.load %arg4[%c0_5, %c0_6, %c0_7] : memref<16x8x32xf32, #tpu.memory_space<vmem>>, vector<16x8x32xf32>
    %c0_8 = arith.constant 0 : index
    %c0_9 = arith.constant 0 : index
    %4 = vector.load %arg5[%c0_8, %c0_9] : memref<16x32xf32, #tpu.memory_space<vmem>>, vector<16x32xf32>
    %c0_10 = arith.constant 0 : index
    %c0_11 = arith.constant 0 : index
    %5 = vector.load %arg6[%c0_10, %c0_11] : memref<16x32xf32, #tpu.memory_space<vmem>>, vector<16x32xf32>
    %cst = arith.constant dense<0.000000e+00> : vector<32x32xf32>
    %6 = tpu.matmul %0, %5, %cst {dimension_numbers = #tpu.dot_dimension_numbers<[1], [0], [0], [1], [0, 0, 1, 1], [], []>, precision = #tpu.contract_precision<fp32>} : vector<32x16xf32>, vector<16x32xf32>, vector<32x32xf32> -> vector<32x32xf32>
    %c0_12 = arith.constant 0 : index
    %c0_13 = arith.constant 0 : index
    %7 = vector.load %arg7[%c0_12, %c0_13] : memref<4x16xf32, #tpu.memory_space<vmem>>, vector<4x16xf32>
    %cst_14 = arith.constant dense<0.000000e+00> : vector<4x32xf32>
    %8 = tpu.matmul %7, %1, %cst_14 {dimension_numbers = #tpu.dot_dimension_numbers<[1], [0], [0], [1], [0, 0, 1, 1], [], []>, precision = #tpu.contract_precision<fp32>} : vector<4x16xf32>, vector<16x32xf32>, vector<4x32xf32> -> vector<4x32xf32>
    %c0_15 = arith.constant 0 : index
    %c0_16 = arith.constant 0 : index
    %9 = vector.load %arg8[%c0_15, %c0_16] : memref<16x4xf32, #tpu.memory_space<vmem>>, vector<16x4xf32>
    %cst_17 = arith.constant dense<0.000000e+00> : vector<16x4xf32>
    %10 = tpu.matmul %2, %9, %cst_17 {dimension_numbers = #tpu.dot_dimension_numbers<[1], [0], [0], [1], [0, 0, 1, 1], [], []>, precision = #tpu.contract_precision<fp32>} : vector<16x16xf32>, vector<16x4xf32>, vector<16x4xf32> -> vector<16x4xf32>
    %c0_18 = arith.constant 0 : index
    %c0_19 = arith.constant 0 : index
    %11 = vector.load %arg9[%c0_18, %c0_19] : memref<8x4xf32, #tpu.memory_space<vmem>>, vector<8x4xf32>
    %12 = vector.extract_strided_slice %11 {offsets = [0, 0], sizes = [8, 1], strides = [1, 1]} : vector<8x4xf32> to vector<8x1xf32>
    %13 = vector.shape_cast %12 : vector<8x1xf32> to vector<1x8x1xf32>
    %14 = vector.broadcast %13 : vector<1x8x1xf32> to vector<16x8x32xf32>
    %15 = arith.mulf %3, %14 : vector<16x8x32xf32>
    %cst_20 = arith.constant dense<0.000000e+00> : vector<16x32xf32>
    %16 = vector.multi_reduction <add>, %15, %cst_20 [1] : vector<16x8x32xf32> to vector<16x32xf32>
    %17 = vector.extract_strided_slice %8 {offsets = [0, 0], sizes = [1, 32], strides = [1, 1]} : vector<4x32xf32> to vector<1x32xf32>
    %18 = vector.broadcast %17 : vector<1x32xf32> to vector<16x32xf32>
    %19 = arith.addf %16, %18 : vector<16x32xf32>
    %20 = vector.extract_strided_slice %10 {offsets = [0, 0], sizes = [16, 1], strides = [1, 1]} : vector<16x4xf32> to vector<16x1xf32>
    %21 = vector.broadcast %20 : vector<16x1xf32> to vector<16x32xf32>
    %22 = arith.addf %19, %21 : vector<16x32xf32>
    %cst_21 = arith.constant 0.000000e+00 : f32
    %23 = vector.broadcast %cst_21 : f32 to vector<16x32xf32>
    %24 = arith.cmpf ogt, %22, %23 : vector<16x32xf32>
    %cst_22 = arith.constant 2.000000e-01 : f32
    %25 = vector.broadcast %cst_22 : f32 to vector<16x32xf32>
    %26 = arith.mulf %25, %22 : vector<16x32xf32>
    %27 = arith.select %24, %22, %26 : vector<16x32xi1>, vector<16x32xf32>
    %cst_23 = arith.constant 0.000000e+00 : f32
    %28 = vector.broadcast %cst_23 : f32 to vector<16x32xf32>
    %29 = arith.cmpf ogt, %4, %28 : vector<16x32xf32>
    %cst_24 = arith.constant -1.000000e+30 : f32
    %30 = vector.broadcast %cst_24 : f32 to vector<16x32xf32>
    %31 = arith.select %29, %27, %30 : vector<16x32xi1>, vector<16x32xf32>
    %cst_25 = arith.constant dense<0xFF800000> : vector<16xf32>
    %32 = vector.multi_reduction <maximumf>, %31, %cst_25 [1] : vector<16x32xf32> to vector<16xf32>
    %33 = vector.shape_cast %32 : vector<16xf32> to vector<16x1xf32>
    %34 = vector.broadcast %33 : vector<16x1xf32> to vector<16x32xf32>
    %35 = arith.subf %31, %34 : vector<16x32xf32>
    %36 = math.exp %35 : vector<16x32xf32>
    %37 = arith.mulf %36, %4 : vector<16x32xf32>
    %cst_26 = arith.constant dense<0.000000e+00> : vector<16xf32>
    %38 = vector.multi_reduction <add>, %37, %cst_26 [1] : vector<16x32xf32> to vector<16xf32>
    %39 = vector.shape_cast %38 : vector<16xf32> to vector<16x1xf32>
    %cst_27 = arith.constant 1.000000e-30 : f32
    %40 = vector.broadcast %cst_27 : f32 to vector<16x1xf32>
    %41 = arith.maximumf %39, %40 : vector<16x1xf32>
    %cst_28 = arith.constant 1.000000e+00 : f32
    %42 = vector.broadcast %cst_28 : f32 to vector<16x1xf32>
    %43 = arith.divf %42, %41 : vector<16x1xf32>
    %44 = vector.broadcast %43 : vector<16x1xf32> to vector<16x32xf32>
    %45 = arith.mulf %37, %44 : vector<16x32xf32>
    %46 = vector.extract_strided_slice %6 {offsets = [0, 0], sizes = [32, 8], strides = [1, 1]} : vector<32x32xf32> to vector<32x8xf32>
    %cst_29 = arith.constant dense<0.000000e+00> : vector<16x8xf32>
    %47 = tpu.matmul %45, %46, %cst_29 {dimension_numbers = #tpu.dot_dimension_numbers<[1], [0], [0], [1], [0, 0, 1, 1], [], []>, precision = #tpu.contract_precision<fp32>} : vector<16x32xf32>, vector<32x8xf32>, vector<16x8xf32> -> vector<16x8xf32>
    %48 = vector.extract_strided_slice %11 {offsets = [0, 1], sizes = [8, 1], strides = [1, 1]} : vector<8x4xf32> to vector<8x1xf32>
    %49 = vector.shape_cast %48 : vector<8x1xf32> to vector<1x8x1xf32>
    %50 = vector.broadcast %49 : vector<1x8x1xf32> to vector<16x8x32xf32>
    %51 = arith.mulf %3, %50 : vector<16x8x32xf32>
    %cst_30 = arith.constant dense<0.000000e+00> : vector<16x32xf32>
    %52 = vector.multi_reduction <add>, %51, %cst_30 [1] : vector<16x8x32xf32> to vector<16x32xf32>
    %53 = vector.extract_strided_slice %8 {offsets = [1, 0], sizes = [1, 32], strides = [1, 1]} : vector<4x32xf32> to vector<1x32xf32>
    %54 = vector.broadcast %53 : vector<1x32xf32> to vector<16x32xf32>
    %55 = arith.addf %52, %54 : vector<16x32xf32>
    %56 = vector.extract_strided_slice %10 {offsets = [0, 1], sizes = [16, 1], strides = [1, 1]} : vector<16x4xf32> to vector<16x1xf32>
    %57 = vector.broadcast %56 : vector<16x1xf32> to vector<16x32xf32>
    %58 = arith.addf %55, %57 : vector<16x32xf32>
    %cst_31 = arith.constant 0.000000e+00 : f32
    %59 = vector.broadcast %cst_31 : f32 to vector<16x32xf32>
    %60 = arith.cmpf ogt, %58, %59 : vector<16x32xf32>
    %cst_32 = arith.constant 2.000000e-01 : f32
    %61 = vector.broadcast %cst_32 : f32 to vector<16x32xf32>
    %62 = arith.mulf %61, %58 : vector<16x32xf32>
    %63 = arith.select %60, %58, %62 : vector<16x32xi1>, vector<16x32xf32>
    %cst_33 = arith.constant 0.000000e+00 : f32
    %64 = vector.broadcast %cst_33 : f32 to vector<16x32xf32>
    %65 = arith.cmpf ogt, %4, %64 : vector<16x32xf32>
    %cst_34 = arith.constant -1.000000e+30 : f32
    %66 = vector.broadcast %cst_34 : f32 to vector<16x32xf32>
    %67 = arith.select %65, %63, %66 : vector<16x32xi1>, vector<16x32xf32>
    %cst_35 = arith.constant dense<0xFF800000> : vector<16xf32>
    %68 = vector.multi_reduction <maximumf>, %67, %cst_35 [1] : vector<16x32xf32> to vector<16xf32>
    %69 = vector.shape_cast %68 : vector<16xf32> to vector<16x1xf32>
    %70 = vector.broadcast %69 : vector<16x1xf32> to vector<16x32xf32>
    %71 = arith.subf %67, %70 : vector<16x32xf32>
    %72 = math.exp %71 : vector<16x32xf32>
    %73 = arith.mulf %72, %4 : vector<16x32xf32>
    %cst_36 = arith.constant dense<0.000000e+00> : vector<16xf32>
    %74 = vector.multi_reduction <add>, %73, %cst_36 [1] : vector<16x32xf32> to vector<16xf32>
    %75 = vector.shape_cast %74 : vector<16xf32> to vector<16x1xf32>
    %cst_37 = arith.constant 1.000000e-30 : f32
    %76 = vector.broadcast %cst_37 : f32 to vector<16x1xf32>
    %77 = arith.maximumf %75, %76 : vector<16x1xf32>
    %cst_38 = arith.constant 1.000000e+00 : f32
    %78 = vector.broadcast %cst_38 : f32 to vector<16x1xf32>
    %79 = arith.divf %78, %77 : vector<16x1xf32>
    %80 = vector.broadcast %79 : vector<16x1xf32> to vector<16x32xf32>
    %81 = arith.mulf %73, %80 : vector<16x32xf32>
    %82 = vector.extract_strided_slice %6 {offsets = [0, 8], sizes = [32, 8], strides = [1, 1]} : vector<32x32xf32> to vector<32x8xf32>
    %cst_39 = arith.constant dense<0.000000e+00> : vector<16x8xf32>
    %83 = tpu.matmul %81, %82, %cst_39 {dimension_numbers = #tpu.dot_dimension_numbers<[1], [0], [0], [1], [0, 0, 1, 1], [], []>, precision = #tpu.contract_precision<fp32>} : vector<16x32xf32>, vector<32x8xf32>, vector<16x8xf32> -> vector<16x8xf32>
    %84 = vector.extract_strided_slice %11 {offsets = [0, 2], sizes = [8, 1], strides = [1, 1]} : vector<8x4xf32> to vector<8x1xf32>
    %85 = vector.shape_cast %84 : vector<8x1xf32> to vector<1x8x1xf32>
    %86 = vector.broadcast %85 : vector<1x8x1xf32> to vector<16x8x32xf32>
    %87 = arith.mulf %3, %86 : vector<16x8x32xf32>
    %cst_40 = arith.constant dense<0.000000e+00> : vector<16x32xf32>
    %88 = vector.multi_reduction <add>, %87, %cst_40 [1] : vector<16x8x32xf32> to vector<16x32xf32>
    %89 = vector.extract_strided_slice %8 {offsets = [2, 0], sizes = [1, 32], strides = [1, 1]} : vector<4x32xf32> to vector<1x32xf32>
    %90 = vector.broadcast %89 : vector<1x32xf32> to vector<16x32xf32>
    %91 = arith.addf %88, %90 : vector<16x32xf32>
    %92 = vector.extract_strided_slice %10 {offsets = [0, 2], sizes = [16, 1], strides = [1, 1]} : vector<16x4xf32> to vector<16x1xf32>
    %93 = vector.broadcast %92 : vector<16x1xf32> to vector<16x32xf32>
    %94 = arith.addf %91, %93 : vector<16x32xf32>
    %cst_41 = arith.constant 0.000000e+00 : f32
    %95 = vector.broadcast %cst_41 : f32 to vector<16x32xf32>
    %96 = arith.cmpf ogt, %94, %95 : vector<16x32xf32>
    %cst_42 = arith.constant 2.000000e-01 : f32
    %97 = vector.broadcast %cst_42 : f32 to vector<16x32xf32>
    %98 = arith.mulf %97, %94 : vector<16x32xf32>
    %99 = arith.select %96, %94, %98 : vector<16x32xi1>, vector<16x32xf32>
    %cst_43 = arith.constant 0.000000e+00 : f32
    %100 = vector.broadcast %cst_43 : f32 to vector<16x32xf32>
    %101 = arith.cmpf ogt, %4, %100 : vector<16x32xf32>
    %cst_44 = arith.constant -1.000000e+30 : f32
    %102 = vector.broadcast %cst_44 : f32 to vector<16x32xf32>
    %103 = arith.select %101, %99, %102 : vector<16x32xi1>, vector<16x32xf32>
    %cst_45 = arith.constant dense<0xFF800000> : vector<16xf32>
    %104 = vector.multi_reduction <maximumf>, %103, %cst_45 [1] : vector<16x32xf32> to vector<16xf32>
    %105 = vector.shape_cast %104 : vector<16xf32> to vector<16x1xf32>
    %106 = vector.broadcast %105 : vector<16x1xf32> to vector<16x32xf32>
    %107 = arith.subf %103, %106 : vector<16x32xf32>
    %108 = math.exp %107 : vector<16x32xf32>
    %109 = arith.mulf %108, %4 : vector<16x32xf32>
    %cst_46 = arith.constant dense<0.000000e+00> : vector<16xf32>
    %110 = vector.multi_reduction <add>, %109, %cst_46 [1] : vector<16x32xf32> to vector<16xf32>
    %111 = vector.shape_cast %110 : vector<16xf32> to vector<16x1xf32>
    %cst_47 = arith.constant 1.000000e-30 : f32
    %112 = vector.broadcast %cst_47 : f32 to vector<16x1xf32>
    %113 = arith.maximumf %111, %112 : vector<16x1xf32>
    %cst_48 = arith.constant 1.000000e+00 : f32
    %114 = vector.broadcast %cst_48 : f32 to vector<16x1xf32>
    %115 = arith.divf %114, %113 : vector<16x1xf32>
    %116 = vector.broadcast %115 : vector<16x1xf32> to vector<16x32xf32>
    %117 = arith.mulf %109, %116 : vector<16x32xf32>
    %118 = vector.extract_strided_slice %6 {offsets = [0, 16], sizes = [32, 8], strides = [1, 1]} : vector<32x32xf32> to vector<32x8xf32>
    %cst_49 = arith.constant dense<0.000000e+00> : vector<16x8xf32>
    %119 = tpu.matmul %117, %118, %cst_49 {dimension_numbers = #tpu.dot_dimension_numbers<[1], [0], [0], [1], [0, 0, 1, 1], [], []>, precision = #tpu.contract_precision<fp32>} : vector<16x32xf32>, vector<32x8xf32>, vector<16x8xf32> -> vector<16x8xf32>
    %120 = vector.extract_strided_slice %11 {offsets = [0, 3], sizes = [8, 1], strides = [1, 1]} : vector<8x4xf32> to vector<8x1xf32>
    %121 = vector.shape_cast %120 : vector<8x1xf32> to vector<1x8x1xf32>
    %122 = vector.broadcast %121 : vector<1x8x1xf32> to vector<16x8x32xf32>
    %123 = arith.mulf %3, %122 : vector<16x8x32xf32>
    %cst_50 = arith.constant dense<0.000000e+00> : vector<16x32xf32>
    %124 = vector.multi_reduction <add>, %123, %cst_50 [1] : vector<16x8x32xf32> to vector<16x32xf32>
    %125 = vector.extract_strided_slice %8 {offsets = [3, 0], sizes = [1, 32], strides = [1, 1]} : vector<4x32xf32> to vector<1x32xf32>
    %126 = vector.broadcast %125 : vector<1x32xf32> to vector<16x32xf32>
    %127 = arith.addf %124, %126 : vector<16x32xf32>
    %128 = vector.extract_strided_slice %10 {offsets = [0, 3], sizes = [16, 1], strides = [1, 1]} : vector<16x4xf32> to vector<16x1xf32>
    %129 = vector.broadcast %128 : vector<16x1xf32> to vector<16x32xf32>
    %130 = arith.addf %127, %129 : vector<16x32xf32>
    %cst_51 = arith.constant 0.000000e+00 : f32
    %131 = vector.broadcast %cst_51 : f32 to vector<16x32xf32>
    %132 = arith.cmpf ogt, %130, %131 : vector<16x32xf32>
    %cst_52 = arith.constant 2.000000e-01 : f32
    %133 = vector.broadcast %cst_52 : f32 to vector<16x32xf32>
    %134 = arith.mulf %133, %130 : vector<16x32xf32>
    %135 = arith.select %132, %130, %134 : vector<16x32xi1>, vector<16x32xf32>
    %cst_53 = arith.constant 0.000000e+00 : f32
    %136 = vector.broadcast %cst_53 : f32 to vector<16x32xf32>
    %137 = arith.cmpf ogt, %4, %136 : vector<16x32xf32>
    %cst_54 = arith.constant -1.000000e+30 : f32
    %138 = vector.broadcast %cst_54 : f32 to vector<16x32xf32>
    %139 = arith.select %137, %135, %138 : vector<16x32xi1>, vector<16x32xf32>
    %cst_55 = arith.constant dense<0xFF800000> : vector<16xf32>
    %140 = vector.multi_reduction <maximumf>, %139, %cst_55 [1] : vector<16x32xf32> to vector<16xf32>
    %141 = vector.shape_cast %140 : vector<16xf32> to vector<16x1xf32>
    %142 = vector.broadcast %141 : vector<16x1xf32> to vector<16x32xf32>
    %143 = arith.subf %139, %142 : vector<16x32xf32>
    %144 = math.exp %143 : vector<16x32xf32>
    %145 = arith.mulf %144, %4 : vector<16x32xf32>
    %cst_56 = arith.constant dense<0.000000e+00> : vector<16xf32>
    %146 = vector.multi_reduction <add>, %145, %cst_56 [1] : vector<16x32xf32> to vector<16xf32>
    %147 = vector.shape_cast %146 : vector<16xf32> to vector<16x1xf32>
    %cst_57 = arith.constant 1.000000e-30 : f32
    %148 = vector.broadcast %cst_57 : f32 to vector<16x1xf32>
    %149 = arith.maximumf %147, %148 : vector<16x1xf32>
    %cst_58 = arith.constant 1.000000e+00 : f32
    %150 = vector.broadcast %cst_58 : f32 to vector<16x1xf32>
    %151 = arith.divf %150, %149 : vector<16x1xf32>
    %152 = vector.broadcast %151 : vector<16x1xf32> to vector<16x32xf32>
    %153 = arith.mulf %145, %152 : vector<16x32xf32>
    %154 = vector.extract_strided_slice %6 {offsets = [0, 24], sizes = [32, 8], strides = [1, 1]} : vector<32x32xf32> to vector<32x8xf32>
    %cst_59 = arith.constant dense<0.000000e+00> : vector<16x8xf32>
    %155 = tpu.matmul %153, %154, %cst_59 {dimension_numbers = #tpu.dot_dimension_numbers<[1], [0], [0], [1], [0, 0, 1, 1], [], []>, precision = #tpu.contract_precision<fp32>} : vector<16x32xf32>, vector<32x8xf32>, vector<16x8xf32> -> vector<16x8xf32>
    %156 = tpu.concatenate %47, %83, %119, %155 in 1 : vector<16x8xf32>, vector<16x8xf32>, vector<16x8xf32>, vector<16x8xf32> -> vector<16x32xf32>
    %cst_60 = arith.constant 0.000000e+00 : f32
    %157 = vector.broadcast %cst_60 : f32 to vector<16x32xf32>
    %158 = arith.cmpf ogt, %156, %157 : vector<16x32xf32>
    %159 = math.exp %156 : vector<16x32xf32>
    %cst_61 = arith.constant 1.000000e+00 : f32
    %160 = vector.broadcast %cst_61 : f32 to vector<16x32xf32>
    %161 = arith.subf %159, %160 : vector<16x32xf32>
    %162 = arith.select %158, %156, %161 : vector<16x32xi1>, vector<16x32xf32>
    %c0_62 = arith.constant 0 : index
    %c0_63 = arith.constant 0 : index
    %163 = vector.load %arg10[%c0_62, %c0_63] : memref<16x32xf32, #tpu.memory_space<vmem>>, vector<16x32xf32>
    tpu.vector_store %arg10[%c0_62, %c0_63], %162 {strides = array<i32>} : memref<16x32xf32, #tpu.memory_space<vmem>>, vector<16x32xf32>,
    return
  }
  func.func @transform_0(%arg0: i32) -> (i32, i32) {
    %c0_i32 = arith.constant 0 : i32
    %c0_i32_0 = arith.constant 0 : i32
    %c0_i32_1 = arith.constant 0 : i32
    return %c0_i32, %c0_i32_0 : i32, i32
  }
  func.func @transform_1(%arg0: i32) -> (i32, i32) {
    %c0_i32 = arith.constant 0 : i32
    %c0_i32_0 = arith.constant 0 : i32
    %c0_i32_1 = arith.constant 0 : i32
    return %c0_i32, %c0_i32_0 : i32, i32
  }
  func.func @transform_2(%arg0: i32) -> (i32, i32) {
    %c0_i32 = arith.constant 0 : i32
    %c0_i32_0 = arith.constant 0 : i32
    return %arg0, %c0_i32 : i32, i32
  }
  func.func @transform_3(%arg0: i32) -> (i32, i32, i32) {
    %c0_i32 = arith.constant 0 : i32
    %c0_i32_0 = arith.constant 0 : i32
    %c0_i32_1 = arith.constant 0 : i32
    return %arg0, %c0_i32, %c0_i32_0 : i32, i32, i32
  }
  func.func @transform_4(%arg0: i32) -> (i32, i32) {
    %c0_i32 = arith.constant 0 : i32
    %c0_i32_0 = arith.constant 0 : i32
    return %arg0, %c0_i32 : i32, i32
  }
  func.func @transform_5(%arg0: i32) -> (i32, i32) {
    %c0_i32 = arith.constant 0 : i32
    %c0_i32_0 = arith.constant 0 : i32
    %c0_i32_1 = arith.constant 0 : i32
    return %c0_i32, %c0_i32_0 : i32, i32
  }
  func.func @transform_6(%arg0: i32) -> (i32, i32) {
    %c0_i32 = arith.constant 0 : i32
    %c0_i32_0 = arith.constant 0 : i32
    %c0_i32_1 = arith.constant 0 : i32
    return %c0_i32, %c0_i32_0 : i32, i32
  }
  func.func @transform_7(%arg0: i32) -> (i32, i32) {
    %c0_i32 = arith.constant 0 : i32
    %c0_i32_0 = arith.constant 0 : i32
    %c0_i32_1 = arith.constant 0 : i32
    return %c0_i32, %c0_i32_0 : i32, i32
  }
  func.func @transform_8(%arg0: i32) -> (i32, i32) {
    %c0_i32 = arith.constant 0 : i32
    %c0_i32_0 = arith.constant 0 : i32
    %c0_i32_1 = arith.constant 0 : i32
    return %c0_i32, %c0_i32_0 : i32, i32
  }
  func.func @transform_9(%arg0: i32) -> (i32, i32) {
    %c0_i32 = arith.constant 0 : i32
    %c0_i32_0 = arith.constant 0 : i32
    return %arg0, %c0_i32 : i32, i32
  }
}

</mosaic_0001>

<bundles_post_ra>
// kernel: tpu_custom_call.1
= control target key start
LH: loop header
LB: loop body
LE: loop exit
PB: predicated region body
PF: predicated region fallthrough
CT: control target
= control target key end

     0   :  { %14 = vsyncpa [#allocation3], 0  ;;  %s8232_s0 = inlined_call_operand.vmem [shape: f32[32,16], index: 0, kind: input, shape index: {}]   ;;  %s8233_s1 = inlined_call_operand.vmem [shape: f32[16,32], index: 1, kind: input, shape index: {}]   ;;  %s8234_s2 = inlined_call_operand.vmem [shape: f32[32,16], index: 2, kind: input, shape index: {}]   ;;  %s8235_s3 = inlined_call_operand.hbm [shape: f32[32,8,32], index: 3, kind: input, shape index: {}]   ;;  %s8236_s4 = inlined_call_operand.vmem [shape: f32[32,32], index: 4, kind: input, shape index: {}]   ;;  %s8237_s5 = inlined_call_operand.vmem [shape: f32[16,32], index: 5, kind: input, shape index: {}]   ;;  %s8238_s6 = inlined_call_operand.vmem [shape: f32[4,16], index: 6, kind: input, shape index: {}]   ;;  %s8239_s7 = inlined_call_operand.vmem [shape: f32[16,4], index: 7, kind: input, shape index: {}]   ;;  %s8240_s8 = inlined_call_operand.vmem [shape: f32[8,4], index: 8, kind: input, shape index: {}]   ;;  %s8241_s9 = inlined_call_operand.hbm [shape: f32[32,32], index: 9, kind: output, shape index: {}]  }
   0x1   :  { %16 = vsyncpa [#allocation3 + $0x1], 0 }
   0x2   :  { %17 = vsyncpa [#allocation4], 0 }
   0x3   :  { %19 = vsyncpa [#allocation4 + $0x1], 0  ;;  %s6589_s30 = smov 0   ;;  %s6591_s10 = smov 0  }
   0x4   :  { %s6593_s11 = smov 0   ;;  %s6595_s12 = smov 0  }
   0x5 LB: > { %8288 = sst [smem:[#allocation8_spill]] %s6516_s11  ;;  %s6610_s13 = sadd.s32 4294967295, %s6520_s12   ;;  %s6520_s12 = sphi %s6595_s12, %s8437_s12   ;;  %s6516_s11 = sphi %s6593_s11, %s8434_s11   ;;  %s6512_s10 = sphi %s6591_s10, %s8436_s10   ;;  %s6508_s30 = sphi %s6589_s30, %s8435_s30  }
   0x6   : > { %s5656_s14 = sadd.s32 4294967294, %s6520_s12   ;;  %s6614_s15 = sadd.s32 1, %s6520_s12  }
   0x7   : > { %s100_s16 = sadd.s32 1, %s6516_s11  ;;  %s97_s17 = ssub.s32 %s6520_s12, %s6614_s15 }
   0x8   : > { %p107_p0 = scmp.ne.s32.totalorder %s6516_s11, %s6512_s10  ;;  %p98_p1 = scmp.eq.s32.totalorder %s97_s17, 0 }
   0x9   : > { %p108_p2 = scmp.eq.s32.totalorder %s6520_s12, 0  ;;  %p113_p3 = scmp.ne.s32.totalorder %s6512_s10, %s6508_s30 }
   0xa   : > { %p114_p4 = scmp.eq.s32.totalorder %s6610_s13, 0  ;;  %p247_p7 = scmp.eq.s32.totalorder %s6610_s13, 1 }
   0xb   : > { %s6626_s18 = scalar_select %p98_p1, %s6516_s11, %s100_s16  }
   0xc   : > { %p6628_p5 = por %p108_p2, %p107_p0  ;;  %p6632_p6 = por %p114_p4, %p113_p3 }
   0xd   : > { %8289 = sst [smem:[#allocation9_spill]] %s6626_s18  ;;  %p253_p8 = scmp.eq.s32.totalorder %s5656_s14, 1 }
   0xe   : > { %s8291_s20 = scalar_select %p6632_p6, 1, 0 }
   0xf   : > { %p6320_p10 = scmp.lt.s32.totalorder %s6520_s12, 2  ;;  %p6639_p11 = por %p247_p7, %p107_p0 }
  0x10   : > { %p6643_p12 = por %p253_p8, %p113_p3  ;;  %s300_s23 = sand.u32 1, %s6516_s11  }
  0x11   : > { %s8292_s21 = scalar_select %p6639_p11, 1, 0 }
  0x12   : > { %s8293_s22 = scalar_select %p6643_p12, 1, 0 }
  0x13   : > { %s5676_s24 = sshll.u32 %s6520_s12, 11  ;;  %s5659_s25 = sshll.u32 %s300_s23, 7 }
  0x14   : > { %s6652_s28 = scalar_lea.hbm %s8235_s3, %s5676_s24  ;;  %s304_s29 = scalar_lea.vmem [#allocation2], %s5659_s25 }
  0x15   : > { %s311_s14 = sshll.u32 %s304_s29, 4  ;;  %p6656_p13 = pnand %p6320_p10, %p6628_p5  ;;  %s6660_s14 = int_to_ptr.vmem [resolvable:$true] %s311_s14 }
  0x16   : > { %s6662_s17 = scalar_lea.sflag [#allocation3], %s300_s23  ;;  %s6428_s18 = scalar_lea.hbm %s6652_s28, 2048 }
  0x17   : > { %p6429_p0 = scmp.ne.s32.totalorder %s6652_s28, %s6428_s18  ;;  %p6430_p1 = pneg %p6656_p13 }
  0x18   : > { %s6433_s25 = scalar_lea.hbm %s8235_s3, 4096  ;;  %p6434_p4 = scmp.lt.s32.totalorder %s6652_s28, %s8235_s3 }
  0x19   : > { %p6431_p2 = pnand %p6430_p1, %p6429_p0  ;;  %p6435_p5 = scmp.lt.s32.totalorder %s6433_s25, %s6428_s18 }
  0x1b   : > { %p6432_p3 = pneg %p6431_p2  ;;  %p6436_p7 = por %p6435_p5, %p6434_p4 }
  0x1d   : > { %p6437_p8 = pnand %p6436_p7, %p6432_p3 }
  0x1f   : > { %6440 = shalt.err (!%p6437_p8)
}
  0x20   : > { %s6441_s23 = scalar_lea.vmem %s6660_s14, 2048  ;;  %s6522_s29 = smov [#allocation2]  }
  0x21   : > { %p6442_p10 = scmp.ne.s32.totalorder %s6660_s14, %s6441_s23  ;;  %s6446_s11 = sshll.u32 %s6522_s29, 4  ;;  %s6447_s11 = int_to_ptr.vmem [resolvable:$false] %s6446_s11 }
  0x22   : > { %s6448_s24 = scalar_lea.vmem %s6447_s11, 4096  ;;  %p6449_p2 = scmp.lt.s32.totalorder %s6660_s14, %s6447_s11 }
  0x23   : > { %p6444_p9 = pnand %p6442_p10, %p6430_p1  ;;  %p6450_p12 = scmp.lt.s32.totalorder %s6448_s24, %s6441_s23 }
  0x25   : > { %p6445_p0 = pneg %p6444_p9  ;;  %p6451_p11 = por %p6450_p12, %p6449_p2 }
  0x27   : > { %p6452_p6 = pnand %p6451_p11, %p6445_p0 }
  0x29   : > { %6455 = shalt.err (!%p6452_p6)
}
  0x2a   : > { %s6523_s18 = smov 128   ;;  %s6524_s26 = smov 8  }
  0x2b   : > { %6315 = dma.hbm_to_vmem [thread:$0]  (!%p6656_p13), %s6652_s28, 2048, %s6660_s14, %s6662_s17, %s6523_s18, %s6523_s18, %s6524_s26  }
  0x2c   : > { %p5662_p9 = scmp.ge.s32.totalorder %s6520_s12, 1  ;;  %p328_p1 = scmp.lt.s32.totalorder %s6520_s12, 3 }
  0x2e   : > { %p329_p3 = pnand %p5662_p9, %p328_p1 }
  0x30   : > { %332 = sbr.rel (%p329_p3) target bundleno = 1375 (0x55f), region = 56 }
  0x35   : > { %s6686_s11 = sand.u32 1, %s6512_s10   ;;  %p8295_p6 = scmp.ne.s32.totalorder %s8291_s20, 0 }
  0x36   : > { %s5663_s25 = sshll.u32 %s6686_s11, 7  ;;  %s335_s19 = scalar_lea.sflag [#allocation3], %s6686_s11 }
  0x37   : > { %s6690_s27 = scalar_lea.vmem [#allocation2], %s5663_s25 }
  0x38   : > { %6499 = dma.done.wait (%p8295_p6), %s335_s19, 2048  }
  0x39   : > { %6501 = vsyncadd (%p8295_p6), %s335_s19, 4294965248  ;;  %v6525_v0 = vmov 0   ;;  %vm8284_vm0 = vcmask 130048   ;;  %v424_v1 = vld [vmem:[%s8237_s5 + $0x8] sm:$0xff]  ;;  %v423_v2 = vld [vmem:[%s8237_s5] sm:$0xff]  ;;  %s5665_s23 = sshll.u32 %s6610_s13, 1 }
  0x3a   : > { %6369 = vset.pattern.permute.xlu0 %v6525_v0  ;;  %6370 = vset.pattern.permute.xlu1 %v6525_v0  ;;  %v397_v3 = vld [vmem:[%s8232_s0] sm:$0xff]  ;;  %v6705_v4 = vand.u32 4294901760, %v424_v1  ;;  %v6707_v5 = vand.u32 4294901760, %v423_v2  ;;  %v398_v7 = vld [vmem:[%s8232_s0 + $0x8] sm:$0xff]  ;;  %v399_v8 = vld [vmem:[%s8232_s0 + $0x10] sm:$0xff]  ;;  %p384_p11 = scmp.lt.s32.totalorder %s5665_s23, 3 }
  0x3b   : > { %v427_v6 = vsel %vm8284_vm0, %v397_v3, 0  ;;  %v400_v9 = vld [vmem:[%s8232_s0 + $0x18] sm:$0xff]  ;;  %v430_v11 = vsel %vm8284_vm0, %v398_v7, 0  ;;  %v433_v12 = vsel %vm8284_vm0, %v399_v8, 0  ;;  %v6741_v20 = vld [vmem:[%s8240_s8] sm:$0xff]  ;;  %v402_v37 = vld [vmem:[%s8233_s1 + $0x8] sm:$0xff] }
  0x3c   : > { %v6719_v10 = vand.u32 4294901760, %v427_v6  ;;  %v436_v13 = vsel %vm8284_vm0, %v400_v9, 0  ;;  %5900 = vmatprep.subr.mxu0 %v6705_v4  ;;  %v575_v14 = vsub.f32 %v424_v1, %v6705_v4  ;;  %v6726_v15 = vand.u32 4294901760, %v430_v11  ;;  %2002 = vperm.xlu0 %6369, %v6741_v20   ;;  %v1026_v41 = vld [vmem:[%s8238_s6] sm:$0xf]  ;;  %s8439_s23 = smov (!%p384_p11, %s5665_s23), 3 }
  0x3d   : > { %v582_v16 = vsub.f32 %v423_v2, %v6707_v5  ;;  %v6729_v17 = vand.u32 4294901760, %v433_v12  ;;  %5901 = vmatpush3.msra.mxu0 %v6705_v4  ;;  %v6736_v19 = vand.u32 4294901760, %v436_v13  ;;  %v6769_v43 = vand.u32 4294901760, %v402_v37  ;;  %v401_v45 = vld [vmem:[%s8233_s1] sm:$0xff]  ;;  %s5666_s26 = sshll.u32 %s8439_s23, 3  ;;  %v1490_v62 = vld [vmem:[%s8239_s7 + $0x8] sm:$0xff] }
  0x3e   : > { %v6733_v18 = vsub.f32 %v427_v6, %v6719_v10  ;;  %5914 = vmatprep.mubr.f32.mxu1 %v6719_v10  ;;  %5902 = vmatprep.subr.mxu0 %v6707_v5  ;;  %v576_v21 = vand.u32 4294901760, %v575_v14  ;;  %v516_v22 = vsub.f32 %v430_v11, %v6726_v15  ;;  %v1028_v46 = vsel %vm8284_vm0, %v1026_v41, 0  ;;  %s387_s28 = scalar_lea.vmem %s8234_s2, %s5666_s26  ;;  %v1489_v0 = vld [vmem:[%s8239_s7] sm:$0xff]  ;;  %s7215_s18 = scalar_lea.vmem %s8236_s4, %s5666_s26 }
  0x3f   : > { %v6745_v23 = vand.u32 4294901760, %v582_v16  ;;  %v6748_v24 = vsub.f32 %v433_v12, %v6729_v17  ;;  %5903 = vmatpush3.msra.mxu0 %v6707_v5  ;;  %v6754_v26 = vsub.f32 %v436_v13, %v6736_v19  ;;  %v6779_v47 = vsub.f32 %v402_v37, %v6769_v43  ;;  %v403_v56 = vld [vmem:[%s387_s28] sm:$0xff]  ;;  %v404_v59 = vld [vmem:[%s387_s28 + $0x8] sm:$0xff]  ;;  %s6532_s23 = smov 112   ;;  %s6533_s26 = smov 104  }
  0x40   : > { %v507_v25 = vand.u32 4294901760, %v6733_v18  ;;  %v577_v27 = vsub.f32 %v575_v14, %v576_v21  ;;  %v517_v28 = vand.u32 4294901760, %v516_v22  ;;  %5920 = vmatprep.subr.mxu0 %v575_v14  ;;  %v6781_v48 = vand.u32 4294901760, %v401_v45  ;;  %s6534_s25 = smov 8   ;;  %s6535_s19 = smov 16  }
  0x41   : > { %v584_v29 = vsub.f32 %v582_v16, %v6745_v23  ;;  %v527_v30 = vand.u32 4294901760, %v6748_v24  ;;  %v537_v32 = vand.u32 4294901760, %v6754_v26  ;;  %v6783_v49 = vand.u32 4294901760, %v1028_v46  ;;  %s6536_s28 = smov 24   ;;  %s5664_s14 = sshll.u32 %s6686_s11, 4 }
  0x42   : > { %v508_v31 = vsub.f32 %v6733_v18, %v507_v25  ;;  %v578_v33 = vand.u32 4294901760, %v577_v27  ;;  %v518_v34 = vsub.f32 %v516_v22, %v517_v28  ;;  %v1138_v50 = vand.u32 4294901760, %v6779_v47  ;;  %s382_s16 = scalar_lea.vmem [#allocation5], %s5664_s14  ;;  %s5677_s29 = sshll.u32 %s6610_s13, 8 }
  0x43   : > { %v585_v35 = vand.u32 4294901760, %v584_v29  ;;  %v528_v36 = vsub.f32 %v6748_v24, %v527_v30  ;;  %v538_v39 = vsub.f32 %v6754_v26, %v537_v32  ;;  %v6794_v51 = vsub.f32 %v401_v45, %v6781_v48  ;;  %s5559_s17 = sshll.u32 %s382_s16, 4  ;;  %s5546_s13 = scalar_lea.sflag [#allocation4], %s6686_s11  ;;  %s8181_s17 = int_to_ptr.vmem [resolvable:$true] %s5559_s17 }
  0x44   : > { %v509_v38 = vand.u32 4294901760, %v508_v31  ;;  %5910 = vmatprep.subr.mxu1 %v578_v33  ;;  %v519_v40 = vand.u32 4294901760, %v518_v34  ;;  %v6797_v52 = vsub.f32 %v1028_v46, %v6783_v49  ;;  %v1139_v53 = vsub.f32 %v6779_v47, %v1138_v50  ;;  %p8430_p13 = scmp.ne.s32.totalorder %s8292_s21, 0 }
  0x45   : > { %5911 = vmatpush3.msra.mxu1 %v578_v33  ;;  %v529_v42 = vand.u32 4294901760, %v528_v36  ;;  %v539_v44 = vand.u32 4294901760, %v538_v39  ;;  %v1145_v54 = vand.u32 4294901760, %v6794_v51  ;;  %v6526_v60 = vmov 0.0  }
  0x46   : > { %5904 = vmatprep.mubr.f32.mxu0 %v509_v38  ;;  %5912 = vmatprep.subr.mxu1 %v585_v35  ;;  %v1099_v55 = vand.u32 4294901760, %v6797_v52  ;;  %v1140_v57 = vand.u32 4294901760, %v1139_v53  ;;  %v1492_v63 = vsel %vm8284_vm0, %v403_v56, 0  ;;  %v1495_v1 = vsel %vm8284_vm0, %v404_v59, 0 }
  0x47   : > { %5905 = vmatmul.mubr.f32.vlgmr.msra.gmra.mxu0 %v519_v40  ;;  %5913 = vmatpush3.msra.mxu1 %v585_v35  ;;  %v1146_v58 = vsub.f32 %v6794_v51, %v1145_v54  ;;  %v6840_v3 = vand.u32 4294901760, %v1490_v62  ;;  %v6848_v6 = vand.u32 4294901760, %v1489_v0  ;;  %v6850_v7 = vand.u32 4294901760, %v1495_v1 }
  0x48   : > { %5921 = vmatpush3.msra.mxu0 %v575_v14  ;;  %5915 = vmatmul.mubr.f32.vlgmr.msra.gmra.mxu1 %v6726_v15  ;;  %v1100_v61 = vsub.f32 %v6797_v52, %v1099_v55  ;;  %vm6527_vm1 = vmmov 0   ;;  %vm8285_vm2 = vcmask 261120   ;;  %vm2275_vm6 = vcmask 1041409  }
  0x49   : > { %5930 = vmatprep.subr.mxu1 %v6705_v4  ;;  %5907 = vmatprep.mubr.f32.mxu0 %v529_v42  ;;  %v1147_v2 = vand.u32 4294901760, %v1146_v58  ;;  %v1614_v8 = vsub.f32 %v1490_v62, %v6840_v3  ;;  %v1621_v11 = vsub.f32 %v1489_v0, %v6848_v6  ;;  %vm2278_vm10 = vcmask 1042434  }
  0x4a   : > { %5931 = vmatpush3.msra.mxu1 %v6705_v4  ;;  %5922 = vmatprep.subr.mxu0 %v582_v16  ;;  %vm2281_vm13 = vcmask 1043459   ;;  %vm2284_vm14 = vcmask 1044484   ;;  %vm2287_vm15 = vcmask 1045509   ;;  %vm2293_vm0 = vcmask 1047559  }
  0x4b   : > { %5908 = vmatmul.mubr.f32.gmra.mxu0 %v539_v44  ;;  %5917 = vmatprep.mubr.f32.mxu1 %v6729_v17  ;;  %v1615_v12 = vand.u32 4294901760, %v1614_v8 }
  0x4c   : > { %5923 = vmatpush3.msra.mxu0 %v582_v16  ;;  %5918 = vmatmul.mubr.f32.gmra.mxu1 %v6736_v19 }
  0x4d   : > { %5932 = vmatprep.subr.mxu1 %v6707_v5  ;;  %5924 = vmatprep.mubr.f32.mxu0 %v6733_v18  ;;  %v1616_v16 = vsub.f32 %v1614_v8, %v1615_v12 }
  0x4e   : > { %5933 = vmatpush3.msra.mxu1 %v6707_v5  ;;  %5940 = vmatprep.subr.mxu0 %v576_v21 }
  0x4f   : > { %5925 = vmatmul.mubr.f32.vlgmr.msra.gmra.mxu0 %v516_v22  ;;  %5934 = vmatprep.mubr.f32.mxu1 %v507_v25 }
  0x50   : > { %5941 = vmatpush3.msra.mxu0 %v576_v21  ;;  %5935 = vmatmul.mubr.f32.vlgmr.msra.gmra.mxu1 %v517_v28  ;;  %v1617_v21 = vand.u32 4294901760, %v1616_v16 }
  0x51   : > { %5950 = vmatprep.subr.mxu1 %v6705_v4  ;;  %5927 = vmatprep.mubr.f32.mxu0 %v6748_v24 }
  0x52   : > { %5951 = vmatpush3.msra.mxu1 %v6705_v4  ;;  %5942 = vmatprep.subr.mxu0 %v6745_v23  ;;  %v1101_v4 = vand.u32 4294901760, %v1100_v61 }
  0x53   : > { %5928 = vmatmul.mubr.f32.gmra.mxu0 %v6754_v26  ;;  %5937 = vmatprep.mubr.f32.mxu1 %v527_v30 }
  0x54   : > { %5943 = vmatpush3.msra.mxu0 %v6745_v23  ;;  %5938 = vmatmul.mubr.f32.gmra.mxu1 %v537_v32 }
  0x55   : > { %5952 = vmatprep.subr.mxu1 %v6707_v5  ;;  %5944 = vmatprep.mubr.f32.mxu0 %v6719_v10 }
  0x56   : > { %5953 = vmatpush3.msra.mxu1 %v6707_v5  ;;  %5960 = vmatprep.subr.mxu0 %v6526_v60  ;;  %v6844_v5 = vand.u32 4294901760, %v1492_v63 }
  0x57   : > { %5945 = vmatmul.mubr.f32.vlgmr.msra.gmra.mxu0 %v6726_v15  ;;  %5954 = vmatprep.mubr.f32.mxu1 %v6719_v10  ;;  %v1575_v10 = vsub.f32 %v1495_v1, %v6850_v7 }
  0x58   : > { %5961 = vmatpush3.msra.mxu0 %v6769_v43  ;;  %5955 = vmatmul.mubr.f32.vlgmr.msra.gmra.mxu1 %v6726_v15  ;;  %v6859_v9 = vsub.f32 %v1492_v63, %v6844_v5  ;;  %v1622_v15 = vand.u32 4294901760, %v1621_v11 }
  0x59   : > { %5967 = vmatprep.subr.mxu1 %v6526_v60  ;;  %5947 = vmatprep.mubr.f32.mxu0 %v6729_v17  ;;  %v1576_v14 = vand.u32 4294901760, %v1575_v10 }
  0x5a   : > { %5968 = vmatpush3.msra.mxu1 %v1140_v57  ;;  %5962 = vmatprep.subr.mxu0 %v6526_v60  ;;  %v1566_v13 = vand.u32 4294901760, %v6859_v9 }
  0x5b   : > { %5948 = vmatmul.mubr.f32.gmra.mxu0 %v6736_v19  ;;  %5957 = vmatprep.mubr.f32.mxu1 %v6729_v17  ;;  %v1577_v18 = vsub.f32 %v1575_v10, %v1576_v14 }
  0x5c   : > { %5963 = vmatpush3.msra.mxu0 %v6781_v48  ;;  %5958 = vmatmul.mubr.f32.gmra.mxu1 %v6736_v19  ;;  %v1567_v17 = vsub.f32 %v6859_v9, %v1566_v13  ;;  %v1623_v19 = vsub.f32 %v1621_v11, %v1622_v15 }
  0x5d   : > { %5969 = vmatprep.subr.mxu1 %v6526_v60  ;;  %5964 = vmatprep.mubr.msk.f32.mxu0 %vm6527_vm1, %v6526_v60  ;;  %v1578_v23 = vand.u32 4294901760, %v1577_v18 }
  0x5e   : > { %5970 = vmatpush3.msra.mxu1 %v1147_v2  ;;  %5974 = vmatprep.subr.mxu0 %v6526_v60  ;;  %v1568_v22 = vand.u32 4294901760, %v1567_v17  ;;  %v1624_v24 = vand.u32 4294901760, %v1623_v19  ;;  %v2134_v17 = vlaneseq }
  0x5f   : > { %5965 = vmatmul.mubr.f32.vlgmr.msra.gmra.mxu0 %v1101_v4  ;;  %5971 = vmatprep.mubr.msk.f32.mxu1 %vm6527_vm1, %v6526_v60 }
  0x60   : > { %5975 = vmatpush3.msra.mxu0 %v6779_v47  ;;  %5972 = vmatmul.mubr.f32.vlgmr.msra.gmra.mxu1 %v6783_v49 }
  0x61   : > { %5976 = vmatprep.subr.mxu0 %v6526_v60  ;;  %5981 = vmatprep.subr.mxu1 %v6526_v60 }
  0x62   : > { %5977 = vmatpush3.msra.mxu0 %v6794_v51  ;;  %5978 = vmatprep.mubr.msk.f32.mxu0 %vm6527_vm1, %v6526_v60 }
  0x63   : > { %5982 = vmatpush3.msra.mxu1 %v6769_v43  ;;  %5979 = vmatmul.mubr.f32.vlgmr.msra.gmra.mxu0 %v6797_v52 }
  0x64   : > { %5983 = vmatprep.subr.mxu1 %v6526_v60  ;;  %5988 = vmatprep.subr.mxu0 %v6526_v60 }
  0x65   : > { %5984 = vmatpush3.msra.mxu1 %v6781_v48  ;;  %5985 = vmatprep.mubr.msk.f32.mxu1 %vm6527_vm1, %v6526_v60 }
  0x66   : > { %5989 = vmatpush3.msra.mxu0 %v1138_v50  ;;  %5986 = vmatmul.mubr.f32.vlgmr.msra.gmra.mxu1 %v1099_v55 }
  0x67   : > { %5990 = vmatprep.subr.mxu0 %v6526_v60  ;;  %5995 = vmatprep.subr.mxu1 %v6526_v60 }
  0x68   : > { %5991 = vmatpush3.msra.mxu0 %v1145_v54  ;;  %5992 = vmatprep.mubr.msk.f32.mxu0 %vm6527_vm1, %v6526_v60 }
  0x69   : > { %5996 = vmatpush3.msra.mxu1 %v6769_v43  ;;  %5993 = vmatmul.mubr.f32.vlgmr.msra.gmra.mxu0 %v6783_v49 }
  0x6a   : > { %5997 = vmatprep.subr.mxu1 %v6526_v60  ;;  %6002 = vmatprep.subr.mxu0 %v6840_v3 }
  0x6b   : > { %5998 = vmatpush3.msra.mxu1 %v6781_v48  ;;  %5999 = vmatprep.mubr.msk.f32.mxu1 %vm6527_vm1, %v6526_v60  ;;  %vm8286_vm1 = vcmask 1046534  }
  0x6c   : > { %6003 = vmatpush3.msra.mxu0 %v6840_v3  ;;  %6000 = vmatmul.mubr.f32.vlgmr.msra.gmra.mxu1 %v6783_v49 }
  0x6d   : > { %6004 = vmatprep.subr.mxu0 %v6848_v6  ;;  %6009 = vmatprep.subr.mxu1 %v1617_v21 }
  0x6e   : > { %6005 = vmatpush3.msra.mxu0 %v6848_v6  ;;  %6006 = vmatprep.mubr.f32.mxu0 %v1568_v22 }
  0x6f   : > { %6010 = vmatpush3.msra.mxu1 %v1617_v21  ;;  %6007 = vmatmul.mubr.f32.vlgmr.msra.gmra.mxu0 %v1578_v23 }
  0x70   : > { %6011 = vmatprep.subr.mxu1 %v1624_v24  ;;  %6016 = vmatprep.subr.mxu0 %v1614_v8 }
  0x71   : > { %6012 = vmatpush3.msra.mxu1 %v1624_v24  ;;  %6013 = vmatprep.mubr.f32.mxu1 %v6844_v5 }
  0x72   : > { %6017 = vmatpush3.msra.mxu0 %v1614_v8  ;;  %6014 = vmatmul.mubr.f32.vlgmr.msra.gmra.mxu1 %v6850_v7 }
  0x73   : > { %6018 = vmatprep.subr.mxu0 %v1621_v11  ;;  %6023 = vmatprep.subr.mxu1 %v6840_v3 }
  0x74   : > { %6019 = vmatpush3.msra.mxu0 %v1621_v11  ;;  %6020 = vmatprep.mubr.f32.mxu0 %v6859_v9 }
  0x75   : > { %6024 = vmatpush3.msra.mxu1 %v6840_v3  ;;  %6021 = vmatmul.mubr.f32.vlgmr.msra.gmra.mxu0 %v1575_v10 }
  0x76   : > { %6025 = vmatprep.subr.mxu1 %v6848_v6  ;;  %6030 = vmatprep.subr.mxu0 %v1615_v12 }
  0x77   : > { %6026 = vmatpush3.msra.mxu1 %v6848_v6  ;;  %6027 = vmatprep.mubr.f32.mxu1 %v1566_v13 }
  0x78   : > { %6031 = vmatpush3.msra.mxu0 %v1615_v12  ;;  %6028 = vmatmul.mubr.f32.vlgmr.msra.gmra.mxu1 %v1576_v14 }
  0x79   : > { %6032 = vmatprep.subr.mxu0 %v1622_v15  ;;  %6037 = vmatprep.subr.mxu1 %v6840_v3 }
  0x7a   : > { %6033 = vmatpush3.msra.mxu0 %v1622_v15  ;;  %6034 = vmatprep.mubr.f32.mxu0 %v6844_v5 }
  0x7b   : > { %6038 = vmatpush3.msra.mxu1 %v6840_v3  ;;  %6035 = vmatmul.mubr.f32.vlgmr.msra.gmra.mxu0 %v6850_v7 }
  0x7c   : > { %6039 = vmatprep.subr.mxu1 %v6848_v6  ;;  %6041 = vmatprep.mubr.f32.mxu1 %v6844_v5 }
  0x7d   : > { %6040 = vmatpush3.msra.mxu1 %v6848_v6 }
  0x7e   : > { %6042 = vmatmul.mubr.f32.vlgmr.msra.gmra.mxu1 %v6850_v7 }
 0x107   : > { %v5906_v25 = vpop.f32.mrf.mxu0 }
 0x108   : > { %v5916_v27 = vpop.f32.mrf.mxu1 }
 0x109   : > { %v511_v26 = vpop.f32.mrf.mxu0  ;;  %v629_v34 = vadd.f32 %v5916_v27, %v5906_v25 }
 0x10a   : > { %v622_v29 = vpop.f32.mrf.mxu1 }
 0x10b   : > { %v5909_v28 = vpop.f32.mrf.mxu0  ;;  %v623_v37 = vadd.f32 %v622_v29, %v511_v26  ;;  %v6973_v29 = vshrl.u32 %v2134_v17, 7 }
 0x10c   : > { %v5919_v31 = vpop.f32.mrf.mxu1 }
 0x10d   : > { %v531_v30 = vpop.f32.mrf.mxu0  ;;  %v641_v41 = vadd.f32 %v5919_v31, %v5909_v28 }
 0x10e   : > { %v634_v32 = vpop.f32.mrf.mxu1 }
 0x10f   : > { %v5926_v33 = vpop.f32.mrf.mxu0  ;;  %v635_v45 = vadd.f32 %v634_v32, %v531_v30 }
 0x110   : > { %v5936_v36 = vpop.f32.mrf.mxu1  ;;  %v724_v38 = vadd.f32 %v5926_v33, %v629_v34 }
 0x111   : > { %v716_v35 = vpop.f32.mrf.mxu0 }
 0x112   : > { %v812_v40 = vpop.f32.mrf.mxu1  ;;  %v717_v42 = vadd.f32 %v716_v35, %v623_v37  ;;  %v821_v46 = vadd.f32 %v5936_v36, %v724_v38 }
 0x113   : > { %v5929_v39 = vpop.f32.mrf.mxu0 }
 0x114   : > { %v5939_v44 = vpop.f32.mrf.mxu1  ;;  %v738_v47 = vadd.f32 %v5929_v39, %v641_v41  ;;  %v813_v50 = vadd.f32 %v812_v40, %v717_v42  ;;  %v3887_v40 = vsub.s32 2, %v6973_v29  ;;  %v4761_v41 = vsub.s32 3, %v6973_v29 }
 0x115   : > { %v730_v43 = vpop.f32.mrf.mxu0 }
 0x116   : > { %v828_v48 = vpop.f32.mrf.mxu1  ;;  %v731_v51 = vadd.f32 %v730_v43, %v635_v45  ;;  %v837_v55 = vadd.f32 %v5939_v44, %v738_v47 }
 0x117   : > { %v5946_v49 = vpop.f32.mrf.mxu0 }
 0x118   : > { %v920_v52 = vadd.f32 %v5946_v49, %v821_v46  ;;  %v5956_v54 = vpop.f32.mrf.mxu1  ;;  %v829_v60 = vadd.f32 %v828_v48, %v731_v51 }
 0x119   : > { %v913_v53 = vpop.f32.mrf.mxu0 }
 0x11a   : > { %v914_v56 = vadd.f32 %v913_v53, %v813_v50  ;;  %v6917_v57 = vadd.f32 %v5956_v54, %v920_v52  ;;  %v1004_v59 = vpop.f32.mrf.mxu1 }
 0x11b   : > { %v5949_v58 = vpop.f32.mrf.mxu0 }
 0x11c   : > { %8296 = vst [vmem:[#allocation10_spill] sm:$0xff] %v6917_v57  ;;  %v6920_v61 = vand.u32 4294901760, %v6917_v57  ;;  %v932_v62 = vadd.f32 %v5949_v58, %v837_v55  ;;  %v6922_v63 = vadd.f32 %v1004_v59, %v914_v56  ;;  %v5959_v1 = vpop.f32.mrf.mxu1 }
 0x11d   : > { %v925_v0 = vpop.f32.mrf.mxu0 }
 0x11e   : > { %8297 = vst [vmem:[#allocation11_spill] sm:$0xff] %v6920_v61  ;;  %8298 = vst [vmem:[#allocation12_spill] sm:$0xff] %v6922_v63  ;;  %v6925_v2 = vand.u32 4294901760, %v6922_v63  ;;  %v926_v3 = vadd.f32 %v925_v0, %v829_v60  ;;  %v6927_v4 = vadd.f32 %v5959_v1, %v932_v62  ;;  %v1016_v5 = vpop.f32.mrf.mxu1  ;;  %v6936_v9 = vsub.f32 %v6917_v57, %v6920_v61 }
 0x11f   : > { %v1103_v6 = vpop.f32.mrf.mxu0 }
 0x120   : > { %8299 = vst [vmem:[#allocation13_spill] sm:$0xff] %v6925_v2  ;;  %8300 = vst [vmem:[#allocation14_spill] sm:$0xff] %v6927_v4  ;;  %v6930_v7 = vand.u32 4294901760, %v6927_v4  ;;  %v6932_v8 = vadd.f32 %v1016_v5, %v926_v3  ;;  %v1184_v11 = vpop.f32.mrf.mxu1  ;;  %v6948_v15 = vsub.f32 %v6922_v63, %v6925_v2  ;;  %v6960_v22 = vand.u32 4294901760, %v6936_v9 }
 0x121   : > { %8303 = vst [vmem:[#allocation17_spill] sm:$0xff] %v6936_v9  ;;  %v5966_v10 = vpop.f32.mrf.mxu0  ;;  %v1185_v13 = vadd.f32 %v1184_v11, %v1103_v6 }
 0x122   : > { %8301 = vst [vmem:[#allocation15_spill] sm:$0xff] %v6930_v7  ;;  %8302 = vst [vmem:[#allocation16_spill] sm:$0xff] %v6932_v8  ;;  %v6939_v12 = vand.u32 4294901760, %v6932_v8  ;;  %6044 = vmatprep.subr.mxu0 %v6930_v7  ;;  %v6944_v14 = vsub.f32 %v6927_v4, %v6930_v7  ;;  %v5973_v16 = vpop.f32.mrf.mxu1  ;;  %v6970_v27 = vand.u32 4294901760, %v6948_v15  ;;  %v2478_v33 = vsub.f32 %v6936_v9, %v6960_v22 }
 0x123   : > { %8306 = vst [vmem:[#allocation20_spill] sm:$0xff] %v6948_v15  ;;  %6045 = vmatpush3.msra.mxu0 %v6930_v7  ;;  %v1260_v18 = vpop.f32.mrf.mxu0  ;;  %8309 = vst [vmem:[#allocation23_spill] sm:$0xff] %v6960_v22 }
 0x124   : > { %8304 = vst [vmem:[#allocation18_spill] sm:$0xff] %v6939_v12  ;;  %8305 = vst [vmem:[#allocation19_spill] sm:$0xff] %v6944_v14  ;;  %6046 = vmatprep.subr.mxu0 %v6939_v12  ;;  %v6953_v19 = vand.u32 4294901760, %v6944_v14  ;;  %v6957_v21 = vsub.f32 %v6932_v8, %v6939_v12  ;;  %v1261_v23 = vadd.f32 %v1260_v18, %v1185_v13  ;;  %v2479_v42 = vand.u32 4294901760, %v2478_v33  ;;  %v7009_v33 = vld [vmem:[%s6690_s27] sm:$0xff] }
 0x125   : > { %6047 = vmatpush3.msra.mxu0 %v6939_v12  ;;  %v5980_v24 = vpop.f32.mrf.mxu0  ;;  %8311 = vst [vmem:[#allocation25_spill] sm:$0xff] %v6970_v27  ;;  %v2485_v37 = vsub.f32 %v6948_v15, %v6970_v27  ;;  %v6528_v18 = vmov 1  }
 0x126   : > { %8307 = vst [vmem:[#allocation21_spill] sm:$0xff] %v6953_v19  ;;  %8308 = vst [vmem:[#allocation22_spill] sm:$0xff] %v6957_v21  ;;  %6048 = vmatprep.subr.mxu0 %v6920_v61  ;;  %v2464_v25 = vsub.f32 %v6944_v14, %v6953_v19  ;;  %v6967_v26 = vand.u32 4294901760, %v6957_v21  ;;  %v1335_v28 = vpop.f32.mrf.mxu1  ;;  %v6530_v24 = vmov 3  }
 0x127   : > { %6049 = vmatpush3.msra.mxu0 %v6920_v61  ;;  %v1336_v30 = vadd.f32 %v1335_v28, %v1261_v23  ;;  %v2486_v45 = vand.u32 4294901760, %v2485_v37  ;;  %v6529_v23 = vmov 2   ;;  %v6999_v28 = vld [vmem:[%s6690_s27 + $0x40] sm:$0xff] }
 0x128   : > { %8310 = vst [vmem:[#allocation24_spill] sm:$0xff] %v6967_v26  ;;  %6050 = vmatprep.subr.mxu0 %v6925_v2  ;;  %v2465_v31 = vand.u32 4294901760, %v2464_v25  ;;  %v2471_v32 = vsub.f32 %v6957_v21, %v6967_v26  ;;  %v5987_v34 = vpop.f32.mrf.mxu1  ;;  %v2003_v25 = vpop.permute.xlu0 %2002 }
 0x129   : > { %6051 = vmatpush3.msra.mxu0 %v6925_v2  ;;  %v1412_v35 = vpop.f32.mrf.mxu0  ;;  %v7012_v34 = vld [vmem:[%s6690_s27 + $0x8] sm:$0xff]  ;;  %v2005_v37 = vmul.f32 %v2003_v25, %v7009_v33 }
 0x12a   : > { %6055 = vmatprep.subr.mxu1 %v2465_v31  ;;  %6066 = vmatprep.subr.mxu0 %v6944_v14  ;;  %v2472_v36 = vand.u32 4294901760, %v2471_v32  ;;  %v1413_v38 = vadd.f32 %v1412_v35, %v1336_v30  ;;  %v7002_v30 = vld [vmem:[%s6690_s27 + $0x48] sm:$0xff]  ;;  %v2013_v32 = vmul.f32 %v2003_v25, %v6999_v28 }
 0x12b   : > { %6056 = vmatpush3.msra.mxu1 %v2465_v31  ;;  %v5994_v39 = vpop.f32.mrf.mxu0  ;;  %v7005_v31 = vld [vmem:[%s6690_s27 + $0x50] sm:$0xff] }
 0x12c   : > { %6057 = vmatprep.subr.mxu1 %v2472_v36  ;;  %v1485_v43 = vpop.f32.mrf.mxu1  ;;  %v2015_v35 = vmul.f32 %v2003_v25, %v7005_v31  ;;  %v7024_v39 = vld [vmem:[%s6690_s27 + $0x60] sm:$0xff] }
 0x12d   : > { %6058 = vmatpush3.msra.mxu1 %v2472_v36  ;;  %v6986_v44 = vadd.f32 %v1485_v43, %v1413_v38  ;;  %v7017_v36 = vld [vmem:[%s6690_s27 + $0x10] sm:$0xff]  ;;  %v7021_v38 = vld [vmem:[%s6690_s27 + $0x58] sm:$0xff] }
 0x12e   : > { %6059 = vmatprep.subr.mxu1 %v2479_v42  ;;  %v6001_v46 = vpop.f32.mrf.mxu1 }
 0x12f   : > { %6060 = vmatpush3.msra.mxu1 %v2479_v42  ;;  %v6989_v47 = vrot.slane %v6986_v44, %v3887_v40  ;;  %v6992_v48 = vrot.slane %v6986_v44, %v4761_v41  ;;  %v6008_v49 = vpop.f32.mrf.mxu0  ;;  %v2078_v40 = vsel %vm8285_vm2, %v2013_v32, 0.0  ;;  %v7028_v41 = vld [vmem:[%s6690_s27 + $0x68] sm:$0xff]  ;;  %v7031_v42 = vld [vmem:[%s6690_s27 + $0x70] sm:$0xff]  ;;  %v7036_v46 = vld [vmem:[%s6690_s27 + $0x78] sm:$0xff] }
 0x130   : > { %6061 = vmatprep.subr.mxu1 %v2486_v45  ;;  %8313 = vst [vmem:[#allocation27_spill] sm:$0xff] %v7031_v42  ;;  %8314 = vst [vmem:[#allocation28_spill] sm:$0xff] %v7036_v46 }
 0x131   : > { %8312 = vst [vmem:[#allocation26_spill] sm:$0xff] %v6992_v48  ;;  %6062 = vmatpush3.msra.mxu1 %v2486_v45  ;;  %v1570_v50 = vpop.f32.mrf.mxu0 }
 0x132   : > { %6077 = vmatprep.subr.mxu1 %v6930_v7  ;;  %v6015_v51 = vpop.f32.mrf.mxu1 }
 0x133   : > { %v1668_v52 = vadd.f32 %v6015_v51, %v6008_v49  ;;  %v7039_v49 = vld [vmem:[%s6690_s27 + $0x18] sm:$0xff]  ;;  %v2006_v51 = vmul.f32 %v2003_v25, %v7012_v34 }
 0x134   : > { %v1661_v53 = vpop.f32.mrf.mxu1  ;;  %8315 = vst [vmem:[#allocation29_spill] sm:$0xff] %v7039_v49 }
 0x135   : > { %v1662_v54 = vadd.f32 %v1661_v53, %v1570_v50  ;;  %v6022_v55 = vpop.f32.mrf.mxu0  ;;  %v7042_v50 = vld [vmem:[%s6690_s27 + $0x20] sm:$0xff]  ;;  %v2016_v53 = vmul.f32 %v2003_v25, %v7021_v38 }
 0x136   : > { %v1751_v56 = vadd.f32 %v6022_v55, %v1668_v52  ;;  %8316 = vst [vmem:[#allocation30_spill] sm:$0xff] %v7042_v50  ;;  %v2007_v52 = vmul.f32 %v2003_v25, %v7017_v36  ;;  %v7049_v55 = vld [vmem:[%s6690_s27 + $0x28] sm:$0xff] }
 0x137   : > { %v1743_v58 = vpop.f32.mrf.mxu0  ;;  %8317 = vst [vmem:[#allocation31_spill] sm:$0xff] %v7049_v55 }
 0x138   : > { %v1744_v59 = vadd.f32 %v1743_v58, %v1662_v54  ;;  %v6029_v60 = vpop.f32.mrf.mxu1  ;;  %v2017_v54 = vmul.f32 %v2003_v25, %v7024_v39  ;;  %v7055_v58 = vld [vmem:[%s6690_s27 + $0x38] sm:$0xff] }
 0x139   : > { %v1834_v62 = vadd.f32 %v6029_v60, %v1751_v56  ;;  %v7052_v56 = vld [vmem:[%s6690_s27 + $0x30] sm:$0xff]  ;;  %8319 = vst [vmem:[#allocation33_spill] sm:$0xff] %v7055_v58 }
 0x13a   : > { %v1825_v0 = vpop.f32.mrf.mxu1  ;;  %8318 = vst [vmem:[#allocation32_spill] sm:$0xff] %v7052_v56 }
 0x13b   : > { %v1826_v1 = vadd.f32 %v1825_v0, %v1744_v59  ;;  %v6036_v3 = vpop.f32.mrf.mxu0  ;;  %v2079_v59 = vrot.slane %v2078_v40, 4  ;;  %v2022_v0 = vsel %vm8285_vm2, %v2005_v37, 0.0  ;;  %v2106_v37 = vsel %vm8285_vm2, %v2017_v54, 0.0 }
 0x13c   : > { %v1917_v5 = vadd.f32 %v6036_v3, %v1834_v62  ;;  %v2092_v62 = vsel %vm8285_vm2, %v2015_v35, 0.0  ;;  %v2019_v3 = vmul.f32 %v2003_v25, %v7031_v42  ;;  %v2099_v35 = vsel %vm8285_vm2, %v2016_v53, 0.0 }
 0x13d   : > { %v1910_v6 = vpop.f32.mrf.mxu0  ;;  %v2080_v32 = vadd.f32 %v2079_v59, %v2078_v40  ;;  %v2100_v59 = vrot.slane %v2099_v35, 4  ;;  %v2107_v54 = vrot.slane %v2106_v37, 4 }
 0x13e   : > { %v6043_v10 = vpop.f32.mrf.mxu1  ;;  %v1911_v11 = vadd.f32 %v1910_v6, %v1826_v1  ;;  %v2018_v1 = vmul.f32 %v2003_v25, %v7028_v41  ;;  %v2008_v6 = vmul.f32 %v2003_v25, %v7039_v49  ;;  %v2120_v43 = vsel %vm8285_vm2, %v2019_v3, 0.0 }
 0x13f   : > { %v1996_v13 = vadd.f32 %v6043_v10, %v1917_v5  ;;  %v2020_v5 = vmul.f32 %v2003_v25, %v7036_v46  ;;  %v2009_v10 = vmul.f32 %v2003_v25, %v7042_v50  ;;  %v2081_v14 = vrot.slane %v2080_v32, 2 }
 0x140   : > { %v1989_v16 = vpop.f32.mrf.mxu1  ;;  %v2113_v45 = vsel %vm8285_vm2, %v2018_v1, 0.0  ;;  %v2121_v1 = vrot.slane %v2120_v43, 4  ;;  %v2101_v12 = vadd.f32 %v2100_v59, %v2099_v35 }
 0x141   : > { %v1990_v17 = vadd.f32 %v1989_v16, %v1911_v11  ;;  %2160 = vperm.xlu1 %6370, %v1996_v13   ;;  %v2010_v11 = vmul.f32 %v2003_v25, %v7049_v55  ;;  %v2012_v16 = vmul.f32 %v2003_v25, %v7055_v58  ;;  %v2127_v27 = vsel %vm8285_vm2, %v2020_v5, 0.0 }
 0x142   : > { %v2050_v22 = vsel %vm8285_vm2, %v2009_v10, 0.0  ;;  %v2114_v19 = vrot.slane %v2113_v45, 4  ;;  %v2128_v15 = vrot.slane %v2127_v27, 4  ;;  %v2122_v63 = vadd.f32 %v2121_v1, %v2120_v43 }
 0x143   : > { %2156 = vperm.xlu0 %6369, %v1990_v17   ;;  %v2057_v26 = vsel %vm8285_vm2, %v2010_v11, 0.0  ;;  %v2051_v9 = vrot.slane %v2050_v22, 4  ;;  %v2082_v50 = vadd.f32 %v2081_v14, %v2080_v32 }
 0x144   : > { %v2058_v5 = vrot.slane %v2057_v26, 4  ;;  %v2115_v7 = vadd.f32 %v2114_v19, %v2113_v45  ;;  %v2129_v57 = vadd.f32 %v2128_v15, %v2127_v27 }
 0x145   : > { %6371 = vset.pattern.permute.xlu1 %v6528_v18  ;;  %v2052_v8 = vadd.f32 %v2051_v9, %v2050_v22  ;;  %v2083_v9 = vrot.slane %v2082_v50, 1 }
 0x146   : > { %2876 = vperm.xlu1 %6371, %v6741_v20   ;;  %v2059_v58 = vadd.f32 %v2058_v5, %v2057_v26 }
 0x147   : > { %6374 = vset.pattern.permute.xlu0 %v6528_v18  ;;  %v2093_v18 = vrot.slane %v2092_v62, 4  ;;  %v2053_v19 = vrot.slane %v2052_v8, 2 }
 0x148   : > { %3028 = vperm.xlu0 %6374, %v1990_v17   ;;  %v2060_v43 = vrot.slane %v2059_v58, 2 }
 0x149   : > { %v2094_v2 = vadd.f32 %v2093_v18, %v2092_v62  ;;  %v2102_v62 = vrot.slane %v2101_v12, 2  ;;  %v2123_v18 = vrot.slane %v2122_v63, 2 }
 0x14a   : > { %3031 = vperm.xlu1 %6371, %v1996_v13  }
 0x14b   : > { %v2095_v48 = vrot.slane %v2094_v2, 2  ;;  %v2103_v32 = vadd.f32 %v2102_v62, %v2101_v12 }
 0x14c   : > { %6375 = vset.pattern.permute.xlu0 %v6529_v23 }
 0x14d   : > { %3906 = vperm.xlu0 %6375, %v1990_v17  }
 0x14e   : > { %6372 = vset.pattern.permute.xlu1 %v6529_v23  ;;  %v2023_v23 = vrot.slane %v2022_v0, 4 }
 0x14f   : > { %3754 = vperm.xlu1 %6372, %v6741_v20  }
 0x150   : > { %v2024_v11 = vadd.f32 %v2023_v23, %v2022_v0  ;;  %v2130_v23 = vrot.slane %v2129_v57, 2 }
 0x151   : > { %6376 = vset.pattern.permute.xlu0 %v6530_v24 }
 0x152   : > { %4780 = vperm.xlu0 %6376, %v1990_v17   ;;  %v2025_v46 = vrot.slane %v2024_v11, 2 }
 0x153   : > { %3909 = vperm.xlu1 %6372, %v1996_v13  }
 0x154   : > { %v2026_v26 = vadd.f32 %v2025_v46, %v2024_v11 }
 0x156   : > { %v2027_v5 = vrot.slane %v2026_v26, 1 }
 0x157   : > { %6373 = vset.pattern.permute.xlu1 %v6530_v24  ;;  %v2029_v24 = vsel %vm8285_vm2, %v2006_v51, 0.0  ;;  %v2071_v51 = vsel %vm8285_vm2, %v2012_v16, 0.0  ;;  %v2108_v16 = vadd.f32 %v2107_v54, %v2106_v37  ;;  %v2124_v37 = vadd.f32 %v2123_v18, %v2122_v63 }
 0x158   : > { %4628 = vperm.xlu1 %6373, %v6741_v20   ;;  %v2014_v20 = vmul.f32 %v2003_v25, %v7002_v30  ;;  %v2084_v54 = vadd.f32 %v2083_v9, %v2082_v50 }
 0x159   : > { %v2109_v0 = vrot.slane %v2108_v16, 2 }
 0x15a   : > { %v2085_v60 = vsel %vm8285_vm2, %v2014_v20, 0.0  ;;  %v2036_v20 = vsel %vm8285_vm2, %v2007_v52, 0.0  ;;  %v2030_v52 = vrot.slane %v2029_v24, 4 }
 0x15b   : > { %v2086_v17 = vrot.slane %v2085_v60, 4  ;;  %v2037_v53 = vrot.slane %v2036_v20, 4 }
 0x15c   : > { %4783 = vperm.xlu1 %6373, %v1996_v13   ;;  %v2011_v13 = vmul.f32 %v2003_v25, %v7052_v56  ;;  %v2043_v25 = vsel %vm8285_vm2, %v2008_v6, 0.0  ;;  %v2072_v6 = vrot.slane %v2071_v51, 4  ;;  %v2031_v61 = vadd.f32 %v2030_v52, %v2029_v24 }
 0x15d   : > { %v2044_v3 = vrot.slane %v2043_v25, 4  ;;  %v2087_v10 = vadd.f32 %v2086_v17, %v2085_v60  ;;  %v2116_v17 = vrot.slane %v2115_v7, 2  ;;  %v2061_v52 = vadd.f32 %v2060_v43, %v2059_v58 }
 0x15e   : > { %v2064_v40 = vsel %vm8285_vm2, %v2011_v13, 0.0  ;;  %v2038_v13 = vadd.f32 %v2037_v53, %v2036_v20  ;;  %v2073_v55 = vadd.f32 %v2072_v6, %v2071_v51  ;;  %v2032_v42 = vrot.slane %v2031_v61, 2 }
 0x15f   : > { %v2065_v21 = vrot.slane %v2064_v40, 4  ;;  %v2045_v4 = vadd.f32 %v2044_v3, %v2043_v25  ;;  %v2088_v49 = vrot.slane %v2087_v10, 2  ;;  %v2110_v20 = vadd.f32 %v2109_v0, %v2108_v16 }
 0x160   : > { %v2039_v60 = vrot.slane %v2038_v13, 2  ;;  %v2074_v27 = vrot.slane %v2073_v55, 2  ;;  %v2033_v14 = vadd.f32 %v2032_v42, %v2031_v61  ;;  %v2117_v35 = vadd.f32 %v2116_v17, %v2115_v7 }
 0x161   : > { %v2066_v56 = vadd.f32 %v2065_v21, %v2064_v40  ;;  %v2046_v24 = vrot.slane %v2045_v4, 2  ;;  %v2089_v22 = vadd.f32 %v2088_v49, %v2087_v10  ;;  %v2096_v21 = vadd.f32 %v2095_v48, %v2094_v2 }
 0x162   : > { %v2040_v45 = vadd.f32 %v2039_v60, %v2038_v13  ;;  %v2131_v25 = vadd.f32 %v2130_v23, %v2129_v57  ;;  %v2054_v51 = vadd.f32 %v2053_v19, %v2052_v8  ;;  %v2075_v59 = vadd.f32 %v2074_v27, %v2073_v55 }
 0x163   : > { %v2067_v15 = vrot.slane %v2066_v56, 2  ;;  %v2047_v40 = vadd.f32 %v2046_v24, %v2045_v4  ;;  %v2090_v1 = vrot.slane %v2089_v22, 1  ;;  %v2097_v3 = vrot.slane %v2096_v21, 1 }
 0x164   : > { %v2034_v6 = vrot.slane %v2033_v14, 1  ;;  %v2041_v49 = vrot.slane %v2040_v45, 1  ;;  %v2104_v2 = vrot.slane %v2103_v32, 1  ;;  %v2111_v48 = vrot.slane %v2110_v20, 1 }
 0x165   : > { %v2068_v53 = vadd.f32 %v2067_v15, %v2066_v56  ;;  %v2118_v61 = vrot.slane %v2117_v35, 1  ;;  %v2125_v42 = vrot.slane %v2124_v37, 1  ;;  %v2132_v12 = vrot.slane %v2131_v25, 1 }
 0x166   : > { %v2048_v46 = vrot.slane %v2047_v40, 1  ;;  %v2055_v7 = vrot.slane %v2054_v51, 1  ;;  %v2062_v63 = vrot.slane %v2061_v52, 1  ;;  %v2076_v4 = vrot.slane %v2075_v59, 1 }
 0x167   : > { %v2069_v57 = vrot.slane %v2068_v53, 1  ;;  %v8320_v8 = vsub.s32 0, %v6973_v29  ;;  %v2091_v50 = vadd.f32 %v2090_v1, %v2089_v22  ;;  %v2098_v56 = vadd.f32 %v2097_v3, %v2096_v21 }
 0x168   : > { %v2028_v58 = vadd.f32 %v2027_v5, %v2026_v26  ;;  %v2035_v10 = vadd.f32 %v2034_v6, %v2033_v14  ;;  %v2042_v11 = vadd.f32 %v2041_v49, %v2040_v45  ;;  %v2105_v13 = vadd.f32 %v2104_v2, %v2103_v32 }
 0x169   : > { %v2137_v55 = vrot.slane %v6986_v44, %v8320_v8  ;;  %v2112_v16 = vadd.f32 %v2111_v48, %v2110_v20  ;;  %v2119_v60 = vadd.f32 %v2118_v61, %v2117_v35  ;;  %v2126_v62 = vadd.f32 %v2125_v42, %v2124_v37 }
 0x16a   : > { %v2133_v0 = vadd.f32 %v2132_v12, %v2131_v25  ;;  %v2049_v17 = vadd.f32 %v2048_v46, %v2047_v40  ;;  %v2056_v18 = vadd.f32 %v2055_v7, %v2054_v51  ;;  %v2063_v23 = vadd.f32 %v2062_v63, %v2061_v52 }
 0x16b   : > { %v2070_v24 = vadd.f32 %v2069_v57, %v2068_v53  ;;  %v2077_v19 = vadd.f32 %v2076_v4, %v2075_v59  ;;  %v8321_v43 = vsub.s32 1, %v6973_v29  ;;  %v2146_v27 = vadd.f32 %v2137_v55, %v2084_v54 }
 0x16c   : > { %v2147_v9 = vadd.f32 %v2137_v55, %v2091_v50  ;;  %v2148_v22 = vadd.f32 %v2137_v55, %v2098_v56  ;;  %v2138_v21 = vadd.f32 %v2137_v55, %v2028_v58  ;;  %v2139_v26 = vadd.f32 %v2137_v55, %v2035_v10 }
 0x16d   : > { %v7086_v15 = vrot.slane %v6986_v44, %v8321_v43  ;;  %v2140_v14 = vadd.f32 %v2137_v55, %v2042_v11  ;;  %v2149_v45 = vadd.f32 %v2137_v55, %v2105_v13  ;;  %v2150_v32 = vadd.f32 %v2137_v55, %v2112_v16 }
 0x16e   : > { %v2151_v20 = vadd.f32 %v2137_v55, %v2119_v60  ;;  %v2152_v35 = vadd.f32 %v2137_v55, %v2126_v62  ;;  %v2153_v37 = vadd.f32 %v2137_v55, %v2133_v0  ;;  %v7088_v40 = vadd.f32 %v2137_v55, %v2049_v17 }
 0x16f   : > { %v7090_v51 = vadd.f32 %v2137_v55, %v2056_v18  ;;  %v7092_v29 = vadd.f32 %v2137_v55, %v2063_v23  ;;  %v7094_v44 = vadd.f32 %v2137_v55, %v2070_v24  ;;  %v7100_v49 = vadd.f32 %v2137_v55, %v2077_v19 }
 0x1bc   : > { %v2161_v25 = vpop.permute.xlu1 %2160 }
 0x1bd   : > { %v2169_v52 = vrot.slane %v2161_v25, 1  ;;  %v2170_v53 = vrot.slane %v2161_v25, 2  ;;  %v2171_v59 = vrot.slane %v2161_v25, 3  ;;  %v2172_v54 = vrot.slane %v2161_v25, 4 }
 0x1be   : > { %v7096_v1 = vadd.f32 %v2161_v25, %v2146_v27  ;;  %v7098_v3 = vpop.permute.xlu0 %2156  ;;  %v2173_v5 = vrot.slane %v2161_v25, 5  ;;  %v2174_v6 = vrot.slane %v2161_v25, 6  ;;  %v2175_v42 = vrot.slane %v2161_v25, 7 }
 0x1bf   : > { %v7102_v2 = vadd.f32 %v2169_v52, %v2147_v9  ;;  %v2162_v48 = vrot.slane %v7098_v3, 1  ;;  %v2163_v61 = vrot.slane %v7098_v3, 2  ;;  %v7106_v12 = vadd.f32 %v2170_v53, %v2148_v22 }
 0x1c0   : > { %v2164_v46 = vrot.slane %v7098_v3, 3  ;;  %v2165_v7 = vrot.slane %v7098_v3, 4  ;;  %v7111_v63 = vadd.f32 %v7098_v3, %v2138_v21  ;;  %v7119_v55 = vadd.f32 %v2171_v59, %v2149_v45 }
 0x1c1   : > { %v7113_v57 = vadd.f32 %v2162_v48, %v2139_v26  ;;  %v7115_v4 = vadd.f32 %v2163_v61, %v2140_v14  ;;  %v7117_v8 = vpop.permute.xlu1 %2876  ;;  %v7121_v50 = vadd.f32 %v2172_v54, %v2150_v32  ;;  %v7137_v62 = vadd.f32 %v2173_v5, %v2151_v20 }
 0x1c2   : > { %v2879_v56 = vmul.f32 %v7117_v8, %v7009_v33  ;;  %v2880_v58 = vmul.f32 %v7117_v8, %v7012_v34  ;;  %v2881_v10 = vmul.f32 %v7117_v8, %v7017_v36  ;;  %v2887_v11 = vmul.f32 %v7117_v8, %v6999_v28 }
 0x1c3   : > { %v7131_v13 = vpop.permute.xlu0 %3028  ;;  %v2888_v16 = vmul.f32 %v7117_v8, %v7002_v30  ;;  %v2889_v60 = vmul.f32 %v7117_v8, %v7005_v31  ;;  %v7139_v33 = vadd.f32 %v2174_v6, %v2152_v35  ;;  %v7144_v17 = vadd.f32 %v2175_v42, %v2153_v37 }
 0x1c4   : > { %v2895_v34 = vsel %vm8285_vm2, %v2879_v56, 0.0  ;;  %v2902_v0 = vsel %vm8285_vm2, %v2880_v58, 0.0  ;;  %v2909_v36 = vsel %vm8285_vm2, %v2881_v10, 0.0  ;;  %v3033_v19 = vrot.slane %v7131_v13, 1 }
 0x1c5   : > { %v2896_v18 = vrot.slane %v2895_v34, 4  ;;  %v2903_v23 = vrot.slane %v2902_v0, 4  ;;  %v2910_v24 = vrot.slane %v2909_v36, 4  ;;  %v7147_v43 = vpop.permute.xlu1 %3031  ;;  %v3034_v27 = vrot.slane %v7131_v13, 2 }
 0x1c6   : > { %v2951_v22 = vsel %vm8285_vm2, %v2887_v11, 0.0  ;;  %v2958_v21 = vsel %vm8285_vm2, %v2888_v16, 0.0  ;;  %v2965_v37 = vsel %vm8285_vm2, %v2889_v60, 0.0  ;;  %v3040_v25 = vrot.slane %v7147_v43, 1 }
 0x1c7   : > { %v2897_v26 = vadd.f32 %v2896_v18, %v2895_v34  ;;  %v2904_v14 = vadd.f32 %v2903_v23, %v2902_v0  ;;  %v2911_v45 = vadd.f32 %v2910_v24, %v2909_v36  ;;  %v2952_v32 = vrot.slane %v2951_v22, 4 }
 0x1c8   : > { %v2959_v35 = vrot.slane %v2958_v21, 4  ;;  %v7156_v52 = vpop.permute.xlu0 %3906  ;;  %v2966_v48 = vrot.slane %v2965_v37, 4  ;;  %v3041_v61 = vrot.slane %v7147_v43, 2  ;;  %vm2216_vm3 = vcmp.gt.f32.partialorder %v7096_v1, 0.0 }
 0x1c9   : > { %v2898_v53 = vrot.slane %v2897_v26, 2  ;;  %v2905_v59 = vrot.slane %v2904_v14, 2  ;;  %v2912_v54 = vrot.slane %v2911_v45, 2  ;;  %v2953_v5 = vadd.f32 %v2952_v32, %v2951_v22 }
 0x1ca   : > { %v2960_v6 = vadd.f32 %v2959_v35, %v2958_v21  ;;  %v2967_v60 = vadd.f32 %v2966_v48, %v2965_v37  ;;  %v7162_v36 = vpop.permute.xlu1 %3754  ;;  %vm2217_vm4 = vcmp.gt.f32.partialorder %v7102_v2, 0.0  ;;  %vm2218_vm5 = vcmp.gt.f32.partialorder %v7106_v12, 0.0 }
 0x1cb   : > { %v2899_v56 = vadd.f32 %v2898_v53, %v2897_v26  ;;  %v2906_v58 = vadd.f32 %v2905_v59, %v2904_v14  ;;  %v2913_v10 = vadd.f32 %v2912_v54, %v2911_v45  ;;  %v2954_v11 = vrot.slane %v2953_v5, 2 }
 0x1cc   : > { %v2961_v16 = vrot.slane %v2960_v6, 2  ;;  %v2968_v35 = vrot.slane %v2967_v60, 2  ;;  %vm2219_vm7 = vcmp.gt.f32.partialorder %v7119_v55, 0.0  ;;  %vm2220_vm8 = vcmp.gt.f32.partialorder %v7121_v50, 0.0 }
 0x1cd   : > { %v2900_v18 = vrot.slane %v2899_v56, 1  ;;  %v2907_v23 = vrot.slane %v2906_v58, 1  ;;  %v2914_v24 = vrot.slane %v2913_v10, 1  ;;  %v2955_v22 = vadd.f32 %v2954_v11, %v2953_v5  ;;  %v7164_v21 = vpop.permute.xlu0 %4780 }
 0x1ce   : > { %v2962_v32 = vadd.f32 %v2961_v16, %v2960_v6  ;;  %v2969_v48 = vadd.f32 %v2968_v35, %v2967_v60  ;;  %vm2221_vm9 = vcmp.gt.f32.partialorder %v7137_v62, 0.0  ;;  %vm2222_vm11 = vcmp.gt.f32.partialorder %v7139_v33, 0.0 }
 0x1cf   : > { %v2901_v45 = vadd.f32 %v2900_v18, %v2899_v56  ;;  %v2908_v37 = vadd.f32 %v2907_v23, %v2906_v58  ;;  %v2915_v53 = vadd.f32 %v2914_v24, %v2913_v10  ;;  %v2956_v59 = vrot.slane %v2955_v22, 1  ;;  %v7175_v10 = vpop.permute.xlu1 %3909 }
 0x1d0   : > { %v2963_v54 = vrot.slane %v2962_v32, 1  ;;  %v2970_v9 = vrot.slane %v2969_v48, 1  ;;  %vm2223_vm12 = vcmp.gt.f32.partialorder %v7144_v17, 0.0  ;;  %v2236_v20 = vmul.f32 0.2, %v7121_v50 }
 0x1d1   : > { %v3011_v5 = vadd.f32 %v7086_v15, %v2901_v45  ;;  %v3012_v11 = vadd.f32 %v7086_v15, %v2908_v37  ;;  %v3013_v6 = vadd.f32 %v7086_v15, %v2915_v53  ;;  %v2957_v16 = vadd.f32 %v2956_v59, %v2955_v22 }
 0x1d2   : > { %v2964_v26 = vadd.f32 %v2963_v54, %v2962_v32  ;;  %v2971_v35 = vadd.f32 %v2970_v9, %v2969_v48  ;;  %v3765_v32 = vmul.f32 %v7162_v36, %v6999_v28  ;;  %v3766_v45 = vmul.f32 %v7162_v36, %v7002_v30 }
 0x1d3   : > { %v7178_v60 = vadd.f32 %v7131_v13, %v3011_v5  ;;  %v7180_v18 = vadd.f32 %v3033_v19, %v3012_v11  ;;  %v7182_v23 = vadd.f32 %v3034_v27, %v3013_v6  ;;  %v3019_v24 = vadd.f32 %v7086_v15, %v2957_v16 }
 0x1d4   : > { %v3020_v22 = vadd.f32 %v7086_v15, %v2964_v26  ;;  %v3767_v19 = vmul.f32 %v7162_v36, %v7005_v31  ;;  %v3918_v27 = vrot.slane %v7175_v10, 1  ;;  %v3919_v53 = vrot.slane %v7175_v10, 2 }
 0x1d5   : > { %v7191_v37 = vadd.f32 %v7147_v43, %v3019_v24  ;;  %v3021_v9 = vadd.f32 %v7086_v15, %v2971_v35  ;;  %v3829_v26 = vsel %vm8285_vm2, %v3765_v32, 0.0  ;;  %v3836_v54 = vsel %vm8285_vm2, %v3766_v45, 0.0 }
 0x1d6   : > { %v7198_v59 = vadd.f32 %v3040_v25, %v3020_v22  ;;  %v3830_v48 = vrot.slane %v3829_v26, 4  ;;  %v3837_v5 = vrot.slane %v3836_v54, 4  ;;  %v3843_v11 = vsel %vm8285_vm2, %v3767_v19, 0.0 }
 0x1d7   : > { %v7204_v16 = vadd.f32 %v3041_v61, %v3021_v9  ;;  %v3844_v24 = vrot.slane %v3843_v11, 4  ;;  %v2232_v19 = vmul.f32 0.2, %v7096_v1  ;;  %v2233_v9 = vmul.f32 0.2, %v7102_v2 }
 0x1d8   : > { %v3831_v25 = vadd.f32 %v3830_v48, %v3829_v26  ;;  %v3838_v35 = vadd.f32 %v3837_v5, %v3836_v54  ;;  %v2166_v26 = vrot.slane %v7098_v3, 5  ;;  %v7226_v5 = vld [vmem:[%s7215_s18 + $0x8] sm:$0xff]  ;;  %v2237_v0 = vmul.f32 0.2, %v7137_v62 }
 0x1d9   : > { %v3845_v22 = vadd.f32 %v3844_v24, %v3843_v11  ;;  %v2234_v11 = vmul.f32 0.2, %v7106_v12  ;;  %v2235_v24 = vmul.f32 0.2, %v7119_v55  ;;  %v2238_v14 = vmul.f32 0.2, %v7139_v33 }
 0x1da   : > { %v3832_v61 = vrot.slane %v3831_v25, 2  ;;  %v3839_v32 = vrot.slane %v3838_v35, 2  ;;  %vm8287_vm2 = vcmp.gt.f32.partialorder %v7226_v5, 0.0 }
 0x1db   : > { %v3846_v45 = vrot.slane %v3845_v22, 2 }
 0x1dc   : > { %v3833_v54 = vadd.f32 %v3832_v61, %v3831_v25  ;;  %v3840_v48 = vadd.f32 %v3839_v32, %v3838_v35  ;;  %v2239_v25 = vmul.f32 0.2, %v7144_v17  ;;  %v2248_v35 = vsel %vm2216_vm3, %v7096_v1, %v2232_v19 }
 0x1dd   : > { %v3847_v56 = vadd.f32 %v3846_v45, %v3845_v22  ;;  %v2249_v22 = vsel %vm2217_vm4, %v7102_v2, %v2233_v9  ;;  %v2250_v32 = vsel %vm2218_vm5, %v7106_v12, %v2234_v11  ;;  %v2251_v45 = vsel %vm2219_vm7, %v7119_v55, %v2235_v24 }
 0x1de   : > { %v3834_v58 = vrot.slane %v3833_v54, 1  ;;  %v3841_v6 = vrot.slane %v3840_v48, 1  ;;  %v2252_v1 = vsel %vm2220_vm8, %v7121_v50, %v2236_v20  ;;  %v2253_v2 = vsel %vm2221_vm9, %v7137_v62, %v2237_v0 }
 0x1df   : > { %v3848_v61 = vrot.slane %v3847_v56, 1  ;;  %v2254_v12 = vsel %vm2222_vm11, %v7139_v33, %v2238_v14  ;;  %v2255_v55 = vsel %vm2223_vm12, %v7144_v17, %v2239_v25  ;;  %v2295_v9 = vrot.slane %v2249_v22, 7 }
 0x1e0   : > { %v3835_v34 = vadd.f32 %v3834_v58, %v3833_v54  ;;  %v3842_v42 = vadd.f32 %v3841_v6, %v3840_v48  ;;  %v2297_v54 = vrot.slane %v2250_v32, 6  ;;  %v2299_v50 = vrot.slane %v2251_v45, 5 }
 0x1e1   : > { %v3849_v19 = vadd.f32 %v3848_v61, %v3847_v56  ;;  %v2296_v62 = vsel %vm2275_vm6, %v2295_v9, %v2248_v35  ;;  %v2301_v0 = vrot.slane %v2252_v1, 4  ;;  %v2303_v56 = vrot.slane %v2253_v2, 3 }
 0x1e2   : > { %v3897_v58 = vadd.f32 %v6989_v47, %v3835_v34  ;;  %v3898_v6 = vadd.f32 %v6989_v47, %v3842_v42  ;;  %v2298_v17 = vsel %vm2278_vm10, %v2297_v54, %v2296_v62  ;;  %v2305_v34 = vrot.slane %v2254_v12, 2 }
 0x1e3   : > { %v3899_v20 = vadd.f32 %v6989_v47, %v3849_v19  ;;  %v2300_v14 = vsel %vm2281_vm13, %v2299_v50, %v2298_v17  ;;  %v2307_v11 = vrot.slane %v2255_v55, 1  ;;  %v2167_v24 = vrot.slane %v7098_v3, 6 }
 0x1e4   : > { %v7264_v48 = vadd.f32 %v7175_v10, %v3897_v58  ;;  %v7268_v33 = vadd.f32 %v3918_v27, %v3898_v6  ;;  %v2302_v25 = vsel %vm2284_vm14, %v2301_v0, %v2300_v14  ;;  %v2168_v35 = vrot.slane %v7098_v3, 7  ;;  %v7297_v3 = vld [vmem:[%s7215_s18] sm:$0xff] }
 0x1e5   : > { %v7273_v42 = vadd.f32 %v3919_v53, %v3899_v20  ;;  %v2195_v27 = vadd.f32 %v2164_v46, %v7088_v40  ;;  %v2196_v61 = vadd.f32 %v2165_v7, %v7090_v51  ;;  %v2304_v53 = vsel %vm2287_vm15, %v2303_v56, %v2302_v25  ;;  %v7293_v40 = vpop.permute.xlu1 %4628 }
 0x1e6   : > { %v2197_v22 = vadd.f32 %v2166_v26, %v7092_v29  ;;  %v2198_v32 = vadd.f32 %v2167_v24, %v7094_v44  ;;  %vm2208_vm3 = vcmp.gt.f32.partialorder %v7111_v63, 0.0  ;;  %v2306_v45 = vsel %vm8286_vm1, %v2305_v34, %v2304_v53 }
 0x1e7   : > { %v2199_v1 = vadd.f32 %v2168_v35, %v7100_v49  ;;  %vm2209_vm4 = vcmp.gt.f32.partialorder %v7113_v57, 0.0  ;;  %vm2210_vm5 = vcmp.gt.f32.partialorder %v7115_v4, 0.0  ;;  %v2308_v51 = vsel %vm2293_vm0, %v2307_v11, %v2306_v45 }
 0x1e8   : > { %vm2211_vm7 = vcmp.gt.f32.partialorder %v2195_v27, 0.0  ;;  %vm2212_vm8 = vcmp.gt.f32.partialorder %v2196_v61, 0.0  ;;  %vm2213_vm9 = vcmp.gt.f32.partialorder %v2197_v22, 0.0  ;;  %v7301_v29 = vsel %vm8287_vm2, %v2308_v51, -1e+30 }
 0x1e9   : > { %vm2214_vm11 = vcmp.gt.f32.partialorder %v2198_v32, 0.0  ;;  %vm2215_vm12 = vcmp.gt.f32.partialorder %v2199_v1, 0.0  ;;  %v2224_v44 = vmul.f32 0.2, %v7111_v63  ;;  %vm8322_vm1 = vcmask 261120   ;;  %v7325_v34 = vpop.permute.xlu1 %4783 }
 0x1ea   : > { %v2316_v49 = vsel %vm8322_vm1, %v7301_v29, -inf  ;;  %v2225_v46 = vmul.f32 0.2, %v7113_v57  ;;  %v2226_v7 = vmul.f32 0.2, %v7115_v4  ;;  %v4639_v26 = vmul.f32 %v7293_v40, %v6999_v28 }
 0x1eb   : > { %2317 = vmax.xlane.f32.xlu0 %v2316_v49  ;;  %v2227_v2 = vmul.f32 0.2, %v2195_v27  ;;  %v2228_v19 = vmul.f32 0.2, %v2196_v61  ;;  %v2229_v12 = vmul.f32 0.2, %v2197_v22  ;;  %v2240_v55 = vsel %vm2208_vm3, %v7111_v63, %v2224_v44  ;;  %vm8323_vm3 = vmmov %vm8322_vm1 }
 0x1ec   : > { %vm2256_vm2 = vcmp.gt.f32.partialorder %v7297_v3, 0.0  ;;  %v2230_v9 = vmul.f32 0.2, %v2198_v32  ;;  %v2231_v58 = vmul.f32 0.2, %v2199_v1  ;;  %v2241_v6 = vsel %vm2209_vm4, %v7113_v57, %v2225_v46  ;;  %vm8324_vm4 = vmmov %vm8322_vm1 }
 0x1ed   : > { %v2242_v28 = vsel %vm2210_vm5, %v7115_v4, %v2226_v7  ;;  %v2243_v54 = vsel %vm2211_vm7, %v2195_v27, %v2227_v2  ;;  %v2244_v50 = vsel %vm2212_vm8, %v2196_v61, %v2228_v19  ;;  %v2245_v20 = vsel %vm2213_vm9, %v2197_v22, %v2229_v12  ;;  %vm8327_vm7 = vmmov %vm8322_vm1 }
 0x1ee   : > { %v2274_v62 = vrot.slane %v2241_v6, 7  ;;  %v2246_v63 = vsel %vm2214_vm11, %v2198_v32, %v2230_v9  ;;  %v2247_v0 = vsel %vm2215_vm12, %v2199_v1, %v2231_v58  ;;  %v2277_v56 = vrot.slane %v2242_v28, 6  ;;  %vm8329_vm8 = vmmov %vm8322_vm1 }
 0x1ef   : > { %v2280_v17 = vrot.slane %v2243_v54, 5  ;;  %v2283_v14 = vrot.slane %v2244_v50, 4  ;;  %v2286_v11 = vrot.slane %v2245_v20, 3  ;;  %v2289_v4 = vrot.slane %v2246_v63, 2  ;;  %v8326_v50 = vld [vmem:[#allocation27_spill] sm:$0xff]  ;;  %vm8330_vm9 = vmmov %vm8322_vm1 }
 0x1f0   : > { %v2276_v57 = vsel %vm2275_vm6, %v2274_v62, %v2240_v55  ;;  %v2292_v25 = vrot.slane %v2247_v0, 1  ;;  %v4640_v35 = vmul.f32 %v7293_v40, %v7002_v30  ;;  %v4641_v27 = vmul.f32 %v7293_v40, %v7005_v31  ;;  %v8328_v0 = vld [vmem:[#allocation28_spill] sm:$0xff]  ;;  %vm8331_vm11 = vmmov %vm8322_vm1 }
 0x1f1   : > { %v2279_v24 = vsel %vm2278_vm10, %v2277_v56, %v2276_v57  ;;  %v4703_v53 = vsel %vm8322_vm1, %v4639_v26, 0.0  ;;  %v4792_v22 = vrot.slane %v7325_v34, 1  ;;  %v4793_v32 = vrot.slane %v7325_v34, 2  ;;  %vm8332_vm12 = vmmov %vm8322_vm1 }
 0x1f2   : > { %v2282_v61 = vsel %vm2281_vm13, %v2280_v17, %v2279_v24  ;;  %v4704_v1 = vrot.slane %v4703_v53, 4  ;;  %v4710_v51 = vsel %vm8323_vm3, %v4640_v35, 0.0  ;;  %v4717_v44 = vsel %vm8324_vm4, %v4641_v27, 0.0 }
 0x1f3   : > { %v2285_v45 = vsel %vm2284_vm14, %v2283_v14, %v2282_v61  ;;  %v4711_v49 = vrot.slane %v4710_v51, 4  ;;  %v4718_v46 = vrot.slane %v4717_v44, 4  ;;  %v4794_v31 = vrot.slane %v7325_v34, 3 }
 0x1f4   : > { %v2288_v30 = vsel %vm2287_vm15, %v2286_v11, %v2285_v45  ;;  %vm8325_vm5 = vcmask 1046534   ;;  %v4705_v26 = vadd.f32 %v4704_v1, %v4703_v53  ;;  %v4795_v2 = vrot.slane %v7325_v34, 4 }
 0x1f5   : > { %v2291_v7 = vsel %vm8325_vm5, %v2289_v4, %v2288_v30  ;;  %v2890_v19 = vmul.f32 %v7117_v8, %v7021_v38  ;;  %v4712_v55 = vadd.f32 %v4711_v49, %v4710_v51  ;;  %v4719_v9 = vadd.f32 %v4718_v46, %v4717_v44 }
 0x1f6   : > { %v2294_v12 = vsel %vm2293_vm0, %v2292_v25, %v2291_v7  ;;  %v2891_v58 = vmul.f32 %v7117_v8, %v7024_v39  ;;  %v4706_v28 = vrot.slane %v4705_v26, 2  ;;  %v2892_v54 = vmul.f32 %v7117_v8, %v7028_v41 }
 0x1f7   : > { %v7351_v6 = vsel %vm2256_vm2, %v2294_v12, -1e+30  ;;  %v2893_v20 = vmul.f32 %v7117_v8, %v8326_v50  ;;  %v4713_v62 = vrot.slane %v4712_v55, 2  ;;  %v4720_v63 = vrot.slane %v4719_v9, 2 }
 0x1f8   : > { %v2313_v38 = vsel %vm8327_vm7, %v7351_v6, -inf  ;;  %v2894_v56 = vmul.f32 %v7117_v8, %v8328_v0  ;;  %v4707_v39 = vadd.f32 %v4706_v28, %v4705_v26  ;;  %v2972_v17 = vsel %vm8329_vm8, %v2890_v19, 0.0 }
 0x1f9   : > { %2314 = vmax.xlane.f32.xlu1 %v2313_v38  ;;  %v2979_v57 = vsel %vm8330_vm9, %v2891_v58, 0.0  ;;  %v2986_v14 = vsel %vm8331_vm11, %v2892_v54, 0.0  ;;  %v4714_v41 = vadd.f32 %v4713_v62, %v4712_v55  ;;  %v4721_v11 = vadd.f32 %v4720_v63, %v4719_v9  ;;  %v8333_v55 = vld [vmem:[#allocation26_spill] sm:$0xff] }
 0x1fa   : > { %v2973_v4 = vrot.slane %v2972_v17, 4  ;;  %v2980_v24 = vrot.slane %v2979_v57, 4  ;;  %v4708_v25 = vrot.slane %v4707_v39, 1  ;;  %v2987_v35 = vrot.slane %v2986_v14, 4 }
 0x1fb   : > { %v2993_v27 = vsel %vm8332_vm12, %v2893_v20, 0.0  ;;  %v3000_v61 = vsel %vm8322_vm1, %v2894_v56, 0.0  ;;  %v4715_v53 = vrot.slane %v4714_v41, 1  ;;  %v4722_v45 = vrot.slane %v4721_v11, 1 }
 0x1fc   : > { %v2974_v1 = vadd.f32 %v2973_v4, %v2972_v17  ;;  %v2981_v51 = vadd.f32 %v2980_v24, %v2979_v57  ;;  %v4709_v44 = vadd.f32 %v4708_v25, %v4707_v39  ;;  %v2988_v30 = vadd.f32 %v2987_v35, %v2986_v14 }
 0x1fd   : > { %v2994_v49 = vrot.slane %v2993_v27, 4  ;;  %v3001_v46 = vrot.slane %v3000_v61, 4  ;;  %v4716_v7 = vadd.f32 %v4715_v53, %v4714_v41  ;;  %v4723_v26 = vadd.f32 %v4722_v45, %v4721_v11 }
 0x1fe   : > { %v2975_v19 = vrot.slane %v2974_v1, 2  ;;  %v2982_v12 = vrot.slane %v2981_v51, 2  ;;  %v4771_v9 = vadd.f32 %v8333_v55, %v4709_v44  ;;  %v2989_v58 = vrot.slane %v2988_v30, 2 }
 0x1ff   : > { %v2995_v28 = vadd.f32 %v2994_v49, %v2993_v27  ;;  %v3002_v54 = vadd.f32 %v3001_v46, %v3000_v61  ;;  %v4772_v50 = vadd.f32 %v8333_v55, %v4716_v7  ;;  %v4773_v20 = vadd.f32 %v8333_v55, %v4723_v26 }
 0x200   : > { %v2976_v38 = vadd.f32 %v2975_v19, %v2974_v1  ;;  %v2983_v62 = vadd.f32 %v2982_v12, %v2981_v51  ;;  %v7370_v63 = vadd.f32 %v7325_v34, %v4771_v9  ;;  %v2990_v0 = vadd.f32 %v2989_v58, %v2988_v30 }
 0x201   : > { %v2996_v56 = vrot.slane %v2995_v28, 2  ;;  %v3003_v39 = vrot.slane %v3002_v54, 2  ;;  %v7374_v17 = vadd.f32 %v4792_v22, %v4772_v50  ;;  %v7378_v57 = vadd.f32 %v4793_v32, %v4773_v20 }
 0x202   : > { %v2977_v14 = vrot.slane %v2976_v38, 1  ;;  %v2984_v41 = vrot.slane %v2983_v62, 1  ;;  %v2991_v11 = vrot.slane %v2990_v0, 1  ;;  %v3044_v25 = vrot.slane %v7147_v43, 5 }
 0x203   : > { %v2997_v4 = vadd.f32 %v2996_v56, %v2995_v28  ;;  %v3004_v24 = vadd.f32 %v3003_v39, %v3002_v54  ;;  %v3045_v61 = vrot.slane %v7147_v43, 6  ;;  %v3046_v53 = vrot.slane %v7147_v43, 7 }
 0x204   : > { %v2978_v35 = vadd.f32 %v2977_v14, %v2976_v38  ;;  %v2985_v27 = vadd.f32 %v2984_v41, %v2983_v62  ;;  %v2992_v45 = vadd.f32 %v2991_v11, %v2990_v0  ;;  %vm3087_vm3 = vcmp.gt.f32.partialorder %v7191_v37, 0.0 }
 0x205   : > { %v2998_v22 = vrot.slane %v2997_v4, 1  ;;  %v3005_v1 = vrot.slane %v3004_v24, 1  ;;  %vm3088_vm4 = vcmp.gt.f32.partialorder %v7198_v59, 0.0  ;;  %vm3089_vm5 = vcmp.gt.f32.partialorder %v7204_v16, 0.0 }
 0x206   : > { %v3022_v32 = vadd.f32 %v7086_v15, %v2978_v35  ;;  %v3023_v51 = vadd.f32 %v7086_v15, %v2985_v27  ;;  %v3024_v49 = vadd.f32 %v7086_v15, %v2992_v45  ;;  %v3103_v46 = vmul.f32 0.2, %v7191_v37 }
 0x207   : > { %v2999_v44 = vadd.f32 %v2998_v22, %v2997_v4  ;;  %v3006_v30 = vadd.f32 %v3005_v1, %v3004_v24  ;;  %v8334_v7 = vrot.slane %v7147_v43, 3  ;;  %v8335_v19 = vrot.slane %v7147_v43, 4 }
 0x208   : > { %v3104_v9 = vmul.f32 0.2, %v7198_v59  ;;  %v3105_v58 = vmul.f32 0.2, %v7204_v16  ;;  %v3076_v50 = vadd.f32 %v3044_v25, %v3024_v49  ;;  %v3119_v20 = vsel %vm3087_vm3, %v7191_v37, %v3103_v46  ;;  %v8338_v46 = vld [vmem:[#allocation31_spill] sm:$0xff]  ;;  %vm8341_vm3 = vmmov %vm8322_vm1 }
 0x209   : > { %v3074_v26 = vadd.f32 %v8334_v7, %v3022_v32  ;;  %v3075_v12 = vadd.f32 %v8335_v19, %v3023_v51  ;;  %v3025_v28 = vadd.f32 %v7086_v15, %v2999_v44  ;;  %v3026_v54 = vadd.f32 %v7086_v15, %v3006_v30  ;;  %v8336_v51 = vld [vmem:[#allocation29_spill] sm:$0xff]  ;;  %v8337_v30 = vld [vmem:[#allocation30_spill] sm:$0xff] }
 0x20a   : > { %vm3092_vm9 = vcmp.gt.f32.partialorder %v3076_v50, 0.0  ;;  %v3108_v56 = vmul.f32 0.2, %v3076_v50  ;;  %v3120_v39 = vsel %vm3088_vm4, %v7198_v59, %v3104_v9  ;;  %v3121_v14 = vsel %vm3089_vm5, %v7204_v16, %v3105_v58  ;;  %v8340_v9 = vld [vmem:[#allocation33_spill] sm:$0xff]  ;;  %vm8342_vm4 = vmmov %vm8322_vm1 }
 0x20b   : > { %vm3090_vm7 = vcmp.gt.f32.partialorder %v3074_v26, 0.0  ;;  %vm3091_vm8 = vcmp.gt.f32.partialorder %v3075_v12, 0.0  ;;  %v3106_v38 = vmul.f32 0.2, %v3074_v26  ;;  %v3107_v62 = vmul.f32 0.2, %v3075_v12  ;;  %vm8343_vm5 = vmmov %vm8322_vm1 }
 0x20c   : > { %v3077_v0 = vadd.f32 %v3045_v61, %v3025_v28  ;;  %v3078_v43 = vadd.f32 %v3046_v53, %v3026_v54  ;;  %v3124_v24 = vsel %vm3092_vm9, %v3076_v50, %v3108_v56  ;;  %v3157_v25 = vrot.slane %v3120_v39, 7 }
 0x20d   : > { %v3122_v41 = vsel %vm3090_vm7, %v3074_v26, %v3106_v38  ;;  %v3123_v11 = vsel %vm3091_vm8, %v3075_v12, %v3107_v62  ;;  %v3159_v35 = vrot.slane %v3121_v14, 6  ;;  %v3165_v22 = vrot.slane %v3124_v24, 3  ;;  %v8339_v26 = vld [vmem:[#allocation32_spill] sm:$0xff]  ;;  %vm8345_vm8 = vmmov %vm8322_vm1 }
 0x20e   : > { %vm3093_vm11 = vcmp.gt.f32.partialorder %v3077_v0, 0.0  ;;  %vm3094_vm12 = vcmp.gt.f32.partialorder %v3078_v43, 0.0  ;;  %v3109_v37 = vmul.f32 0.2, %v3077_v0  ;;  %v3110_v4 = vmul.f32 0.2, %v3078_v43 }
 0x20f   : > { %v3161_v27 = vrot.slane %v3122_v41, 5  ;;  %v3163_v45 = vrot.slane %v3123_v11, 4  ;;  %v3158_v59 = vsel %vm2275_vm6, %v3157_v25, %v3119_v20  ;;  %v2882_v16 = vmul.f32 %v7117_v8, %v8336_v51 }
 0x210   : > { %v3125_v61 = vsel %vm3093_vm11, %v3077_v0, %v3109_v37  ;;  %v3126_v53 = vsel %vm3094_vm12, %v3078_v43, %v3110_v4  ;;  %v3160_v44 = vsel %vm2278_vm10, %v3159_v35, %v3158_v59  ;;  %v2883_v49 = vmul.f32 %v7117_v8, %v8337_v30  ;;  %vm8347_vm11 = vmmov %vm8322_vm1 }
 0x211   : > { %v3167_v1 = vrot.slane %v3125_v61, 2  ;;  %v3169_v32 = vrot.slane %v3126_v53, 1  ;;  %v2884_v7 = vmul.f32 %v7117_v8, %v8338_v46  ;;  %v2885_v19 = vmul.f32 %v7117_v8, %v8339_v26 }
 0x212   : > { %v3162_v12 = vsel %vm2281_vm13, %v3161_v27, %v3160_v44  ;;  %v2886_v58 = vmul.f32 %v7117_v8, %v8340_v9  ;;  %v2916_v28 = vsel %vm8322_vm1, %v2882_v16, 0.0  ;;  %v3037_v54 = vrot.slane %v7131_v13, 5 }
 0x213   : > { %v3164_v50 = vsel %vm2284_vm14, %v3163_v45, %v3162_v12  ;;  %v2917_v20 = vrot.slane %v2916_v28, 4  ;;  %v2923_v38 = vsel %vm8341_vm3, %v2883_v49, 0.0  ;;  %v2930_v62 = vsel %vm8342_vm4, %v2884_v7, 0.0 }
 0x214   : > { %v3166_v0 = vsel %vm2287_vm15, %v3165_v22, %v3164_v50  ;;  %v2924_v43 = vrot.slane %v2923_v38, 4  ;;  %v2931_v56 = vrot.slane %v2930_v62, 4  ;;  %v2937_v39 = vsel %vm8343_vm5, %v2885_v19, 0.0 }
 0x215   : > { %vm8344_vm7 = vcmask 1046534   ;;  %v2918_v8 = vadd.f32 %v2917_v20, %v2916_v28  ;;  %v2938_v41 = vrot.slane %v2937_v39, 4  ;;  %v2944_v11 = vsel %vm8345_vm8, %v2886_v58, 0.0 }
 0x216   : > { %v3168_v14 = vsel %vm8344_vm7, %v3167_v1, %v3166_v0  ;;  %v2925_v4 = vadd.f32 %v2924_v43, %v2923_v38  ;;  %v2932_v24 = vadd.f32 %v2931_v56, %v2930_v62  ;;  %v2945_v25 = vrot.slane %v2944_v11, 4 }
 0x217   : > { %v3170_v37 = vsel %vm2293_vm0, %v3169_v32, %v3168_v14  ;;  %vm8346_vm9 = vcmp.gt.f32.partialorder %v7226_v5, 0.0  ;;  %v2919_v27 = vrot.slane %v2918_v8, 2  ;;  %v2939_v61 = vadd.f32 %v2938_v41, %v2937_v39 }
 0x218   : > { %v7432_v35 = vsel %vm8346_vm9, %v3170_v37, -1e+30  ;;  %v3038_v53 = vrot.slane %v7131_v13, 6  ;;  %v2926_v22 = vrot.slane %v2925_v4, 2  ;;  %v2933_v59 = vrot.slane %v2932_v24, 2 }
 0x219   : > { %v3178_v45 = vsel %vm8347_vm11, %v7432_v35, -inf  ;;  %v2946_v1 = vadd.f32 %v2945_v25, %v2944_v11  ;;  %v2920_v51 = vadd.f32 %v2919_v27, %v2918_v8  ;;  %v2940_v32 = vrot.slane %v2939_v61, 2 }
 0x21a   : > { %3179 = vmax.xlane.f32.xlu1 %v3178_v45  ;;  %v3039_v16 = vrot.slane %v7131_v13, 7  ;;  %vm3079_vm12 = vcmp.gt.f32.partialorder %v7178_v60, 0.0  ;;  %v2927_v44 = vadd.f32 %v2926_v22, %v2925_v4  ;;  %v2934_v30 = vadd.f32 %v2933_v59, %v2932_v24 }
 0x21b   : > { %v2947_v49 = vrot.slane %v2946_v1, 2  ;;  %vm3080_vm1 = vcmp.gt.f32.partialorder %v7180_v18, 0.0  ;;  %v2921_v46 = vrot.slane %v2920_v51, 1  ;;  %v2941_v7 = vadd.f32 %v2940_v32, %v2939_v61  ;;  %v7461_v61 = vld [vmem:[%s6690_s27 + $0x58] sm:$0xff] }
 0x21c   : > { %vm3081_vm3 = vcmp.gt.f32.partialorder %v7182_v23, 0.0  ;;  %v3095_v26 = vmul.f32 0.2, %v7178_v60  ;;  %v2928_v19 = vrot.slane %v2927_v44, 1  ;;  %v2935_v12 = vrot.slane %v2934_v30, 1 }
 0x21d   : > { %v2948_v9 = vadd.f32 %v2947_v49, %v2946_v1  ;;  %v3096_v58 = vmul.f32 0.2, %v7180_v18  ;;  %v2922_v28 = vadd.f32 %v2921_v46, %v2920_v51  ;;  %v2942_v50 = vrot.slane %v2941_v7, 1 }
 0x21e   : > { %v3097_v20 = vmul.f32 0.2, %v7182_v23  ;;  %v3111_v38 = vsel %vm3079_vm12, %v7178_v60, %v3095_v26  ;;  %v2929_v62 = vadd.f32 %v2928_v19, %v2927_v44  ;;  %v2936_v0 = vadd.f32 %v2935_v12, %v2934_v30  ;;  %v7472_v30 = vld [vmem:[%s6690_s27 + $0x60] sm:$0xff]  ;;  %vm8350_vm12 = vmmov %vm8347_vm11 }
 0x21f   : > { %v2949_v43 = vrot.slane %v2948_v9, 1  ;;  %v3112_v56 = vsel %vm3080_vm1, %v7180_v18, %v3096_v58  ;;  %v2943_v39 = vadd.f32 %v2942_v50, %v2941_v7  ;;  %v3014_v14 = vadd.f32 %v7086_v15, %v2922_v28  ;;  %v7477_v28 = vld [vmem:[%s6690_s27 + $0x68] sm:$0xff]  ;;  %vm8351_vm1 = vmmov %vm8347_vm11 }
 0x220   : > { %v3113_v8 = vsel %vm3081_vm3, %v7182_v23, %v3097_v20  ;;  %v3143_v41 = vrot.slane %v3112_v56, 7  ;;  %v3015_v60 = vadd.f32 %v7086_v15, %v2929_v62  ;;  %v3016_v37 = vadd.f32 %v7086_v15, %v2936_v0  ;;  %v7484_v56 = vld [vmem:[%s6690_s27 + $0x70] sm:$0xff] }
 0x221   : > { %v2950_v11 = vadd.f32 %v2949_v43, %v2948_v9  ;;  %v3145_v4 = vrot.slane %v3113_v8, 6  ;;  %v3017_v24 = vadd.f32 %v7086_v15, %v2943_v39  ;;  %v8348_v25 = vrot.slane %v7131_v13, 3 }
 0x222   : > { %v3144_v27 = vsel %vm2275_vm6, %v3143_v41, %v3111_v38  ;;  %v3768_v23 = vmul.f32 %v7461_v61, %v7162_v36  ;;  %v8349_v22 = vrot.slane %v7131_v13, 4  ;;  %v3068_v1 = vadd.f32 %v3037_v54, %v3016_v37 }
 0x223   : > { %v3066_v18 = vadd.f32 %v8348_v25, %v3014_v14  ;;  %v3018_v45 = vadd.f32 %v7086_v15, %v2950_v11  ;;  %v3146_v51 = vsel %vm2278_vm10, %v3145_v4, %v3144_v27  ;;  %v3069_v32 = vadd.f32 %v3038_v53, %v3017_v24  ;;  %v7489_v14 = vld [vmem:[%s6690_s27 + $0x78] sm:$0xff] }
 0x224   : > { %v3067_v59 = vadd.f32 %v8349_v22, %v3015_v60  ;;  %v3769_v49 = vmul.f32 %v7472_v30, %v7162_v36  ;;  %vm3084_vm7 = vcmp.gt.f32.partialorder %v3068_v1, 0.0  ;;  %v3100_v7 = vmul.f32 0.2, %v3068_v1 }
 0x225   : > { %vm3082_vm4 = vcmp.gt.f32.partialorder %v3066_v18, 0.0  ;;  %v3098_v44 = vmul.f32 0.2, %v3066_v18  ;;  %v3070_v46 = vadd.f32 %v3039_v16, %v3018_v45  ;;  %vm3085_vm8 = vcmp.gt.f32.partialorder %v3069_v32, 0.0 }
 0x226   : > { %vm3083_vm5 = vcmp.gt.f32.partialorder %v3067_v59, 0.0  ;;  %v3099_v15 = vmul.f32 0.2, %v3067_v59  ;;  %v3101_v26 = vmul.f32 0.2, %v3069_v32  ;;  %v3116_v12 = vsel %vm3084_vm7, %v3068_v1, %v3100_v7  ;;  %vm8355_vm7 = vmmov %vm8351_vm1 }
 0x227   : > { %v3114_v13 = vsel %vm3082_vm4, %v3066_v18, %v3098_v44  ;;  %vm3086_vm9 = vcmp.gt.f32.partialorder %v3070_v46, 0.0  ;;  %v3102_v54 = vmul.f32 0.2, %v3070_v46  ;;  %v3770_v16 = vmul.f32 %v7477_v28, %v7162_v36  ;;  %vm8353_vm4 = vmmov %vm8351_vm1 }
 0x228   : > { %v3115_v53 = vsel %vm3083_vm5, %v3067_v59, %v3099_v15  ;;  %v3147_v19 = vrot.slane %v3114_v13, 5  ;;  %v3117_v9 = vsel %vm3085_vm8, %v3069_v32, %v3101_v26  ;;  %v3151_v38 = vrot.slane %v3116_v12, 3  ;;  %vm8354_vm5 = vmmov %vm8351_vm1 }
 0x229   : > { %v3149_v58 = vrot.slane %v3115_v53, 4  ;;  %v3118_v50 = vsel %vm3086_vm9, %v3070_v46, %v3102_v54  ;;  %v3153_v62 = vrot.slane %v3117_v9, 2  ;;  %v3771_v39 = vmul.f32 %v7484_v56, %v7162_v36 }
 0x22a   : > { %v3148_v20 = vsel %vm2281_vm13, %v3147_v19, %v3146_v51  ;;  %v3155_v43 = vrot.slane %v3118_v50, 1  ;;  %v3772_v8 = vmul.f32 %v7489_v14, %v7162_v36  ;;  %v3850_v11 = vsel %vm8347_vm11, %v3768_v23, 0.0 }
 0x22b   : > { %v3150_v0 = vsel %vm2284_vm14, %v3149_v58, %v3148_v20  ;;  %v3857_v60 = vsel %vm8350_vm12, %v3769_v49, 0.0  ;;  %v3864_v37 = vsel %vm8351_vm1, %v3770_v16, 0.0  ;;  %vm8352_vm3 = vcmask 1046534  }
 0x22c   : > { %v3152_v41 = vsel %vm2287_vm15, %v3151_v38, %v3150_v0  ;;  %v3851_v24 = vrot.slane %v3850_v11, 4  ;;  %v3858_v25 = vrot.slane %v3857_v60, 4  ;;  %v3865_v18 = vrot.slane %v3864_v37, 4 }
 0x22d   : > { %v3154_v4 = vsel %vm8352_vm3, %v3153_v62, %v3152_v41  ;;  %v3871_v45 = vsel %vm8353_vm4, %v3771_v39, 0.0  ;;  %v3878_v22 = vsel %vm8354_vm5, %v3772_v8, 0.0  ;;  %v3922_v59 = vrot.slane %v7175_v10, 5 }
 0x22e   : > { %v3156_v27 = vsel %vm2293_vm0, %v3155_v43, %v3154_v4  ;;  %v3852_v1 = vadd.f32 %v3851_v24, %v3850_v11  ;;  %v3859_v51 = vadd.f32 %v3858_v25, %v3857_v60  ;;  %v3866_v32 = vadd.f32 %v3865_v18, %v3864_v37 }
 0x22f   : > { %v7504_v23 = vsel %vm2256_vm2, %v3156_v27, -1e+30  ;;  %v3872_v49 = vrot.slane %v3871_v45, 4  ;;  %v3879_v46 = vrot.slane %v3878_v22, 4  ;;  %v3923_v15 = vrot.slane %v7175_v10, 6 }
 0x230   : > { %v3175_v44 = vsel %vm8355_vm7, %v7504_v23, -inf  ;;  %v3853_v7 = vrot.slane %v3852_v1, 2  ;;  %v3860_v26 = vrot.slane %v3859_v51, 2  ;;  %v3867_v13 = vrot.slane %v3866_v32, 2 }
 0x231   : > { %3176 = vmax.xlane.f32.xlu0 %v3175_v44  ;;  %v3924_v54 = vrot.slane %v7175_v10, 7  ;;  %v3873_v53 = vadd.f32 %v3872_v49, %v3871_v45  ;;  %v3880_v19 = vadd.f32 %v3879_v46, %v3878_v22  ;;  %vm3965_vm8 = vcmp.gt.f32.partialorder %v7264_v48, 0.0  ;;  %v7535_v46 = vld [vmem:[%s6690_s27 + $0x8] sm:$0xff] }
 0x232   : > { %vm3966_vm9 = vcmp.gt.f32.partialorder %v7268_v33, 0.0  ;;  %v3854_v12 = vadd.f32 %v3853_v7, %v3852_v1  ;;  %v3861_v9 = vadd.f32 %v3860_v26, %v3859_v51  ;;  %v3868_v58 = vadd.f32 %v3867_v13, %v3866_v32 }
 0x233   : > { %vm3967_vm11 = vcmp.gt.f32.partialorder %v7273_v42, 0.0  ;;  %v3874_v16 = vrot.slane %v3873_v53, 2  ;;  %v3881_v50 = vrot.slane %v3880_v19, 2  ;;  %v3981_v20 = vmul.f32 0.2, %v7264_v48 }
 0x234   : > { %v3982_v38 = vmul.f32 0.2, %v7268_v33  ;;  %v3855_v62 = vrot.slane %v3854_v12, 1  ;;  %v3862_v0 = vrot.slane %v3861_v9, 1  ;;  %v3869_v43 = vrot.slane %v3868_v58, 1 }
 0x235   : > { %v3983_v39 = vmul.f32 0.2, %v7273_v42  ;;  %v3875_v8 = vadd.f32 %v3874_v16, %v3873_v53  ;;  %v3882_v41 = vadd.f32 %v3881_v50, %v3880_v19  ;;  %v3997_v11 = vsel %vm3965_vm8, %v7264_v48, %v3981_v20  ;;  %v7547_v50 = vld [vmem:[%s6690_s27 + $0x10] sm:$0xff]  ;;  %vm8358_vm8 = vmmov %vm8355_vm7 }
 0x236   : > { %v3998_v60 = vsel %vm3966_vm9, %v7268_v33, %v3982_v38  ;;  %v3856_v37 = vadd.f32 %v3855_v62, %v3854_v12  ;;  %v3863_v4 = vadd.f32 %v3862_v0, %v3861_v9  ;;  %v3870_v24 = vadd.f32 %v3869_v43, %v3868_v58  ;;  %v7529_v33 = vld [vmem:[%s6690_s27] sm:$0xff]  ;;  %v7552_v38 = vld [vmem:[%s6690_s27 + $0x18] sm:$0xff]  ;;  %vm8359_vm9 = vmmov %vm8355_vm7 }
 0x237   : > { %v3999_v25 = vsel %vm3967_vm11, %v7273_v42, %v3983_v39  ;;  %v3876_v18 = vrot.slane %v3875_v8, 1  ;;  %v3883_v27 = vrot.slane %v3882_v41, 1  ;;  %v4035_v45 = vrot.slane %v3998_v60, 7  ;;  %v7562_v60 = vld [vmem:[%s6690_s27 + $0x28] sm:$0xff]  ;;  %vm8360_vm11 = vmmov %vm8355_vm7 }
 0x238   : > { %v4037_v22 = vrot.slane %v3999_v25, 6  ;;  %v3900_v1 = vadd.f32 %v6989_v47, %v3856_v37  ;;  %v3901_v48 = vadd.f32 %v6989_v47, %v3863_v4  ;;  %v3902_v51 = vadd.f32 %v6989_v47, %v3870_v24  ;;  %v7567_v4 = vld [vmem:[%s6690_s27 + $0x30] sm:$0xff] }
 0x239   : > { %v3757_v32 = vmul.f32 %v7529_v33, %v7162_v36  ;;  %v3877_v44 = vadd.f32 %v3876_v18, %v3875_v8  ;;  %v3884_v49 = vadd.f32 %v3883_v27, %v3882_v41  ;;  %v4036_v42 = vsel %vm2275_vm6, %v4035_v45, %v3997_v11  ;;  %v7557_v41 = vld [vmem:[%s6690_s27 + $0x20] sm:$0xff]  ;;  %v7574_v45 = vld [vmem:[%s6690_s27 + $0x38] sm:$0xff]  ;;  %s6531_s27 = smov 120  }
 0x23a   : > { %v3758_v7 = vmul.f32 %v7535_v46, %v7162_v36  ;;  %v8356_v26 = vrot.slane %v7175_v10, 3  ;;  %v8357_v53 = vrot.slane %v7175_v10, 4  ;;  %v3954_v12 = vadd.f32 %v3922_v59, %v3902_v51 }
 0x23b   : > { %v4038_v9 = vsel %vm2278_vm10, %v4037_v22, %v4036_v42  ;;  %v3903_v58 = vadd.f32 %v6989_v47, %v3877_v44  ;;  %v3904_v16 = vadd.f32 %v6989_v47, %v3884_v49  ;;  %v3759_v20 = vmul.f32 %v7547_v50, %v7162_v36 }
 0x23c   : > { %v3952_v13 = vadd.f32 %v8356_v26, %v3900_v1  ;;  %v3953_v19 = vadd.f32 %v8357_v53, %v3901_v48  ;;  %v3760_v10 = vmul.f32 %v7552_v38, %v7162_v36  ;;  %vm3970_vm3 = vcmp.gt.f32.partialorder %v3954_v12, 0.0 }
 0x23d   : > { %v3955_v62 = vadd.f32 %v3923_v15, %v3903_v58  ;;  %v3956_v0 = vadd.f32 %v3924_v54, %v3904_v16  ;;  %v3986_v39 = vmul.f32 0.2, %v3954_v12  ;;  %v3761_v11 = vmul.f32 %v7557_v41, %v7162_v36 }
 0x23e   : > { %vm3968_vm12 = vcmp.gt.f32.partialorder %v3952_v13, 0.0  ;;  %vm3969_vm1 = vcmp.gt.f32.partialorder %v3953_v19, 0.0  ;;  %v3984_v59 = vmul.f32 0.2, %v3952_v13  ;;  %v3985_v43 = vmul.f32 0.2, %v3953_v19 }
 0x23f   : > { %v3762_v37 = vmul.f32 %v7562_v60, %v7162_v36  ;;  %v3763_v15 = vmul.f32 %v7567_v4, %v7162_v36  ;;  %vm3971_vm4 = vcmp.gt.f32.partialorder %v3955_v62, 0.0  ;;  %vm3972_vm5 = vcmp.gt.f32.partialorder %v3956_v0, 0.0 }
 0x240   : > { %v4000_v8 = vsel %vm3968_vm12, %v3952_v13, %v3984_v59  ;;  %v3987_v54 = vmul.f32 0.2, %v3955_v62  ;;  %v3988_v24 = vmul.f32 0.2, %v3956_v0  ;;  %v4001_v25 = vsel %vm3969_vm1, %v3953_v19, %v3985_v43  ;;  %vm8362_vm1 = vmmov %vm8355_vm7 }
 0x241   : > { %v4002_v18 = vsel %vm3970_vm3, %v3954_v12, %v3986_v39  ;;  %v4039_v27 = vrot.slane %v4000_v8, 5  ;;  %v3764_v22 = vmul.f32 %v7574_v45, %v7162_v36  ;;  %v4041_v51 = vrot.slane %v4001_v25, 4 }
 0x242   : > { %v4003_v1 = vsel %vm3971_vm4, %v3955_v62, %v3987_v54  ;;  %v4004_v48 = vsel %vm3972_vm5, %v3956_v0, %v3988_v24  ;;  %v4043_v44 = vrot.slane %v4002_v18, 3  ;;  %v3773_v13 = vsel %vm8355_vm7, %v3757_v32, 0.0  ;;  %vm8364_vm4 = vmmov %vm8362_vm1 }
 0x243   : > { %v4040_v49 = vsel %vm2281_vm13, %v4039_v27, %v4038_v9  ;;  %v4045_v42 = vrot.slane %v4003_v1, 2  ;;  %v4047_v26 = vrot.slane %v4004_v48, 1  ;;  %v3774_v19 = vrot.slane %v3773_v13, 4  ;;  %vm8365_vm5 = vmmov %vm8362_vm1 }
 0x244   : > { %v4042_v53 = vsel %vm2284_vm14, %v4041_v51, %v4040_v49  ;;  %v3780_v12 = vsel %vm8358_vm8, %v3758_v7, 0.0  ;;  %v3787_v58 = vsel %vm8359_vm9, %v3759_v20, 0.0  ;;  %v3794_v62 = vsel %vm8360_vm11, %v3760_v10, 0.0  ;;  %vm8366_vm7 = vmmov %vm8362_vm1 }
 0x245   : > { %v4044_v16 = vsel %vm2287_vm15, %v4043_v44, %v4042_v53  ;;  %v3781_v36 = vrot.slane %v3780_v12, 4  ;;  %v3788_v59 = vrot.slane %v3787_v58, 4  ;;  %vm8361_vm12 = vcmask 1046534   ;;  %vm8367_vm8 = vmmov %vm8362_vm1 }
 0x246   : > { %v4046_v0 = vsel %vm8361_vm12, %v4045_v42, %v4044_v16  ;;  %v3775_v9 = vadd.f32 %v3774_v19, %v3773_v13  ;;  %v3795_v43 = vrot.slane %v3794_v62, 4  ;;  %v3801_v39 = vsel %vm8362_vm1, %v3761_v11, 0.0 }
 0x247   : > { %v4048_v32 = vsel %vm2293_vm0, %v4047_v26, %v4046_v0  ;;  %v3782_v8 = vadd.f32 %v3781_v36, %v3780_v12  ;;  %v3789_v54 = vadd.f32 %v3788_v59, %v3787_v58  ;;  %v3802_v24 = vrot.slane %v3801_v39, 4 }
 0x248   : > { %vm8363_vm3 = vcmp.gt.f32.partialorder %v7226_v5, 0.0  ;;  %v3776_v20 = vrot.slane %v3775_v9, 2  ;;  %v3796_v25 = vadd.f32 %v3795_v43, %v3794_v62  ;;  %v3808_v18 = vsel %vm8364_vm4, %v3762_v37, 0.0 }
 0x249   : > { %v7590_v7 = vsel %vm8363_vm3, %v4048_v32, -1e+30  ;;  %v3783_v27 = vrot.slane %v3782_v8, 2  ;;  %v3790_v1 = vrot.slane %v3789_v54, 2  ;;  %v3803_v48 = vadd.f32 %v3802_v24, %v3801_v39 }
 0x24a   : > { %v4056_v10 = vsel %vm8365_vm5, %v7590_v7, -inf  ;;  %v3777_v11 = vadd.f32 %v3776_v20, %v3775_v9  ;;  %v3797_v51 = vrot.slane %v3796_v25, 2  ;;  %v3809_v44 = vrot.slane %v3808_v18, 4 }
 0x24b   : > { %4057 = vmax.xlane.f32.xlu1 %v4056_v10  ;;  %v3815_v49 = vsel %vm8366_vm7, %v3763_v15, 0.0  ;;  %v3784_v42 = vadd.f32 %v3783_v27, %v3782_v8  ;;  %v3791_v26 = vadd.f32 %v3790_v1, %v3789_v54  ;;  %v3804_v13 = vrot.slane %v3803_v48, 2 }
 0x24c   : > { %v3816_v53 = vrot.slane %v3815_v49, 4  ;;  %v3778_v19 = vrot.slane %v3777_v11, 1  ;;  %v3798_v12 = vadd.f32 %v3797_v51, %v3796_v25  ;;  %v3810_v58 = vadd.f32 %v3809_v44, %v3808_v18 }
 0x24d   : > { %v3822_v37 = vsel %vm8367_vm8, %v3764_v22, 0.0  ;;  %v3785_v16 = vrot.slane %v3784_v42, 1  ;;  %v3792_v36 = vrot.slane %v3791_v26, 1  ;;  %v3805_v59 = vadd.f32 %v3804_v13, %v3803_v48 }
 0x24e   : > { %v3817_v62 = vadd.f32 %v3816_v53, %v3815_v49  ;;  %v3779_v0 = vadd.f32 %v3778_v19, %v3777_v11  ;;  %v3799_v43 = vrot.slane %v3798_v12, 1  ;;  %v3811_v9 = vrot.slane %v3810_v58, 2 }
 0x24f   : > { %v3823_v39 = vrot.slane %v3822_v37, 4  ;;  %v3786_v32 = vadd.f32 %v3785_v16, %v3784_v42  ;;  %v3793_v24 = vadd.f32 %v3792_v36, %v3791_v26  ;;  %v3806_v15 = vrot.slane %v3805_v59, 1 }
 0x250   : > { %v3818_v8 = vrot.slane %v3817_v62, 2  ;;  %v3800_v54 = vadd.f32 %v3799_v43, %v3798_v12  ;;  %v3812_v20 = vadd.f32 %v3811_v9, %v3810_v58  ;;  %v3889_v25 = vadd.f32 %v6989_v47, %v3779_v0 }
 0x251   : > { %v3824_v10 = vadd.f32 %v3823_v39, %v3822_v37  ;;  %v3807_v18 = vadd.f32 %v3806_v15, %v3805_v59  ;;  %v3890_v22 = vadd.f32 %v6989_v47, %v3786_v32  ;;  %v3891_v1 = vadd.f32 %v6989_v47, %v3793_v24 }
 0x252   : > { %v3819_v27 = vadd.f32 %v3818_v8, %v3817_v62  ;;  %v3813_v48 = vrot.slane %v3812_v20, 1  ;;  %v3892_v51 = vadd.f32 %v6989_v47, %v3800_v54  ;;  %v3915_v44 = vrot.slane %v7156_v52, 5 }
 0x253   : > { %v3825_v11 = vrot.slane %v3824_v10, 2  ;;  %v3893_v42 = vadd.f32 %v6989_v47, %v3807_v18  ;;  %v3916_v26 = vrot.slane %v7156_v52, 6  ;;  %v3917_v13 = vrot.slane %v7156_v52, 7 }
 0x254   : > { %v3820_v49 = vrot.slane %v3819_v27, 1  ;;  %v3814_v53 = vadd.f32 %v3813_v48, %v3812_v20  ;;  %v3941_v12 = vadd.f32 %v7156_v52, %v3889_v25  ;;  %v8368_v58 = vrot.slane %v7156_v52, 1 }
 0x255   : > { %v3826_v19 = vadd.f32 %v3825_v11, %v3824_v10  ;;  %v8369_v36 = vrot.slane %v7156_v52, 2  ;;  %v8370_v62 = vrot.slane %v7156_v52, 3  ;;  %v8371_v43 = vrot.slane %v7156_v52, 4 }
 0x256   : > { %v3942_v37 = vadd.f32 %v8368_v58, %v3890_v22  ;;  %v3821_v16 = vadd.f32 %v3820_v49, %v3819_v27  ;;  %v3894_v32 = vadd.f32 %v6989_v47, %v3814_v53  ;;  %vm3957_vm9 = vcmp.gt.f32.partialorder %v3941_v12, 0.0 }
 0x257   : > { %v3943_v59 = vadd.f32 %v8369_v36, %v3891_v1  ;;  %v3944_v0 = vadd.f32 %v8370_v62, %v3892_v51  ;;  %v3945_v9 = vadd.f32 %v8371_v43, %v3893_v42  ;;  %v3827_v39 = vrot.slane %v3826_v19, 1 }
 0x258   : > { %vm3958_vm11 = vcmp.gt.f32.partialorder %v3942_v37, 0.0  ;;  %v3895_v24 = vadd.f32 %v6989_v47, %v3821_v16  ;;  %v3946_v8 = vadd.f32 %v3915_v44, %v3894_v32  ;;  %v3973_v54 = vmul.f32 0.2, %v3941_v12 }
 0x259   : > { %vm3959_vm12 = vcmp.gt.f32.partialorder %v3943_v59, 0.0  ;;  %vm3960_vm1 = vcmp.gt.f32.partialorder %v3944_v0, 0.0  ;;  %vm3961_vm3 = vcmp.gt.f32.partialorder %v3945_v9, 0.0  ;;  %v3828_v15 = vadd.f32 %v3827_v39, %v3826_v19 }
 0x25a   : > { %v3974_v20 = vmul.f32 0.2, %v3942_v37  ;;  %v3947_v10 = vadd.f32 %v3916_v26, %v3895_v24  ;;  %v3975_v25 = vmul.f32 0.2, %v3943_v59  ;;  %v3976_v18 = vmul.f32 0.2, %v3944_v0 }
 0x25b   : > { %v3977_v27 = vmul.f32 0.2, %v3945_v9  ;;  %v3896_v52 = vadd.f32 %v6989_v47, %v3828_v15  ;;  %vm3962_vm4 = vcmp.gt.f32.partialorder %v3946_v8, 0.0  ;;  %v3978_v22 = vmul.f32 0.2, %v3946_v8 }
 0x25c   : > { %v3989_v1 = vsel %vm3957_vm9, %v3941_v12, %v3973_v54  ;;  %vm3963_vm5 = vcmp.gt.f32.partialorder %v3947_v10, 0.0  ;;  %v3979_v48 = vmul.f32 0.2, %v3947_v10  ;;  %v3990_v11 = vsel %vm3958_vm11, %v3942_v37, %v3974_v20  ;;  %vm8372_vm9 = vmmov %vm8367_vm8 }
 0x25d   : > { %v3991_v51 = vsel %vm3959_vm12, %v3943_v59, %v3975_v25  ;;  %v3948_v49 = vadd.f32 %v3917_v13, %v3896_v52  ;;  %v3992_v44 = vsel %vm3960_vm1, %v3944_v0, %v3976_v18  ;;  %v3993_v42 = vsel %vm3961_vm3, %v3945_v9, %v3977_v27  ;;  %vm8373_vm11 = vmmov %vm8367_vm8 }
 0x25e   : > { %v3994_v26 = vsel %vm3962_vm4, %v3946_v8, %v3978_v22  ;;  %v3995_v53 = vsel %vm3963_vm5, %v3947_v10, %v3979_v48  ;;  %v4021_v19 = vrot.slane %v3990_v11, 7  ;;  %v4023_v58 = vrot.slane %v3991_v51, 6  ;;  %vm8374_vm12 = vmmov %vm8367_vm8 }
 0x25f   : > { %v4025_v47 = vrot.slane %v3992_v44, 5  ;;  %vm3964_vm7 = vcmp.gt.f32.partialorder %v3948_v49, 0.0  ;;  %v3980_v16 = vmul.f32 0.2, %v3948_v49  ;;  %v4027_v36 = vrot.slane %v3993_v42, 4  ;;  %vm8376_vm3 = vmmov %vm8367_vm8 }
 0x260   : > { %v4029_v12 = vrot.slane %v3994_v26, 3  ;;  %v4022_v62 = vsel %vm2275_vm6, %v4021_v19, %v3989_v1  ;;  %v4031_v43 = vrot.slane %v3995_v53, 2  ;;  %v4642_v37 = vmul.f32 %v7461_v61, %v7293_v40  ;;  %vm8377_vm4 = vmmov %vm8376_vm3 }
 0x261   : > { %v4643_v13 = vmul.f32 %v7472_v30, %v7293_v40  ;;  %v3996_v59 = vsel %vm3964_vm7, %v3948_v49, %v3980_v16  ;;  %v4024_v0 = vsel %vm2278_vm10, %v4023_v58, %v4022_v62  ;;  %v4644_v9 = vmul.f32 %v7477_v28, %v7293_v40 }
 0x262   : > { %v4645_v39 = vmul.f32 %v7484_v56, %v7293_v40  ;;  %v4026_v32 = vsel %vm2281_vm13, %v4025_v47, %v4024_v0  ;;  %v4033_v24 = vrot.slane %v3996_v59, 1  ;;  %v4646_v15 = vmul.f32 %v7489_v14, %v7293_v40 }
 0x263   : > { %v4724_v61 = vsel %vm8367_vm8, %v4642_v37, 0.0  ;;  %v4028_v8 = vsel %vm2284_vm14, %v4027_v36, %v4026_v32  ;;  %v4731_v54 = vsel %vm8372_vm9, %v4643_v13, 0.0  ;;  %v4738_v20 = vsel %vm8373_vm11, %v4644_v9, 0.0 }
 0x264   : > { %v4725_v30 = vrot.slane %v4724_v61, 4  ;;  %v4030_v28 = vsel %vm2287_vm15, %v4029_v12, %v4028_v8  ;;  %v4732_v10 = vrot.slane %v4731_v54, 4  ;;  %v4739_v25 = vrot.slane %v4738_v20, 4 }
 0x265   : > { %v4745_v56 = vsel %vm8374_vm12, %v4645_v39, 0.0  ;;  %vm8375_vm1 = vcmask 1046534   ;;  %v4752_v14 = vsel %vm8376_vm3, %v4646_v15, 0.0  ;;  %v4796_v42 = vrot.slane %v7325_v34, 5 }
 0x266   : > { %v4032_v18 = vsel %vm8375_vm1, %v4031_v43, %v4030_v28  ;;  %v4726_v27 = vadd.f32 %v4725_v30, %v4724_v61  ;;  %v4746_v52 = vrot.slane %v4745_v56, 4  ;;  %v4733_v1 = vadd.f32 %v4732_v10, %v4731_v54 }
 0x267   : > { %v4034_v22 = vsel %vm2293_vm0, %v4033_v24, %v4032_v18  ;;  %v4740_v48 = vadd.f32 %v4739_v25, %v4738_v20  ;;  %v4753_v11 = vrot.slane %v4752_v14, 4  ;;  %v4797_v36 = vrot.slane %v7325_v34, 6 }
 0x268   : > { %v7646_v51 = vsel %vm2256_vm2, %v4034_v22, -1e+30  ;;  %v4727_v49 = vrot.slane %v4726_v27, 2  ;;  %v4747_v44 = vadd.f32 %v4746_v52, %v4745_v56  ;;  %v4734_v53 = vrot.slane %v4733_v1, 2 }
 0x269   : > { %v4053_v26 = vsel %vm8377_vm4, %v7646_v51, -inf  ;;  %v4741_v19 = vrot.slane %v4740_v48, 2  ;;  %v4754_v58 = vadd.f32 %v4753_v11, %v4752_v14  ;;  %v4798_v12 = vrot.slane %v7325_v34, 7 }
 0x26a   : > { %4054 = vmax.xlane.f32.xlu0 %v4053_v26  ;;  %v4728_v47 = vadd.f32 %v4727_v49, %v4726_v27  ;;  %v4748_v16 = vrot.slane %v4747_v44, 2  ;;  %v4735_v62 = vadd.f32 %v4734_v53, %v4733_v1  ;;  %vm4839_vm5 = vcmp.gt.f32.partialorder %v7370_v63, 0.0 }
 0x26b   : > { %v4742_v43 = vadd.f32 %v4741_v19, %v4740_v48  ;;  %v4755_v37 = vrot.slane %v4754_v58, 2  ;;  %vm4840_vm7 = vcmp.gt.f32.partialorder %v7374_v17, 0.0  ;;  %vm4841_vm8 = vcmp.gt.f32.partialorder %v7378_v57, 0.0 }
 0x26c   : > { %v4729_v13 = vrot.slane %v4728_v47, 1  ;;  %v4749_v59 = vadd.f32 %v4748_v16, %v4747_v44  ;;  %v4736_v0 = vrot.slane %v4735_v62, 1  ;;  %v4855_v32 = vmul.f32 0.2, %v7370_v63 }
 0x26d   : > { %v4743_v9 = vrot.slane %v4742_v43, 1  ;;  %v4756_v39 = vadd.f32 %v4755_v37, %v4754_v58  ;;  %v4856_v61 = vmul.f32 0.2, %v7374_v17  ;;  %v4857_v8 = vmul.f32 0.2, %v7378_v57 }
 0x26e   : > { %v4730_v24 = vadd.f32 %v4729_v13, %v4728_v47  ;;  %v4750_v15 = vrot.slane %v4749_v59, 1  ;;  %v4737_v30 = vadd.f32 %v4736_v0, %v4735_v62  ;;  %v4871_v28 = vsel %vm4839_vm5, %v7370_v63, %v4855_v32 }
 0x26f   : > { %v4744_v54 = vadd.f32 %v4743_v9, %v4742_v43  ;;  %v4757_v20 = vrot.slane %v4756_v39, 1  ;;  %v4872_v56 = vsel %vm4840_vm7, %v7374_v17, %v4856_v61  ;;  %v4873_v18 = vsel %vm4841_vm8, %v7378_v57, %v4857_v8 }
 0x270   : > { %v4751_v10 = vadd.f32 %v4750_v15, %v4749_v59  ;;  %v4774_v25 = vadd.f32 %v8333_v55, %v4730_v24  ;;  %v4775_v52 = vadd.f32 %v8333_v55, %v4737_v30  ;;  %v4909_v22 = vrot.slane %v4872_v56, 7 }
 0x271   : > { %v4758_v27 = vadd.f32 %v4757_v20, %v4756_v39  ;;  %v4776_v14 = vadd.f32 %v8333_v55, %v4744_v54  ;;  %v4911_v48 = vrot.slane %v4873_v18, 6  ;;  %v4631_v11 = vmul.f32 %v7529_v33, %v7293_v40 }
 0x272   : > { %v4777_v1 = vadd.f32 %v8333_v55, %v4751_v10  ;;  %v4826_v63 = vadd.f32 %v4794_v31, %v4774_v25  ;;  %v4827_v57 = vadd.f32 %v4795_v2, %v4775_v52  ;;  %v4910_v44 = vsel %vm2275_vm6, %v4909_v22, %v4871_v28  ;;  %v8386_v52 = vld [vmem:[#allocation16_spill] sm:$0xff] }
 0x273   : > { %v4778_v17 = vadd.f32 %v8333_v55, %v4758_v27  ;;  %v4828_v49 = vadd.f32 %v4796_v42, %v4776_v14  ;;  %v4912_v19 = vsel %vm2278_vm10, %v4911_v48, %v4910_v44  ;;  %v4633_v32 = vmul.f32 %v7547_v50, %v7293_v40 }
 0x274   : > { %v4829_v26 = vadd.f32 %v4797_v36, %v4777_v1  ;;  %vm4842_vm9 = vcmp.gt.f32.partialorder %v4826_v63, 0.0  ;;  %v4858_v53 = vmul.f32 0.2, %v4826_v63  ;;  %vm4843_vm11 = vcmp.gt.f32.partialorder %v4827_v57, 0.0 }
 0x275   : > { %v4830_v58 = vadd.f32 %v4798_v12, %v4778_v17  ;;  %vm4844_vm12 = vcmp.gt.f32.partialorder %v4828_v49, 0.0  ;;  %v4859_v31 = vmul.f32 0.2, %v4827_v57  ;;  %v4860_v47 = vmul.f32 0.2, %v4828_v49 }
 0x276   : > { %vm4845_vm1 = vcmp.gt.f32.partialorder %v4829_v26, 0.0  ;;  %v4861_v33 = vmul.f32 0.2, %v4829_v26  ;;  %v4874_v16 = vsel %vm4842_vm9, %v4826_v63, %v4858_v53  ;;  %v4632_v36 = vmul.f32 %v7535_v46, %v7293_v40 }
 0x277   : > { %vm4846_vm3 = vcmp.gt.f32.partialorder %v4830_v58, 0.0  ;;  %v4862_v62 = vmul.f32 0.2, %v4830_v58  ;;  %v4875_v34 = vsel %vm4843_vm11, %v4827_v57, %v4859_v31  ;;  %v4913_v2 = vrot.slane %v4874_v16, 5 }
 0x278   : > { %v4876_v42 = vsel %vm4844_vm12, %v4828_v49, %v4860_v47  ;;  %v4877_v43 = vsel %vm4845_vm1, %v4829_v26, %v4861_v33  ;;  %v4915_v37 = vrot.slane %v4875_v34, 4  ;;  %v4634_v24 = vmul.f32 %v7552_v38, %v7293_v40 }
 0x279   : > { %v4878_v13 = vsel %vm4846_vm3, %v4830_v58, %v4862_v62  ;;  %v4914_v12 = vsel %vm2281_vm13, %v4913_v2, %v4912_v19  ;;  %v4917_v59 = vrot.slane %v4876_v42, 3  ;;  %v4919_v0 = vrot.slane %v4877_v43, 2 }
 0x27a   : > { %v4916_v9 = vsel %vm2284_vm14, %v4915_v37, %v4914_v12  ;;  %v4921_v39 = vrot.slane %v4878_v13, 1  ;;  %v4635_v61 = vmul.f32 %v7557_v41, %v7293_v40  ;;  %v4636_v46 = vmul.f32 %v7562_v60, %v7293_v40 }
 0x27b   : > { %v4918_v15 = vsel %vm2287_vm15, %v4917_v59, %v4916_v9  ;;  %v4637_v8 = vmul.f32 %v7567_v4, %v7293_v40  ;;  %vm8378_vm4 = vcmask 1046534   ;;  %v4638_v54 = vmul.f32 %v7574_v45, %v7293_v40 }
 0x27c   : > { %v4920_v30 = vsel %vm8378_vm4, %v4919_v0, %v4918_v15  ;;  %vm8379_vm5 = vcmask 261120   ;;  %vm8382_vm9 = vcmp.gt.f32.partialorder %v7226_v5, 0.0 }
 0x27d   : > { %v4647_v50 = vsel %vm8379_vm5, %v4631_v11, 0.0  ;;  %vm8380_vm7 = vmmov %vm8379_vm5  ;;  %v4922_v20 = vsel %vm2293_vm0, %v4921_v39, %v4920_v30 }
 0x27e   : > { %v4654_v38 = vsel %vm8380_vm7, %v4632_v36, 0.0  ;;  %v4648_v28 = vrot.slane %v4647_v50, 4  ;;  %vm8381_vm8 = vmmov %vm8379_vm5  ;;  %v7705_v60 = vsel %vm8382_vm9, %v4922_v20, -1e+30 }
 0x27f   : > { %v4655_v10 = vrot.slane %v4654_v38, 4  ;;  %v4661_v41 = vsel %vm8381_vm8, %v4633_v32, 0.0  ;;  %vm8383_vm11 = vmmov %vm8379_vm5 }
 0x280   : > { %v4662_v4 = vrot.slane %v4661_v41, 4  ;;  %v4668_v25 = vsel %vm8383_vm11, %v4634_v24, 0.0  ;;  %vm8384_vm12 = vmmov %vm8379_vm5  ;;  %v4649_v45 = vadd.f32 %v4648_v28, %v4647_v50  ;;  %3211 = vrot.lane.b32.xlu0 %v8386_v52, %s6531_s27 }
 0x281   : > { %v4675_v56 = vsel %vm8384_vm12, %v4635_v61, 0.0  ;;  %vm8385_vm1 = vmmov %vm8379_vm5  ;;  %v4656_v18 = vadd.f32 %v4655_v10, %v4654_v38  ;;  %v4669_v27 = vrot.slane %v4668_v25, 4  ;;  %v4788_v10 = vrot.slane %v7164_v21, 4 }
 0x282   : > { %v4930_v40 = vsel %vm8385_vm1, %v7705_v60, -inf  ;;  %v4663_v14 = vadd.f32 %v4662_v4, %v4661_v41  ;;  %v4676_v5 = vrot.slane %v4675_v56, 4  ;;  %vm8387_vm3 = vmmov %vm8385_vm1  ;;  %v4650_v63 = vrot.slane %v4649_v45, 2 }
 0x283   : > { %4931 = vmax.xlane.f32.xlu1 %v4930_v40  ;;  %v4682_v22 = vsel %vm8387_vm3, %v4636_v46, 0.0  ;;  %vm8388_vm4 = vmmov %vm8385_vm1  ;;  %v4657_v48 = vrot.slane %v4656_v18, 2  ;;  %v4670_v11 = vadd.f32 %v4669_v27, %v4668_v25  ;;  %v4789_v25 = vrot.slane %v7164_v21, 5 }
 0x284   : > { %v4689_v1 = vsel %vm8388_vm4, %v4637_v8, 0.0  ;;  %v4683_v17 = vrot.slane %v4682_v22, 4  ;;  %v4664_v57 = vrot.slane %v4663_v14, 2  ;;  %v4677_v49 = vadd.f32 %v4676_v5, %v4675_v56  ;;  %vm8389_vm5 = vmmov %vm8385_vm1 }
 0x285   : > { %v4690_v44 = vrot.slane %v4689_v1, 4  ;;  %v4696_v26 = vsel %vm8389_vm5, %v4638_v54, 0.0  ;;  %v4651_v53 = vadd.f32 %v4650_v63, %v4649_v45  ;;  %v4658_v19 = vadd.f32 %v4657_v48, %v4656_v18 }
 0x286   : > { %v4671_v58 = vrot.slane %v4670_v11, 2  ;;  %v4684_v31 = vadd.f32 %v4683_v17, %v4682_v22  ;;  %v4665_v47 = vadd.f32 %v4664_v57, %v4663_v14  ;;  %v4678_v33 = vrot.slane %v4677_v49, 2 }
 0x287   : > { %v4691_v16 = vadd.f32 %v4690_v44, %v4689_v1  ;;  %v4697_v62 = vrot.slane %v4696_v26, 4  ;;  %v4652_v34 = vrot.slane %v4651_v53, 1  ;;  %v4659_v2 = vrot.slane %v4658_v19, 1 }
 0x288   : > { %v4672_v42 = vadd.f32 %v4671_v58, %v4670_v11  ;;  %v4685_v43 = vrot.slane %v4684_v31, 2  ;;  %v4666_v37 = vrot.slane %v4665_v47, 1  ;;  %v4679_v36 = vadd.f32 %v4678_v33, %v4677_v49  ;;  %v8393_v58 = vld [vmem:[#allocation14_spill] sm:$0xff] }
 0x289   : > { %v4692_v13 = vrot.slane %v4691_v16, 2  ;;  %v4698_v12 = vadd.f32 %v4697_v62, %v4696_v26  ;;  %v4653_v59 = vadd.f32 %v4652_v34, %v4651_v53  ;;  %v4660_v0 = vadd.f32 %v4659_v2, %v4658_v19 }
 0x28a   : > { %v4673_v9 = vrot.slane %v4672_v42, 1  ;;  %v4686_v39 = vadd.f32 %v4685_v43, %v4684_v31  ;;  %v4667_v32 = vadd.f32 %v4666_v37, %v4665_v47  ;;  %v4680_v24 = vrot.slane %v4679_v36, 1  ;;  %v8394_v43 = vld [vmem:[#allocation10_spill] sm:$0xff] }
 0x28b   : > { %v4693_v15 = vadd.f32 %v4692_v13, %v4691_v16  ;;  %v4699_v61 = vrot.slane %v4698_v12, 2  ;;  %v4763_v30 = vadd.f32 %v8333_v55, %v4653_v59  ;;  %v4764_v54 = vadd.f32 %v8333_v55, %v4660_v0 }
 0x28c   : > { %v4674_v46 = vadd.f32 %v4673_v9, %v4672_v42  ;;  %v4687_v8 = vrot.slane %v4686_v39, 1  ;;  %v4681_v50 = vadd.f32 %v4680_v24, %v4679_v36  ;;  %v4765_v28 = vadd.f32 %v8333_v55, %v4667_v32 }
 0x28d   : > { %v4694_v38 = vrot.slane %v4693_v15, 1  ;;  %v4700_v20 = vadd.f32 %v4699_v61, %v4698_v12  ;;  %v4790_v18 = vrot.slane %v7164_v21, 6  ;;  %v4815_v14 = vadd.f32 %v7164_v21, %v4763_v30 }
 0x28e   : > { %v4688_v41 = vadd.f32 %v4687_v8, %v4686_v39  ;;  %v4766_v4 = vadd.f32 %v8333_v55, %v4674_v46  ;;  %v4767_v45 = vadd.f32 %v8333_v55, %v4681_v50  ;;  %v8390_v5 = vrot.slane %v7164_v21, 1 }
 0x28f   : > { %v4695_v56 = vadd.f32 %v4694_v38, %v4693_v15  ;;  %v4701_v40 = vrot.slane %v4700_v20, 1  ;;  %v8391_v1 = vrot.slane %v7164_v21, 2  ;;  %v8392_v17 = vrot.slane %v7164_v21, 3  ;;  %v8395_v15 = vld [vmem:[#allocation12_spill] sm:$0xff] }
 0x290   : > { %v4768_v27 = vadd.f32 %v8333_v55, %v4688_v41  ;;  %v4816_v22 = vadd.f32 %v8390_v5, %v4764_v54  ;;  %v4819_v49 = vadd.f32 %v4788_v10, %v4767_v45  ;;  %v4791_v53 = vrot.slane %v7164_v21, 7 }
 0x291   : > { %v4817_v63 = vadd.f32 %v8391_v1, %v4765_v28  ;;  %v4702_v48 = vadd.f32 %v4701_v40, %v4700_v20  ;;  %v4769_v11 = vadd.f32 %v8333_v55, %v4695_v56  ;;  %v4818_v57 = vadd.f32 %v8392_v17, %v4766_v4  ;;  %v2318_v20 = vpop.xlane.xlu0 %2317  ;;  %v6426_v1 = vld [vmem:[%s7215_s18 + $0x8] sm:$0xff] }
 0x292   : > { %v4820_v44 = vadd.f32 %v4789_v25, %v4768_v27  ;;  %vm4831_vm7 = vcmp.gt.f32.partialorder %v4815_v14, 0.0  ;;  %vm4832_vm8 = vcmp.gt.f32.partialorder %v4816_v22, 0.0  ;;  %v4848_v31 = vmul.f32 0.2, %v4816_v22 }
 0x293   : > { %v4770_v26 = vadd.f32 %v8333_v55, %v4702_v48  ;;  %v4821_v19 = vadd.f32 %v4790_v18, %v4769_v11  ;;  %vm4833_vm9 = vcmp.gt.f32.partialorder %v4817_v63, 0.0  ;;  %vm4834_vm11 = vcmp.gt.f32.partialorder %v4818_v57, 0.0  ;;  %v2315_v18 = vpop.xlane.xlu1 %2314 }
 0x294   : > { %3213 = vrot.lane.b32.xlu1 %v8393_v58, %s6531_s27  ;;  %vm4835_vm12 = vcmp.gt.f32.partialorder %v4819_v49, 0.0  ;;  %v4849_v33 = vmul.f32 0.2, %v4817_v63  ;;  %v4850_v16 = vmul.f32 0.2, %v4818_v57  ;;  %vm4836_vm1 = vcmp.gt.f32.partialorder %v4820_v44, 0.0 }
 0x295   : > { %v4822_v47 = vadd.f32 %v4791_v53, %v4770_v26  ;;  %v4847_v62 = vmul.f32 0.2, %v4815_v14  ;;  %v4851_v34 = vmul.f32 0.2, %v4819_v49  ;;  %v4852_v2 = vmul.f32 0.2, %v4820_v44 }
 0x296   : > { %v4853_v55 = vmul.f32 0.2, %v4821_v19  ;;  %v4864_v42 = vsel %vm4832_vm8, %v4816_v22, %v4848_v31  ;;  %v4865_v21 = vsel %vm4833_vm9, %v4817_v63, %v4849_v33  ;;  %vm4837_vm3 = vcmp.gt.f32.partialorder %v4821_v19, 0.0 }
 0x297   : > { %v4854_v37 = vmul.f32 0.2, %v4822_v47  ;;  %v4866_v36 = vsel %vm4834_vm11, %v4818_v57, %v4850_v16  ;;  %vm4838_vm4 = vcmp.gt.f32.partialorder %v4822_v47, 0.0  ;;  %v4867_v13 = vsel %vm4835_vm12, %v4819_v49, %v4851_v34 }
 0x298   : > { %3209 = vrot.lane.b32.xlu1 %v8394_v43, %s6531_s27  ;;  %v4895_v12 = vrot.slane %v4864_v42, 7  ;;  %v4897_v59 = vrot.slane %v4865_v21, 6  ;;  %v4863_v0 = vsel %vm4831_vm7, %v4815_v14, %v4847_v62  ;;  %v4868_v9 = vsel %vm4836_vm1, %v4820_v44, %v4852_v2 }
 0x299   : > { %v4869_v39 = vsel %vm4837_vm3, %v4821_v19, %v4853_v55  ;;  %v4899_v24 = vrot.slane %v4866_v36, 5  ;;  %v4870_v61 = vsel %vm4838_vm4, %v4822_v47, %v4854_v37  ;;  %v4901_v8 = vrot.slane %v4867_v13, 4 }
 0x29a   : > { %v4896_v32 = vsel %vm2275_vm6, %v4895_v12, %v4863_v0  ;;  %v4903_v54 = vrot.slane %v4868_v9, 3  ;;  %v4905_v38 = vrot.slane %v4869_v39, 2  ;;  %v4907_v10 = vrot.slane %v4870_v61, 1 }
 0x29b   : > { %v4898_v46 = vsel %vm2278_vm10, %v4897_v59, %v4896_v32  ;;  %vm8396_vm6 = vcmask 1046534   ;;  %v2320_v25 = vsub.f32 %v7301_v29, %v2318_v20  ;;  %vm8397_vm10 = vmmov %vm8389_vm5  ;;  %v2319_v17 = vsub.f32 %v7351_v6, %v2315_v18 }
 0x29c   : > { %3207 = vrot.lane.b32.xlu1 %v8395_v15, %s6531_s27  ;;  %v4900_v30 = vsel %vm2281_vm13, %v4899_v24, %v4898_v46  ;;  %s6456_s27 = scalar_lea.vmem %s8181_s17, 256 }
 0x29d   : > { %v4902_v50 = vsel %vm2284_vm14, %v4901_v8, %v4900_v30  ;;  %v2323_v45 = vmul.f32 1.442695, %v2320_v25  ;;  %v2321_v57 = vmul.f32 1.442695, %v2319_v17  ;;  %p6457_p12 = scmp.ne.s32.totalorder %s8181_s17, %s6456_s27 }
 0x29e   : > { %v4904_v28 = vsel %vm2287_vm15, %v4903_v54, %v4902_v50 }
 0x29f   : > { %v4906_v41 = vsel %vm8396_vm6, %v4905_v38, %v4904_v28  ;;  %6377 = vpow2.f32 %v2323_v45  ;;  %p6458_p4 = pnand %p6457_p12, %p8430_p13 }
 0x2a0   : > { %v4908_v4 = vsel %vm2293_vm0, %v4907_v10, %v4906_v41  ;;  %vm8398_vm0 = vmmov %vm8389_vm5 }
 0x2a1   : > { %v7753_v56 = vsel %vm2256_vm2, %v4908_v4, -1e+30  ;;  %vm8399_vm2 = vmmov %vm8398_vm0  ;;  %p6459_p5 = pneg %p6458_p4 }
 0x2a2   : > { %v4927_v40 = vsel %vm8397_vm10, %v7753_v56, -inf  ;;  %vm8400_vm13 = vmmov %vm8398_vm0 }
 0x2a3   : > { %4928 = vmax.xlane.f32.xlu0 %v4927_v40  ;;  %v3180_v27 = vpop.xlane.xlu1 %3179  ;;  %vm8401_vm14 = vmmov %vm8398_vm0 }
 0x2a4   : > { %v3182_v14 = vsub.f32 %v7432_v35, %v3180_v27  ;;  %vm8402_vm15 = vmmov %vm8398_vm0 }
 0x2a5   : > { %vm8403_vm5 = vmmov %vm8398_vm0 }
 0x2a6   : > { %v3185_v5 = vmul.f32 1.442695, %v3182_v14  ;;  %vm8404_vm7 = vmmov %vm8398_vm0 }
 0x2a7   : > { %vm8405_vm8 = vmmov %vm8398_vm0 }
 0x2a8   : > { %6379 = vpow2.f32 %v3185_v5  ;;  %vm8406_vm9 = vmmov %vm8398_vm0 }
 0x2a9   : > { %6381 = vpow2.f32 %v2321_v57  ;;  %vm8407_vm11 = vmmov %vm8398_vm0 }
 0x2aa   : > { %vm8412_vm12 = vmmov %vm8398_vm0 }
 0x2ab   : > { %vm8417_vm1 = vmmov %vm8398_vm0 }
 0x2ac   : > { %v6378_v22 = vpop.eup %6377  ;;  %vm8422_vm3 = vmmov %vm8398_vm0 }
 0x2ad   : > { %v7759_v63 = vmul.f32 %v6426_v1, %v6378_v22  ;;  %vm8423_vm4 = vmmov %vm8398_vm0 }
 0x2ae   : > { %vm8424_vm6 = vmmov %vm8398_vm0 }
 0x2af   : > { %v2330_v3 = vsel %vm8398_vm0, %v7759_v63, 0.0  ;;  %vm8425_vm10 = vmmov %vm8398_vm0  ;;  %vm5525_vm0 = vcmask 64512  }
 0x2b5   : > { %v6380_v29 = vpop.eup %6379 }
 0x2b6   : > { %v7763_v48 = vmul.f32 %v6426_v1, %v6380_v29  ;;  %v6382_v6 = vpop.eup %6381 }
 0x2b8   : > { %v3192_v11 = vsel %vm8399_vm2, %v7763_v48, 0.0  ;;  %vm5530_vm2 = vcmask 195584  }
 0x2ba   : > { %v3177_v35 = vpop.xlane.xlu0 %3176 }
 0x2bb   : > { %v3181_v44 = vsub.f32 %v7504_v23, %v3177_v35  ;;  %v8409_v35 = vld [vmem:[#allocation18_spill] sm:$0xff] }
 0x2bd   : > { %v3183_v19 = vmul.f32 1.442695, %v3181_v44 }
 0x2c0   : > { %2331 = vadd.xlane.f32.xlu1 %v2330_v3  ;;  %v8408_v3 = vld [vmem:[#allocation15_spill] sm:$0xff] }
 0x2c4   : > { %3193 = vadd.xlane.f32.xlu1 %v3192_v11 }
 0x2d4   : > { %v4058_v49 = vpop.xlane.xlu1 %4057 }
 0x2d5   : > { %4085 = vrot.lane.b32.xlu1 %v8386_v52, %s6532_s23  ;;  %v4060_v26 = vsub.f32 %v7590_v7, %v4058_v49  ;;  %v6427_v7 = vld [vmem:[%s7215_s18] sm:$0xff]  ;;  %s8187_s18 = scalar_lea.hbm %s8241_s9, %s5677_s29 }
 0x2d6   : > { %v2325_v33 = vmul.f32 %v6427_v7, %v6382_v6 }
 0x2d7   : > { %v4063_v53 = vmul.f32 1.442695, %v4060_v26  ;;  %v8410_v26 = vld [vmem:[#allocation11_spill] sm:$0xff] }
 0x2d8   : > { %v2327_v62 = vsel %vm8401_vm14, %v2325_v33, 0.0 }
 0x2d9   : > { %4081 = vrot.lane.b32.xlu1 %v8395_v15, %s6532_s23  ;;  %6383 = vpow2.f32 %v4063_v53 }
 0x2da   : > { %6385 = vpow2.f32 %v3183_v19 }
 0x2dd   : > { %4961 = vrot.lane.b32.xlu1 %v8393_v58, %s6533_s26 }
 0x2e6   : > { %v6384_v31 = vpop.eup %6383 }
 0x2e7   : > { %v7776_v47 = vmul.f32 %v6426_v1, %v6384_v31  ;;  %v6386_v16 = vpop.eup %6385 }
 0x2e8   : > { %v7782_v34 = vmul.f32 %v6427_v7, %v6386_v16 }
 0x2e9   : > { %v4070_v23 = vsel %vm8400_vm13, %v7776_v47, 0.0  ;;  %vm8426_vm13 = vcmask 130048  }
 0x2ea   : > { %4071 = vadd.xlane.f32.xlu0 %v4070_v23  ;;  %v3189_v2 = vsel %vm8402_vm15, %v7782_v34, 0.0  ;;  %v8411_v23 = vld [vmem:[#allocation13_spill] sm:$0xff]  ;;  %vm8427_vm14 = vmmov %vm8426_vm13 }
 0x2ee   : > { %2328 = vadd.xlane.f32.xlu0 %v2327_v62 }
 0x2f2   : > { %3190 = vadd.xlane.f32.xlu0 %v3189_v2 }
 0x2f3   : > { %v4055_v21 = vpop.xlane.xlu0 %4054 }
 0x2f4   : > { %v4059_v37 = vsub.f32 %v7646_v51, %v4055_v21  ;;  %v8414_v21 = vld [vmem:[#allocation22_spill] sm:$0xff] }
 0x2f6   : > { %v4061_v13 = vmul.f32 1.442695, %v4059_v37 }
 0x2f7   : > { %v7792_v9 = vpop.permute.xlu0 %3211 }
 0x2f8   : > { %v7832_v44 = vand.u32 4294901760, %v7792_v9 }
 0x308   : > { %4087 = vrot.lane.b32.xlu0 %v8393_v58, %s6532_s23 }
 0x30c   : > { %v4932_v55 = vpop.xlane.xlu1 %4931 }
 0x30d   : > { %v4934_v42 = vsub.f32 %v7705_v60, %v4932_v55 }
 0x30f   : > { %v4937_v36 = vmul.f32 1.442695, %v4934_v42  ;;  %v8413_v42 = vld [vmem:[#allocation19_spill] sm:$0xff] }
 0x310   : > { %v3214_v30 = vpop.permute.xlu1 %3213 }
 0x311   : > { %6387 = vpow2.f32 %v4937_v36  ;;  %v7826_v29 = vand.u32 4294901760, %v3214_v30 }
 0x312   : > { %6389 = vpow2.f32 %v4061_v13 }
 0x313   : > { %v7836_v53 = vsub.f32 %v3214_v30, %v7826_v29 }
 0x314   : > { %v3210_v54 = vpop.permute.xlu1 %3209 }
 0x315   : > { %v7840_v31 = vand.u32 4294901760, %v3210_v54 }
 0x317   : > { %v7857_v55 = vsub.f32 %v3210_v54, %v7840_v31 }
 0x318   : > { %v3208_v50 = vpop.permute.xlu1 %3207 }
 0x319   : > { %v7848_v16 = vand.u32 4294901760, %v3208_v50 }
 0x31b   : > { %v7863_v37 = vsub.f32 %v3208_v50, %v7848_v16 }
 0x31e   : > { %v6388_v12 = vpop.eup %6387 }
 0x31f   : > { %v7790_v59 = vmul.f32 %v6426_v1, %v6388_v12  ;;  %v6390_v0 = vpop.eup %6389 }
 0x320   : > { %v7796_v32 = vmul.f32 %v6427_v7, %v6390_v0  ;;  %v8415_v0 = vld [vmem:[#allocation17_spill] sm:$0xff] }
 0x321   : > { %v4944_v39 = vsel %vm8403_vm5, %v7790_v59, 0.0  ;;  %vm8428_vm5 = vmmov %vm8417_vm1 }
 0x322   : > { %v4067_v51 = vsel %vm8404_vm7, %v7796_v32, 0.0 }
 0x327   : > { %4945 = vadd.xlane.f32.xlu0 %v4944_v39  ;;  %v7880_v39 = vand.u32 4294901760, %v7857_v55 }
 0x329   : > { %v3356_v30 = vsub.f32 %v7857_v55, %v7880_v39 }
 0x32b   : > { %4068 = vadd.xlane.f32.xlu0 %v4067_v51 }
 0x32c   : > { %v4929_v60 = vpop.xlane.xlu0 %4928 }
 0x32d   : > { %v4933_v58 = vsub.f32 %v7753_v56, %v4929_v60  ;;  %v8416_v60 = vld [vmem:[#allocation20_spill] sm:$0xff] }
 0x32f   : > { %v4935_v24 = vmul.f32 1.442695, %v4933_v58  ;;  %v7889_v58 = vand.u32 4294901760, %v7863_v37 }
 0x331   : > { %6391 = vpow2.f32 %v4935_v24 }
 0x33e   : > { %v6392_v61 = vpop.eup %6391 }
 0x33f   : > { %v7801_v46 = vmul.f32 %v6427_v7, %v6392_v61 }
 0x341   : > { %v4941_v8 = vsel %vm8405_vm8, %v7801_v46, 0.0  ;;  %4083 = vrot.lane.b32.xlu0 %v8394_v43, %s6532_s23  ;;  %vm8429_vm8 = vmmov %vm8417_vm1  ;;  %s6537_s23 = smov [#allocation5]  }
 0x342   : > { %4942 = vadd.xlane.f32.xlu1 %v4941_v8  ;;  %v8418_v8 = vld [vmem:[#allocation21_spill] sm:$0xff] }
 0x345   : > { %4959 = vrot.lane.b32.xlu0 %v8386_v52, %s6533_s26 }
 0x349   : > { %4955 = vrot.lane.b32.xlu0 %v8395_v15, %s6533_s26  ;;  %v2332_v38 = vpop.xlane.xlu1 %2331 }
 0x34a   : > { %v2334_v20 = vmax.f32 %v2332_v38, 1e-30  ;;  %v3363_v38 = vsub.f32 %v7863_v37, %v7889_v58 }
 0x34c   : > { %6393 = vrcp.f32 %v2334_v20 }
 0x34d   : > { %v3194_v40 = vpop.xlane.xlu1 %3193 }
 0x34e   : > { %v3196_v45 = vmax.f32 %v3194_v40, 1e-30  ;;  %v8421_v40 = vld [vmem:[#allocation25_spill] sm:$0xff] }
 0x353   : > { %4957 = vrot.lane.b32.xlu1 %v8394_v43, %s6533_s26  ;;  %s6460_s26 = sshll.u32 %s6537_s23, 4  ;;  %s6461_s26 = int_to_ptr.vmem [resolvable:$false] %s6460_s26 }
 0x354   : > { %p6463_p7 = scmp.lt.s32.totalorder %s8181_s17, %s6461_s26 }
 0x359   : > { %v6394_v4 = vpop.eup %6393 }
 0x35a   : > { %v2340_v52 = vmul.f32 %v6394_v4, %v7759_v63  ;;  %v8420_v4 = vld [vmem:[#allocation23_spill] sm:$0xff] }
 0x35c   : > { %v2345_v15 = vsel %vm8406_vm9, %v2340_v52, 0  ;;  %v3364_v52 = vand.u32 4294901760, %v3363_v38 }
 0x35d   : > { %v7817_v43 = vand.u32 4294901760, %v2345_v15 }
 0x35f   : > { %v2427_v14 = vsub.f32 %v2345_v15, %v7817_v43 }
 0x361   : > { %v2428_v63 = vand.u32 4294901760, %v2427_v14 }
 0x363   : > { %v2429_v49 = vsub.f32 %v2427_v14, %v2428_v63 }
 0x365   : > { %v2430_v7 = vand.u32 4294901760, %v2429_v49 }
 0x373   : > { %v7813_v28 = vpop.xlane.xlu0 %4071 }
 0x374   : > { %v4074_v15 = vmax.f32 %v7813_v28, 1e-30 }
 0x377   : > { %v2329_v10 = vpop.xlane.xlu0 %2328 }
 0x378   : > { %v2333_v41 = vmax.f32 %v2329_v10, 1e-30  ;;  %v8419_v10 = vld [vmem:[#allocation24_spill] sm:$0xff] }
 0x37a   : > { %6395 = vrcp.f32 %v2333_v41  ;;  %v3357_v41 = vand.u32 4294901760, %v3356_v30 }
 0x37b   : > { %v3191_v25 = vpop.xlane.xlu0 %3190 }
 0x37c   : > { %v3195_v56 = vmax.f32 %v3191_v25, 1e-30 }
 0x37e   : > { %6397 = vrcp.f32 %v3195_v56 }
 0x37f   : > { %6399 = vrcp.f32 %v3196_v45 }
 0x380   : > { %6401 = vrcp.f32 %v4074_v15 }
 0x387   : > { %v6396_v18 = vpop.eup %6395 }
 0x388   : > { %v2339_v27 = vmul.f32 %v6396_v18, %v2325_v33  ;;  %v7846_v33 = vsub.f32 %v7792_v9, %v7832_v44  ;;  %v4086_v18 = vpop.permute.xlu1 %4085 }
 0x38a   : > { %v2342_v5 = vsel %vm8407_vm11, %v2339_v27, 0  ;;  %v7870_v13 = vand.u32 4294901760, %v7846_v33  ;;  %v4088_v27 = vpop.permute.xlu0 %4087 }
 0x38b   : > { %v7821_v22 = vand.u32 4294901760, %v2342_v5  ;;  %v6398_v17 = vpop.eup %6397  ;;  %v7926_v28 = vand.u32 4294901760, %v4088_v27 }
 0x38c   : > { %v3201_v6 = vmul.f32 %v6398_v17, %v7782_v34  ;;  %v6400_v62 = vpop.eup %6399  ;;  %v7853_v34 = vand.u32 4294901760, %v7836_v53 }
 0x38d   : > { %6063 = vmatprep.mubr.f32.mxu1 %v7821_v22  ;;  %v2417_v1 = vsub.f32 %v2342_v5, %v7821_v22  ;;  %v3202_v12 = vmul.f32 %v6400_v62, %v7763_v48  ;;  %v3349_v48 = vsub.f32 %v7846_v33, %v7870_v13  ;;  %v7932_v5 = vand.u32 4294901760, %v4086_v18 }
 0x38e   : > { %6064 = vmatmul.mubr.f32.vlgmr.msra.gmra.mxu1 %v7817_v43  ;;  %v3220_v2 = vsel %vm8412_vm12, %v3201_v6, 0  ;;  %v3342_v9 = vsub.f32 %v7836_v53, %v7853_v34 }
 0x38f   : > { %6078 = vmatpush3.msra.mxu1 %v8408_v3  ;;  %v2418_v11 = vand.u32 4294901760, %v2417_v1  ;;  %v7867_v36 = vand.u32 4294901760, %v3220_v2  ;;  %v3223_v51 = vsel %vm8417_vm1, %v3202_v12, 0  ;;  %v3350_v50 = vand.u32 4294901760, %v3349_v48 }
 0x390   : > { %6079 = vmatprep.subr.mxu1 %v8409_v35  ;;  %v3343_v61 = vand.u32 4294901760, %v3342_v9  ;;  %v7901_v54 = vand.u32 4294901760, %v3223_v51 }
 0x391   : > { %6080 = vmatpush3.msra.mxu1 %v8409_v35  ;;  %6085 = vmatprep.mubr.f32.mxu1 %v2418_v11  ;;  %v2419_v57 = vsub.f32 %v2417_v1, %v2418_v11  ;;  %v7893_v24 = vsub.f32 %v3220_v2, %v7867_v36  ;;  %v7948_v11 = vsub.f32 %v4086_v18, %v7932_v5 }
 0x392   : > { %6081 = vmatprep.subr.mxu1 %v8410_v26  ;;  %v7912_v25 = vsub.f32 %v3223_v51, %v7901_v54 }
 0x393   : > { %6082 = vmatpush3.msra.mxu1 %v8410_v26  ;;  %v2420_v19 = vand.u32 4294901760, %v2419_v57  ;;  %v3296_v20 = vand.u32 4294901760, %v7893_v24 }
 0x394   : > { %6083 = vmatprep.subr.mxu1 %v8411_v23  ;;  %v3306_v45 = vand.u32 4294901760, %v7912_v25 }
 0x395   : > { %6084 = vmatpush3.msra.mxu1 %v8411_v23  ;;  %6052 = vmatprep.mubr.f32.mxu0 %v2420_v19  ;;  %v3297_v56 = vsub.f32 %v7893_v24, %v3296_v20  ;;  %v7967_v19 = vand.u32 4294901760, %v7948_v11 }
 0x396   : > { %6086 = vmatmul.mubr.f32.vlgmr.msra.gmra.mxu1 %v2428_v63  ;;  %6099 = vmatprep.subr.mxu1 %v8408_v3  ;;  %v7941_v63 = vsub.f32 %v4088_v27, %v7926_v28 }
 0x397   : > { %6053 = vmatmul.mubr.f32.vlgmr.msra.gmra.mxu0 %v2430_v7  ;;  %6100 = vmatpush3.msra.mxu1 %v8408_v3  ;;  %v4223_v7 = vsub.f32 %v7948_v11, %v7967_v19 }
 0x398   : > { %6067 = vmatpush3.msra.mxu0 %v8413_v42  ;;  %6107 = vmatprep.mubr.f32.mxu1 %v7821_v22  ;;  %v7957_v49 = vand.u32 4294901760, %v7941_v63 }
 0x399   : > { %6068 = vmatprep.subr.mxu0 %v8414_v21  ;;  %6074 = vmatprep.mubr.f32.mxu0 %v2417_v1 }
 0x39a   : > { %6101 = vmatprep.subr.mxu1 %v8409_v35  ;;  %6069 = vmatpush3.msra.mxu0 %v8414_v21 }
 0x39b   : > { %6102 = vmatpush3.msra.mxu1 %v8409_v35  ;;  %6070 = vmatprep.subr.mxu0 %v8415_v0 }
 0x39c   : > { %6103 = vmatprep.subr.mxu1 %v8410_v26  ;;  %6071 = vmatpush3.msra.mxu0 %v8415_v0 }
 0x39d   : > { %6104 = vmatpush3.msra.mxu1 %v8410_v26  ;;  %6072 = vmatprep.subr.mxu0 %v8416_v60 }
 0x39e   : > { %6105 = vmatprep.subr.mxu1 %v8411_v23  ;;  %6073 = vmatpush3.msra.mxu0 %v8416_v60 }
 0x39f   : > { %6106 = vmatpush3.msra.mxu1 %v8411_v23  ;;  %6075 = vmatmul.mubr.f32.vlgmr.msra.gmra.mxu0 %v2427_v14  ;;  %v3298_v14 = vand.u32 4294901760, %v3297_v56 }
 0x3a0   : > { %6088 = vmatprep.subr.mxu0 %v8418_v8  ;;  %6108 = vmatmul.mubr.f32.vlgmr.msra.gmra.mxu1 %v7817_v43 }
 0x3a1   : > { %6121 = vmatprep.subr.mxu1 %v3343_v61  ;;  %6089 = vmatpush3.msra.mxu0 %v8418_v8 }
 0x3a2   : > { %6096 = vmatprep.mubr.f32.mxu0 %v7821_v22  ;;  %6122 = vmatpush3.msra.mxu1 %v3343_v61  ;;  %v4082_v22 = vpop.permute.xlu1 %4081 }
 0x3a3   : > { %6129 = vmatprep.mubr.f32.mxu1 %v7867_v36  ;;  %6090 = vmatprep.subr.mxu0 %v8419_v10  ;;  %v7950_v17 = vand.u32 4294901760, %v4082_v22 }
 0x3a4   : > { %6123 = vmatprep.subr.mxu1 %v3350_v50  ;;  %6091 = vmatpush3.msra.mxu0 %v8419_v10 }
 0x3a5   : > { %6124 = vmatpush3.msra.mxu1 %v3350_v50  ;;  %6092 = vmatprep.subr.mxu0 %v8420_v4  ;;  %v7962_v26 = vsub.f32 %v4082_v22, %v7950_v17 }
 0x3a6   : > { %6125 = vmatprep.subr.mxu1 %v3357_v41  ;;  %6093 = vmatpush3.msra.mxu0 %v8420_v4  ;;  %v4962_v9 = vpop.permute.xlu1 %4961 }
 0x3a7   : > { %6126 = vmatpush3.msra.mxu1 %v3357_v41  ;;  %6094 = vmatprep.subr.mxu0 %v8421_v40  ;;  %v8033_v61 = vand.u32 4294901760, %v4962_v9 }
 0x3a8   : > { %6127 = vmatprep.subr.mxu1 %v3364_v52  ;;  %6095 = vmatpush3.msra.mxu0 %v8421_v40 }
 0x3a9   : > { %6128 = vmatpush3.msra.mxu1 %v3364_v52  ;;  %6097 = vmatmul.mubr.f32.vlgmr.msra.gmra.mxu0 %v7817_v43  ;;  %v3307_v43 = vsub.f32 %v7912_v25, %v3306_v45 }
 0x3aa   : > { %6110 = vmatprep.subr.mxu0 %v7826_v29  ;;  %6130 = vmatmul.mubr.f32.vlgmr.msra.gmra.mxu1 %v7901_v54 }
 0x3ab   : > { %6143 = vmatprep.subr.mxu1 %v7826_v29  ;;  %6111 = vmatpush3.msra.mxu0 %v7826_v29  ;;  %v3308_v3 = vand.u32 4294901760, %v3307_v43 }
 0x3ac   : > { %6118 = vmatprep.mubr.f32.mxu0 %v3298_v14  ;;  %6144 = vmatpush3.msra.mxu1 %v7826_v29 }
 0x3ad   : > { %6151 = vmatprep.mubr.f32.mxu1 %v3296_v20  ;;  %6112 = vmatprep.subr.mxu0 %v7832_v44  ;;  %v8047_v20 = vsub.f32 %v4962_v9, %v8033_v61 }
 0x3ae   : > { %6145 = vmatprep.subr.mxu1 %v7832_v44  ;;  %6113 = vmatpush3.msra.mxu0 %v7832_v44 }
 0x3af   : > { %6146 = vmatpush3.msra.mxu1 %v7832_v44  ;;  %6114 = vmatprep.subr.mxu0 %v7840_v31  ;;  %v8062_v40 = vand.u32 4294901760, %v8047_v20 }
 0x3b0   : > { %6147 = vmatprep.subr.mxu1 %v7840_v31  ;;  %6115 = vmatpush3.msra.mxu0 %v7840_v31  ;;  %v7938_v1 = vpop.xlane.xlu0 %4945 }
 0x3b1   : > { %6148 = vmatpush3.msra.mxu1 %v7840_v31  ;;  %6116 = vmatprep.subr.mxu0 %v7848_v16  ;;  %v5090_v43 = vsub.f32 %v8047_v20, %v8062_v40 }
 0x3b2   : > { %6149 = vmatprep.subr.mxu1 %v7848_v16  ;;  %6117 = vmatpush3.msra.mxu0 %v7848_v16 }
 0x3b3   : > { %6150 = vmatpush3.msra.mxu1 %v7848_v16  ;;  %6119 = vmatmul.mubr.f32.vlgmr.msra.gmra.mxu0 %v3308_v3  ;;  %v5091_v3 = vand.u32 4294901760, %v5090_v43 }
 0x3b4   : > { %6132 = vmatprep.subr.mxu0 %v7836_v53  ;;  %6152 = vmatmul.mubr.f32.vlgmr.msra.gmra.mxu1 %v3306_v45  ;;  %v4069_v35 = vpop.xlane.xlu0 %4068 }
 0x3b5   : > { %6165 = vmatprep.subr.mxu1 %v7826_v29  ;;  %6133 = vmatpush3.msra.mxu0 %v7836_v53  ;;  %v4073_v57 = vmax.f32 %v4069_v35, 1e-30  ;;  %v6402_v53 = vpop.eup %6401 }
 0x3b6   : > { %6140 = vmatprep.mubr.f32.mxu0 %v7893_v24  ;;  %6166 = vmatpush3.msra.mxu1 %v7826_v29  ;;  %v4216_v29 = vsub.f32 %v7941_v63, %v7957_v49  ;;  %v4080_v62 = vmul.f32 %v6402_v53, %v7776_v47  ;;  %v4224_v47 = vand.u32 4294901760, %v4223_v7 }
 0x3b7   : > { %6173 = vmatprep.mubr.f32.mxu1 %v7867_v36  ;;  %6134 = vmatprep.subr.mxu0 %v7846_v33  ;;  %6403 = vrcp.f32 %v4073_v57 }
 0x3b8   : > { %6167 = vmatprep.subr.mxu1 %v7832_v44  ;;  %6135 = vmatpush3.msra.mxu0 %v7846_v33  ;;  %v4084_v6 = vpop.permute.xlu0 %4083  ;;  %v7987_v33 = vand.u32 4294901760, %v7962_v26  ;;  %v4097_v42 = vsel %vm8422_vm3, %v4080_v62, 0 }
 0x3b9   : > { %6168 = vmatpush3.msra.mxu1 %v7832_v44  ;;  %6136 = vmatprep.subr.mxu0 %v7857_v55  ;;  %v7975_v23 = vand.u32 4294901760, %v4084_v6 }
 0x3ba   : > { %6169 = vmatprep.subr.mxu1 %v7840_v31  ;;  %6137 = vmatpush3.msra.mxu0 %v7857_v55 }
 0x3bb   : > { %6170 = vmatpush3.msra.mxu1 %v7840_v31  ;;  %6138 = vmatprep.subr.mxu0 %v7863_v37  ;;  %v7984_v44 = vsub.f32 %v4084_v6, %v7975_v23  ;;  %v4217_v31 = vand.u32 4294901760, %v4216_v29 }
 0x3bc   : > { %6171 = vmatprep.subr.mxu1 %v7848_v16  ;;  %6139 = vmatpush3.msra.mxu0 %v7863_v37  ;;  %v4948_v37 = vmax.f32 %v7938_v1, 1e-30 }
 0x3bd   : > { %6172 = vmatpush3.msra.mxu1 %v7848_v16  ;;  %6141 = vmatmul.mubr.f32.vlgmr.msra.gmra.mxu0 %v7912_v25  ;;  %v7995_v2 = vand.u32 4294901760, %v7984_v44  ;;  %v4237_v16 = vsub.f32 %v7962_v26, %v7987_v33 }
 0x3be   : > { %6154 = vmatprep.subr.mxu0 %v7853_v34  ;;  %6174 = vmatmul.mubr.f32.vlgmr.msra.gmra.mxu1 %v7901_v54  ;;  %6405 = vrcp.f32 %v4948_v37 }
 0x3bf   : > { %6187 = vmatprep.subr.mxu1 %v4217_v31  ;;  %6155 = vmatpush3.msra.mxu0 %v7853_v34  ;;  %v4230_v55 = vsub.f32 %v7984_v44, %v7995_v2  ;;  %v8008_v34 = vand.u32 4294901760, %v4097_v42  ;;  %v4238_v12 = vand.u32 4294901760, %v4237_v16 }
 0x3c0   : > { %6162 = vmatprep.mubr.f32.mxu0 %v7867_v36  ;;  %6188 = vmatpush3.msra.mxu1 %v4217_v31 }
 0x3c1   : > { %6156 = vmatprep.subr.mxu0 %v7870_v13  ;;  %6189 = vmatprep.subr.mxu1 %v4224_v47  ;;  %v4231_v21 = vand.u32 4294901760, %v4230_v55 }
 0x3c2   : > { %6157 = vmatpush3.msra.mxu0 %v7870_v13  ;;  %6190 = vmatpush3.msra.mxu1 %v4224_v47  ;;  %v8017_v13 = vsub.f32 %v4097_v42, %v8008_v34 }
 0x3c3   : > { %6158 = vmatprep.subr.mxu0 %v7880_v39  ;;  %6191 = vmatprep.subr.mxu1 %v4231_v21 }
 0x3c4   : > { %v6404_v0 = vpop.eup %6403  ;;  %6159 = vmatpush3.msra.mxu0 %v7880_v39  ;;  %6192 = vmatpush3.msra.mxu1 %v4231_v21  ;;  %v4180_v24 = vand.u32 4294901760, %v8017_v13 }
 0x3c5   : > { %6160 = vmatprep.subr.mxu0 %v7889_v58  ;;  %6193 = vmatprep.subr.mxu1 %v4238_v12  ;;  %v4079_v36 = vmul.f32 %v6404_v0, %v7796_v32 }
 0x3c6   : > { %6161 = vmatpush3.msra.mxu0 %v7889_v58  ;;  %6194 = vmatpush3.msra.mxu1 %v4238_v12  ;;  %v4960_v58 = vpop.permute.xlu0 %4959  ;;  %v4181_v50 = vsub.f32 %v8017_v13, %v4180_v24 }
 0x3c7   : > { %6163 = vmatmul.mubr.f32.vlgmr.msra.gmra.mxu0 %v7901_v54  ;;  %6176 = vmatprep.subr.mxu0 %v7926_v28  ;;  %v4094_v60 = vsel %vm8423_vm4, %v4079_v36, 0  ;;  %v8042_v38 = vand.u32 4294901760, %v4960_v58 }
 0x3c8   : > { %6177 = vmatpush3.msra.mxu0 %v7926_v28  ;;  %6209 = vmatprep.subr.mxu1 %v7926_v28  ;;  %v8024_v48 = vand.u32 4294901760, %v4094_v60  ;;  %v4182_v25 = vand.u32 4294901760, %v4181_v50 }
 0x3c9   : > { %6178 = vmatprep.subr.mxu0 %v7932_v5  ;;  %v8055_v52 = vsub.f32 %v4960_v58, %v8042_v38 }
 0x3ca   : > { %6179 = vmatpush3.msra.mxu0 %v7932_v5  ;;  %6195 = vmatprep.mubr.f32.mxu1 %v8024_v48  ;;  %v4169_v51 = vsub.f32 %v4094_v60, %v8024_v48  ;;  %v4956_v10 = vpop.permute.xlu0 %4955 }
 0x3cb   : > { %v4943_v39 = vpop.xlane.xlu1 %4942  ;;  %6180 = vmatprep.subr.mxu0 %v7975_v23  ;;  %6196 = vmatmul.mubr.f32.vlgmr.msra.gmra.mxu1 %v8008_v34  ;;  %v8057_v56 = vand.u32 4294901760, %v4956_v10  ;;  %v6406_v15 = vpop.eup %6405  ;;  %v8076_v27 = vand.u32 4294901760, %v8055_v52 }
 0x3cc   : > { %v4947_v32 = vmax.f32 %v4943_v39, 1e-30  ;;  %6181 = vmatpush3.msra.mxu0 %v7975_v23  ;;  %6210 = vmatpush3.msra.mxu1 %v7926_v28  ;;  %v4170_v8 = vand.u32 4294901760, %v4169_v51  ;;  %v4954_v14 = vmul.f32 %v6406_v15, %v7790_v59 }
 0x3cd   : > { %6182 = vmatprep.subr.mxu0 %v7950_v17  ;;  %6211 = vmatprep.subr.mxu1 %v7932_v5  ;;  %v8071_v18 = vsub.f32 %v4956_v10, %v8057_v56 }
 0x3ce   : > { %6407 = vrcp.f32 %v4947_v32  ;;  %6183 = vmatpush3.msra.mxu0 %v7950_v17  ;;  %6212 = vmatpush3.msra.mxu1 %v7932_v5  ;;  %v4171_v54 = vsub.f32 %v4169_v51, %v4170_v8 }
 0x3cf   : > { %v4958_v30 = vpop.permute.xlu1 %4957  ;;  %6198 = vmatprep.subr.mxu0 %v7941_v63  ;;  %6213 = vmatprep.subr.mxu1 %v7975_v23 }
 0x3d0   : > { %6217 = vmatprep.mubr.f32.mxu1 %v4170_v8  ;;  %6214 = vmatpush3.msra.mxu1 %v7975_v23  ;;  %v4172_v41 = vand.u32 4294901760, %v4171_v54  ;;  %v8050_v4 = vand.u32 4294901760, %v4958_v30 }
 0x3d1   : > { %6215 = vmatprep.subr.mxu1 %v7950_v17 }
 0x3d2   : > { %6216 = vmatpush3.msra.mxu1 %v7950_v17  ;;  %6184 = vmatprep.mubr.f32.mxu0 %v4172_v41  ;;  %v8065_v45 = vsub.f32 %v4958_v30, %v8050_v4 }
 0x3d3   : > { %6218 = vmatmul.mubr.f32.vlgmr.msra.gmra.mxu1 %v4180_v24  ;;  %6231 = vmatprep.subr.mxu1 %v7926_v28 }
 0x3d4   : > { %6185 = vmatmul.mubr.f32.vlgmr.msra.gmra.mxu0 %v4182_v25  ;;  %6232 = vmatpush3.msra.mxu1 %v7926_v28  ;;  %v8087_v1 = vand.u32 4294901760, %v8065_v45 }
 0x3d5   : > { %6199 = vmatpush3.msra.mxu0 %v7941_v63  ;;  %6239 = vmatprep.mubr.f32.mxu1 %v8024_v48  ;;  %v8097_v63 = vand.u32 4294901760, %v8071_v18 }
 0x3d6   : > { %6200 = vmatprep.subr.mxu0 %v7948_v11  ;;  %6206 = vmatprep.mubr.f32.mxu0 %v4169_v51  ;;  %v5104_v35 = vsub.f32 %v8065_v45, %v8087_v1 }
 0x3d7   : > { %6233 = vmatprep.subr.mxu1 %v7932_v5  ;;  %6201 = vmatpush3.msra.mxu0 %v7948_v11  ;;  %v5111_v53 = vsub.f32 %v8071_v18, %v8097_v63 }
 0x3d8   : > { %6234 = vmatpush3.msra.mxu1 %v7932_v5  ;;  %6202 = vmatprep.subr.mxu0 %v7984_v44  ;;  %v5097_v5 = vsub.f32 %v8055_v52, %v8076_v27 }
 0x3d9   : > { %6235 = vmatprep.subr.mxu1 %v7975_v23  ;;  %6203 = vmatpush3.msra.mxu0 %v7984_v44 }
 0x3da   : > { %6236 = vmatpush3.msra.mxu1 %v7975_v23  ;;  %6204 = vmatprep.subr.mxu0 %v7962_v26  ;;  %v5112_v23 = vand.u32 4294901760, %v5111_v53 }
 0x3db   : > { %v6408_v28 = vpop.eup %6407  ;;  %6237 = vmatprep.subr.mxu1 %v7950_v17  ;;  %6205 = vmatpush3.msra.mxu0 %v7962_v26 }
 0x3dc   : > { %v4953_v22 = vmul.f32 %v6408_v28, %v7801_v46  ;;  %v4971_v46 = vsel %vm8425_vm10, %v4954_v14, 0  ;;  %6238 = vmatpush3.msra.mxu1 %v7950_v17  ;;  %6207 = vmatmul.mubr.f32.vlgmr.msra.gmra.mxu0 %v8017_v13  ;;  %v5098_v17 = vand.u32 4294901760, %v5097_v5 }
 0x3dd   : > { %6220 = vmatprep.subr.mxu0 %v7957_v49  ;;  %6240 = vmatmul.mubr.f32.vlgmr.msra.gmra.mxu1 %v8008_v34  ;;  %v8109_v57 = vand.u32 4294901760, %v4971_v46 }
 0x3de   : > { %v4968_v59 = vsel %vm8424_vm6, %v4953_v22, 0  ;;  %6253 = vmatprep.subr.mxu1 %v5091_v3  ;;  %6221 = vmatpush3.msra.mxu0 %v7957_v49  ;;  %v5105_v49 = vand.u32 4294901760, %v5104_v35 }
 0x3df   : > { %v8102_v11 = vand.u32 4294901760, %v4968_v59  ;;  %6228 = vmatprep.mubr.f32.mxu0 %v8024_v48  ;;  %6254 = vmatpush3.msra.mxu1 %v5091_v3  ;;  %v5053_v29 = vsub.f32 %v4971_v46, %v8109_v57 }
 0x3e0   : > { %6222 = vmatprep.subr.mxu0 %v7967_v19  ;;  %6255 = vmatprep.subr.mxu1 %v5098_v17 }
 0x3e1   : > { %v5043_v26 = vsub.f32 %v4968_v59, %v8102_v11  ;;  %6261 = vmatprep.mubr.f32.mxu1 %v8102_v11  ;;  %6223 = vmatpush3.msra.mxu0 %v7967_v19  ;;  %v5054_v19 = vand.u32 4294901760, %v5053_v29 }
 0x3e2   : > { %6256 = vmatpush3.msra.mxu1 %v5098_v17  ;;  %6224 = vmatprep.subr.mxu0 %v7995_v2 }
 0x3e3   : > { %v5044_v6 = vand.u32 4294901760, %v5043_v26  ;;  %6257 = vmatprep.subr.mxu1 %v5105_v49  ;;  %6225 = vmatpush3.msra.mxu0 %v7995_v2 }
 0x3e4   : > { %6258 = vmatpush3.msra.mxu1 %v5105_v49  ;;  %6226 = vmatprep.subr.mxu0 %v7987_v33 }
 0x3e5   : > { %v5045_v7 = vsub.f32 %v5043_v26, %v5044_v6  ;;  %6259 = vmatprep.subr.mxu1 %v5112_v23  ;;  %6227 = vmatpush3.msra.mxu0 %v7987_v33  ;;  %v5055_v33 = vsub.f32 %v5053_v29, %v5054_v19 }
 0x3e6   : > { %6260 = vmatpush3.msra.mxu1 %v5112_v23  ;;  %6229 = vmatmul.mubr.f32.vlgmr.msra.gmra.mxu0 %v8008_v34 }
 0x3e7   : > { %6242 = vmatprep.subr.mxu0 %v8033_v61  ;;  %6262 = vmatmul.mubr.f32.vlgmr.msra.gmra.mxu1 %v8109_v57  ;;  %v5046_v44 = vand.u32 4294901760, %v5045_v7  ;;  %v5056_v62 = vand.u32 4294901760, %v5055_v33 }
 0x3e8   : > { %6275 = vmatprep.subr.mxu1 %v8033_v61  ;;  %6243 = vmatpush3.msra.mxu0 %v8033_v61 }
 0x3e9   : > { %6250 = vmatprep.mubr.f32.mxu0 %v5046_v44  ;;  %6276 = vmatpush3.msra.mxu1 %v8033_v61 }
 0x3ea   : > { %6283 = vmatprep.mubr.f32.mxu1 %v5044_v6  ;;  %6244 = vmatprep.subr.mxu0 %v8042_v38 }
 0x3eb   : > { %6277 = vmatprep.subr.mxu1 %v8042_v38  ;;  %6245 = vmatpush3.msra.mxu0 %v8042_v38 }
 0x3ec   : > { %6278 = vmatpush3.msra.mxu1 %v8042_v38  ;;  %6246 = vmatprep.subr.mxu0 %v8050_v4 }
 0x3ed   : > { %6279 = vmatprep.subr.mxu1 %v8050_v4  ;;  %6247 = vmatpush3.msra.mxu0 %v8050_v4 }
 0x3ee   : > { %6280 = vmatpush3.msra.mxu1 %v8050_v4  ;;  %6248 = vmatprep.subr.mxu0 %v8057_v56 }
 0x3ef   : > { %6281 = vmatprep.subr.mxu1 %v8057_v56  ;;  %6249 = vmatpush3.msra.mxu0 %v8057_v56 }
 0x3f0   : > { %6282 = vmatpush3.msra.mxu1 %v8057_v56  ;;  %6251 = vmatmul.mubr.f32.vlgmr.msra.gmra.mxu0 %v5056_v62 }
 0x3f1   : > { %6264 = vmatprep.subr.mxu0 %v8047_v20  ;;  %6284 = vmatmul.mubr.f32.vlgmr.msra.gmra.mxu1 %v5054_v19 }
 0x3f2   : > { %6297 = vmatprep.subr.mxu1 %v8033_v61  ;;  %6265 = vmatpush3.msra.mxu0 %v8047_v20 }
 0x3f3   : > { %6272 = vmatprep.mubr.f32.mxu0 %v5043_v26  ;;  %6298 = vmatpush3.msra.mxu1 %v8033_v61 }
 0x3f4   : > { %6305 = vmatprep.mubr.f32.mxu1 %v8102_v11  ;;  %6266 = vmatprep.subr.mxu0 %v8055_v52 }
 0x3f5   : > { %6299 = vmatprep.subr.mxu1 %v8042_v38  ;;  %6267 = vmatpush3.msra.mxu0 %v8055_v52 }
 0x3f6   : > { %6300 = vmatpush3.msra.mxu1 %v8042_v38  ;;  %6268 = vmatprep.subr.mxu0 %v8065_v45 }
 0x3f7   : > { %6301 = vmatprep.subr.mxu1 %v8050_v4  ;;  %6269 = vmatpush3.msra.mxu0 %v8065_v45 }
 0x3f8   : > { %6302 = vmatpush3.msra.mxu1 %v8050_v4  ;;  %6270 = vmatprep.subr.mxu0 %v8071_v18 }
 0x3f9   : > { %6303 = vmatprep.subr.mxu1 %v8057_v56  ;;  %6271 = vmatpush3.msra.mxu0 %v8071_v18 }
 0x3fa   : > { %6304 = vmatpush3.msra.mxu1 %v8057_v56  ;;  %6273 = vmatmul.mubr.f32.vlgmr.msra.gmra.mxu0 %v5053_v29 }
 0x3fb   : > { %6286 = vmatprep.subr.mxu0 %v8062_v40  ;;  %6306 = vmatmul.mubr.f32.vlgmr.msra.gmra.mxu1 %v8109_v57 }
 0x3fc   : > { %6287 = vmatpush3.msra.mxu0 %v8062_v40  ;;  %6294 = vmatprep.mubr.f32.mxu0 %v8102_v11 }
 0x3fd   : > { %6288 = vmatprep.subr.mxu0 %v8076_v27 }
 0x3fe   : > { %6289 = vmatpush3.msra.mxu0 %v8076_v27 }
 0x3ff   : > { %6290 = vmatprep.subr.mxu0 %v8087_v1 }
 0x400   : > { %6291 = vmatpush3.msra.mxu0 %v8087_v1 }
 0x401   : > { %6292 = vmatprep.subr.mxu0 %v8097_v63 }
 0x402   : > { %6293 = vmatpush3.msra.mxu0 %v8097_v63 }
 0x403   : > { %6295 = vmatmul.mubr.f32.vlgmr.msra.gmra.mxu0 %v8109_v57 }
 0x44e   : > { %v6065_v31 = vpop.f32.mrf.mxu1 }
 0x450   : > { %v2523_v55 = vpop.f32.mrf.mxu1 }
 0x456   : > { %v6087_v21 = vpop.f32.mrf.mxu1 }
 0x457   : > { %v6054_v2 = vpop.f32.mrf.mxu0 }
 0x458   : > { %v2530_v47 = vadd.f32 %v6065_v31, %v6054_v2  ;;  %v2693_v36 = vpop.f32.mrf.mxu1 }
 0x459   : > { %v2422_v16 = vpop.f32.mrf.mxu0 }
 0x45a   : > { %v2524_v42 = vadd.f32 %v2523_v55, %v2422_v16 }
 0x45f   : > { %v6076_v34 = vpop.f32.mrf.mxu0 }
 0x460   : > { %v2617_v37 = vadd.f32 %v6076_v34, %v2530_v47  ;;  %v6109_v60 = vpop.f32.mrf.mxu1 }
 0x461   : > { %v2609_v12 = vpop.f32.mrf.mxu0 }
 0x462   : > { %v2610_v0 = vadd.f32 %v2609_v12, %v2524_v42  ;;  %v2702_v9 = vadd.f32 %v6087_v21, %v2617_v37  ;;  %v2865_v24 = vpop.f32.mrf.mxu1 }
 0x464   : > { %v2694_v13 = vadd.f32 %v2693_v36, %v2610_v0 }
 0x469   : > { %v6098_v39 = vpop.f32.mrf.mxu0 }
 0x46a   : > { %v2791_v48 = vadd.f32 %v6098_v39, %v2702_v9  ;;  %v6131_v30 = vpop.f32.mrf.mxu1 }
 0x46b   : > { %v2784_v32 = vpop.f32.mrf.mxu0 }
 0x46c   : > { %v8169_v58 = vadd.f32 %v6109_v60, %v2791_v48  ;;  %v2785_v51 = vadd.f32 %v2784_v32, %v2694_v13  ;;  %v3401_v38 = vpop.f32.mrf.mxu1 }
 0x46e   : > { %v8171_v61 = vadd.f32 %v2865_v24, %v2785_v51 }
 0x473   : > { %v6120_v8 = vpop.f32.mrf.mxu0 }
 0x474   : > { %v3408_v20 = vadd.f32 %v6131_v30, %v6120_v8  ;;  %v6153_v10 = vpop.f32.mrf.mxu1 }
 0x475   : > { %v3300_v54 = vpop.f32.mrf.mxu0 }
 0x476   : > { %v3402_v4 = vadd.f32 %v3401_v38, %v3300_v54  ;;  %v3571_v56 = vpop.f32.mrf.mxu1 }
 0x47d   : > { %v6142_v50 = vpop.f32.mrf.mxu0 }
 0x47e   : > { %v3495_v25 = vadd.f32 %v6142_v50, %v3408_v20  ;;  %v6175_v40 = vpop.f32.mrf.mxu1 }
 0x47f   : > { %v3487_v41 = vpop.f32.mrf.mxu0 }
 0x480   : > { %v3488_v52 = vadd.f32 %v3487_v41, %v3402_v4  ;;  %v3580_v15 = vadd.f32 %v6153_v10, %v3495_v25  ;;  %v3743_v22 = vpop.f32.mrf.mxu1 }
 0x482   : > { %v3572_v27 = vadd.f32 %v3571_v56, %v3488_v52 }
 0x487   : > { %v6164_v45 = vpop.f32.mrf.mxu0 }
 0x488   : > { %v3669_v18 = vadd.f32 %v6164_v45, %v3580_v15 }
 0x489   : > { %v3662_v14 = vpop.f32.mrf.mxu0 }
 0x48a   : > { %v3750_v28 = vadd.f32 %v6175_v40, %v3669_v18  ;;  %v3663_v43 = vadd.f32 %v3662_v14, %v3572_v27 }
 0x48b   : > { %v6197_v5 = vpop.f32.mrf.mxu1 }
 0x48c   : > { %v3744_v1 = vadd.f32 %v3743_v22, %v3663_v43  ;;  %5505 = vrot.lane.b32.xlu0 %v3750_v28, %s6534_s25 }
 0x48d   : > { %v4275_v3 = vpop.f32.mrf.mxu1 }
 0x48e   : > { %5503 = vrot.lane.b32.xlu1 %v3744_v1, %s6534_s25 }
 0x493   : > { %v6219_v35 = vpop.f32.mrf.mxu1 }
 0x494   : > { %v6186_v59 = vpop.f32.mrf.mxu0 }
 0x495   : > { %v4282_v11 = vadd.f32 %v6197_v5, %v6186_v59  ;;  %v4445_v6 = vpop.f32.mrf.mxu1 }
 0x496   : > { %v4174_v63 = vpop.f32.mrf.mxu0 }
 0x497   : > { %v4276_v26 = vadd.f32 %v4275_v3, %v4174_v63 }
 0x49c   : > { %v6208_v46 = vpop.f32.mrf.mxu0 }
 0x49d   : > { %v4369_v17 = vadd.f32 %v6208_v46, %v4282_v11  ;;  %v6241_v29 = vpop.f32.mrf.mxu1 }
 0x49e   : > { %v4361_v57 = vpop.f32.mrf.mxu0 }
 0x49f   : > { %v4362_v53 = vadd.f32 %v4361_v57, %v4276_v26  ;;  %v4454_v49 = vadd.f32 %v6219_v35, %v4369_v17  ;;  %v4617_v31 = vpop.f32.mrf.mxu1 }
 0x4a1   : > { %v4446_v19 = vadd.f32 %v4445_v6, %v4362_v53 }
 0x4a6   : > { %v6230_v23 = vpop.f32.mrf.mxu0 }
 0x4a7   : > { %v4543_v7 = vadd.f32 %v6230_v23, %v4454_v49  ;;  %v6263_v55 = vpop.f32.mrf.mxu1 }
 0x4a8   : > { %v4536_v44 = vpop.f32.mrf.mxu0 }
 0x4a9   : > { %v4624_v33 = vadd.f32 %v6241_v29, %v4543_v7  ;;  %v4537_v62 = vadd.f32 %v4536_v44, %v4446_v19  ;;  %v5149_v21 = vpop.f32.mrf.mxu1 }
 0x4ab   : > { %v4618_v2 = vadd.f32 %v4617_v31, %v4537_v62  ;;  %5513 = vrot.lane.b32.xlu0 %v4624_v33, %s6535_s19 }
 0x4ad   : > { %5511 = vrot.lane.b32.xlu1 %v4618_v2, %s6535_s19  ;;  %s6462_s19 = scalar_lea.vmem %s6461_s26, 512 }
 0x4ae   : > { %p6464_p8 = scmp.lt.s32.totalorder %s6462_s19, %s6456_s27 }
 0x4b0   : > { %v6252_v47 = vpop.f32.mrf.mxu0  ;;  %p6465_p10 = por %p6464_p8, %p6463_p7 }
 0x4b1   : > { %v5156_v34 = vadd.f32 %v6263_v55, %v6252_v47  ;;  %v6285_v37 = vpop.f32.mrf.mxu1 }
 0x4b2   : > { %v5048_v16 = vpop.f32.mrf.mxu0  ;;  %p6466_p0 = pnand %p6465_p10, %p6459_p5 }
 0x4b3   : > { %v5150_v0 = vadd.f32 %v5149_v21, %v5048_v16  ;;  %v5319_v13 = vpop.f32.mrf.mxu1 }
 0x4ba   : > { %v6274_v42 = vpop.f32.mrf.mxu0 }
 0x4bb   : > { %v5243_v9 = vadd.f32 %v6274_v42, %v5156_v34  ;;  %v6307_v39 = vpop.f32.mrf.mxu1 }
 0x4bc   : > { %v5235_v12 = vpop.f32.mrf.mxu0 }
 0x4bd   : > { %v5236_v36 = vadd.f32 %v5235_v12, %v5150_v0  ;;  %v5328_v60 = vadd.f32 %v6285_v37, %v5243_v9  ;;  %v5491_v54 = vpop.f32.mrf.mxu1 }
 0x4bf   : > { %v5320_v51 = vadd.f32 %v5319_v13, %v5236_v36 }
 0x4c3   : > { %v6296_v48 = vpop.f32.mrf.mxu0 }
 0x4c4   : > { %v5417_v32 = vadd.f32 %v6296_v48, %v5328_v60 }
 0x4c5   : > { %v5410_v24 = vpop.f32.mrf.mxu0 }
 0x4c6   : > { %v5498_v8 = vadd.f32 %v6307_v39, %v5417_v32  ;;  %v5411_v30 = vadd.f32 %v5410_v24, %v5320_v51 }
 0x4c8   : > { %v5492_v50 = vadd.f32 %v5491_v54, %v5411_v30  ;;  %5521 = vrot.lane.b32.xlu0 %v5498_v8, %s6536_s28 }
 0x4ca   : > { %5519 = vrot.lane.b32.xlu1 %v5492_v50, %s6536_s28 }
 0x4fe   : > { %v5506_v38 = vpop.permute.xlu0 %5505 }
 0x4ff   : > { %v5527_v4 = vsel %vm5525_vm0, %v8169_v58, %v5506_v38 }
 0x500   : > { %v5504_v20 = vpop.permute.xlu1 %5503 }
 0x501   : > { %v5526_v56 = vsel %vm5525_vm0, %v8171_v61, %v5504_v20 }
 0x51d   : > { %v5514_v10 = vpop.permute.xlu0 %5513 }
 0x51e   : > { %v5529_v25 = vsel %vm8426_vm13, %v5527_v4, %v5514_v10 }
 0x51f   : > { %v5512_v41 = vpop.permute.xlu1 %5511 }
 0x520   : > { %v5528_v40 = vsel %vm8427_vm14, %v5526_v56, %v5512_v41 }
 0x53a   : > { %v5522_v52 = vpop.permute.xlu0 %5521 }
 0x53b   : > { %v5532_v15 = vsel %vm5530_vm2, %v5529_v25, %v5522_v52 }
 0x53c   : > { %v5537_v45 = vmul.f32 1.442695, %v5532_v15  ;;  %v5520_v18 = vpop.permute.xlu1 %5519  ;;  %vm5534_vm15 = vcmp.gt.f32.partialorder %v5532_v15, 0.0 }
 0x53d   : > { %v5531_v27 = vsel %vm5530_vm2, %v5528_v40, %v5520_v18 }
 0x53e   : > { %6409 = vpow2.f32 %v5537_v45  ;;  %v5535_v14 = vmul.f32 1.442695, %v5531_v27  ;;  %vm5533_vm7 = vcmp.gt.f32.partialorder %v5531_v27, 0.0 }
 0x540   : > { %6411 = vpow2.f32 %v5535_v14 }
 0x54b   : > { %v6410_v28 = vpop.eup %6409 }
 0x54c   : > { %v5670_v58 = vadd.f32 -1.0, %v6410_v28 }
 0x54d   : > { %v6412_v43 = vpop.eup %6411 }
 0x54e   : > { %v5542_v61 = vsel %vm5534_vm15, %v5532_v15, %v5670_v58  ;;  %v5669_v22 = vadd.f32 -1.0, %v6412_v43 }
 0x54f   : > { %5544 = vst.msk [vmem:[%s382_s16 + $0x8] sm:$0xff] %vm8428_vm5, %v5542_v61 }
 0x550   : > { %v5541_v1 = vsel %vm5533_vm7, %v5531_v27, %v5669_v22 }
 0x551   : > { %5543 = vst.msk [vmem:[%s382_s16] sm:$0xff] %vm8429_vm8, %v5541_v1 }
 0x552   : > { %6469 = shalt.err (!%p6466_p0)
}
 0x553   : > { %s6470_s28 = scalar_lea.hbm %s8187_s18, 256  ;;  %s6474_s29 = scalar_lea.hbm %s8241_s9, 512 }
 0x554   : > { %p6471_p2 = scmp.ne.s32.totalorder %s8187_s18, %s6470_s28  ;;  %p6475_p3 = scmp.lt.s32.totalorder %s8187_s18, %s8241_s9 }
 0x555   : > { %p6476_p6 = scmp.lt.s32.totalorder %s6474_s29, %s6470_s28 }
 0x556   : > { %p6472_p9 = pnand %p6471_p2, %p8430_p13 }
 0x557   : > { %p6477_p11 = por %p6476_p6, %p6475_p3 }
 0x558   : > { %p6473_p1 = pneg %p6472_p9 }
 0x55a   : > { %p6478_p12 = pnand %p6477_p11, %p6473_p1 }
 0x55c   : > { %6481 = shalt.err (!%p6478_p12)
}
 0x55d   : > { %s6538_s27 = smov 128  }
 0x55e   : > { %6310 = dma.vmem_to_hbm [thread:$0]  (%p8430_p13), %s8181_s17, 256, %s8187_s18, %s5546_s13, %s6538_s27, %s6538_s27, %s6534_s25  }
 0x55f PF: > { %s5574_s23 = sand.u32 1, %s6508_s30   ;;  %p8431_p4 = scmp.ne.s32.totalorder %s8293_s22, 0 }
 0x560   : > { %p8432_p5 = scmp.ge.s32.totalorder %s6520_s12, 2  ;;  %s5575_s26 = scalar_lea.sflag [#allocation4], %s5574_s23 }
 0x562   : > { %p6317_p7 = pnand %p8432_p5, %p8431_p4 }
 0x564   : > { %p6318_p8 = pneg %p6317_p7 }
 0x566   : > { %6503 = dma.done.wait (%p6318_p8), %s5575_s26, 256  }
 0x567   : > { %6505 = vsyncadd (%p6318_p8), %s5575_s26, 4294967040  ;;  %s8433_s21 = sld [smem:[#allocation8_spill]]  ;;  %p22_p10 = scmp.ge.s32.totalorder %s6614_s15, 4  }
 0x568   : > { %s8434_s11 = sld [smem:[#allocation9_spill]]  ;;  %s8435_s30 = smov %s6512_s10 }
 0x569   : > { %s8437_s12 = smov %s6614_s15  ;;  %24 = sbr.rel (!%p22_p10) target bundleno = 5 (0x5), region = 107 }
 0x56d   : > { %s8436_s10 = smov %s8433_s21 }
 0x56e   :  { %5580 = vsyncpa [#allocation3], 1 }
 0x56f   :  { %5582 = vsyncpa [#allocation3 + $0x1], 1 }
 0x570   :  { %5583 = vsyncpa [#allocation4], 1 }
 0x571   :  { %5585 = vsyncpa [#allocation4 + $0x1], 1 }

</bundles_post_ra>
